<compile_context>
chip_gen: v7x
topology: tpu7x:2x2x1
jax: 0.10.0
libtpu: 0.0.40
codegen_flags: <defaults>
</compile_context>

<pallas_src>
from functools import partial

import jax
import jax.numpy as jnp
from jax.experimental import pallas as pl
from jax.experimental.pallas import tpu as pltpu


PADW = 8  # left/right column padding of the conv2 scratch (sublane-aligned)


def _bottleneck_kernel(x_ref, w1_ref, b1_ref, w2_ref, b2_ref, w3_ref, b3_ref,
                       out_ref, hp_ref, *, H, W):
    """One batch element per grid step.

    x_ref  : (1, H, W, Cin)  bf16        NHWC input tile
    w1_ref : (Cin, Cmid)     bf16        1x1 conv weight (BN scale folded in)
    w2_ref : (3, 3, Cmid, Cmid) bf16     3x3 conv weight, HWIO (BN folded)
    w3_ref : (Cmid, Cout)    bf16        1x1 conv weight (BN folded)
    b*_ref : (1, C)          f32         folded BN biases
    out_ref: (1, H, W, Cout) f32
    hp_ref : (H+2, W+2*PADW, Cmid) bf16  padded conv2 input scratch
    """
    Cin = x_ref.shape[-1]
    Cmid = w1_ref.shape[1]
    Cout = w3_ref.shape[1]
    Wp = W + 2 * PADW

    # Zero only the halo of the padded scratch (interior is fully overwritten
    # below).  Done every step with cheap, aligned strip stores so the kernel
    # stays correct even when the "parallel" grid axis is sharded over cores.
    zrow = jnp.zeros((1, Wp, Cmid), hp_ref.dtype)
    hp_ref[0:1, :, :] = zrow
    hp_ref[H + 1:H + 2, :, :] = zrow
    zcol = jnp.zeros((H, PADW, Cmid), hp_ref.dtype)
    hp_ref[1:H + 1, 0:PADW, :] = zcol
    hp_ref[1:H + 1, PADW + W:Wp, :] = zcol

    # ---- conv1 (1x1, BN scale folded) + bias + ReLU: one whole-image matmul.
    x2d = x_ref[0].reshape(H * W, Cin)                           # bf16
    h1 = jnp.dot(x2d, w1_ref[...], preferred_element_type=jnp.float32)
    h1 = jnp.maximum(h1 + b1_ref[...], 0.0)
    # Single sublane-aligned store into the padded conv2 input buffer.
    hp_ref[1:H + 1, PADW:PADW + W, :] = (
        h1.reshape(H, W, Cmid).astype(hp_ref.dtype))

    # ---- conv2 (3x3, stride=1, pad=1) + bias + ReLU: 9 tap matmuls, M=H*W.
    acc = jnp.zeros((H * W, Cmid), jnp.float32)
    for ky in range(3):
        for kx in range(3):
            c0 = PADW - 1 + kx
            win = hp_ref[ky:ky + H, c0:c0 + W, :]                # (H, W, Cmid)
            acc = acc + jnp.dot(win.reshape(H * W, Cmid), w2_ref[ky, kx],
                                preferred_element_type=jnp.float32)
    h2 = jnp.maximum(acc + b2_ref[...], 0.0).astype(jnp.bfloat16)

    # ---- conv3 (1x1) + bias + residual + ReLU: one matmul, one dense store.
    h3 = jnp.dot(h2, w3_ref[...], preferred_element_type=jnp.float32)
    h3 = h3 + b3_ref[...] + x2d.astype(jnp.float32)
    out_ref[...] = (jnp.maximum(h3, 0.0)
                    .reshape(1, H, W, Cout).astype(out_ref.dtype))


# --------------------------- parameter preparation ---------------------------
def _fold_bn(gamma, beta, mean, var, eps=1e-5):
    s = gamma / jnp.sqrt(var + eps)
    b = beta - mean * s
    return s.astype(jnp.float32), b.astype(jnp.float32)


def _prepare(params):
    """Fold eval-mode BN scales into conv weights; return bf16 weights and
    f32 per-channel biases in the layouts the kernel expects."""
    s1, b1 = _fold_bn(*params["bn1"])
    s2, b2 = _fold_bn(*params["bn2"])
    s3, b3 = _fold_bn(*params["bn3"])
    w1 = jnp.transpose(params["conv1_w"][:, :, 0, 0], (1, 0)) * s1[None, :]
    w2 = jnp.transpose(params["conv2_w"], (2, 3, 1, 0)) * s2[None, None, None, :]
    w3 = jnp.transpose(params["conv3_w"][:, :, 0, 0], (1, 0)) * s3[None, :]
    return (w1.astype(jnp.bfloat16), b1[None, :],
            w2.astype(jnp.bfloat16), b2[None, :],
            w3.astype(jnp.bfloat16), b3[None, :])


def _ceil_to(v, m):
    return -(-v // m) * m


def _vmem_block_bytes(shape, dtype):
    s = list(shape)
    s[-1] = max(_ceil_to(s[-1], 128), 128)
    if len(s) >= 2:
        s[-2] = max(_ceil_to(s[-2], 8), 8)
    n = 1
    for d in s:
        n *= d
    return n * jnp.dtype(dtype).itemsize


# --------------------------------- wrapper -----------------------------------
def bottleneck_pallas(x_nchw, params):
    """Forward pass of the Bottleneck block.  x_nchw: (N, Cin, H, W)."""
    x = jnp.transpose(x_nchw, (0, 2, 3, 1)).astype(jnp.bfloat16)   # NHWC bf16
    N, H, W, Cin = x.shape
    w1, b1, w2, b2, w3, b3 = _prepare(params)
    Cmid = w1.shape[1]
    Cout = w3.shape[1]
    assert Cin == Cout, "downsample=None requires in_channel == out_channel*4"
    assert W % 8 == 0, "W must be sublane-aligned for flattened matmuls"

    full = lambda shape: pl.BlockSpec(shape, lambda n, _s=shape: (0,) * len(_s))

    # VMEM footprint estimate -> explicit scoped-VMEM limit (with headroom).
    io_blocks = [
        ((1, H, W, Cin), jnp.bfloat16), ((1, H, W, Cout), jnp.float32),
        ((Cin, Cmid), jnp.bfloat16), ((1, Cmid), jnp.float32),
        ((3, 3, Cmid, Cmid), jnp.bfloat16), ((1, Cmid), jnp.float32),
        ((Cmid, Cout), jnp.bfloat16), ((1, Cout), jnp.float32),
    ]
    scratch_bytes = _vmem_block_bytes((H + 2, W + 2 * PADW, Cmid), jnp.bfloat16)
    footprint = (2 * sum(_vmem_block_bytes(s, d) for s, d in io_blocks)
                 + scratch_bytes)
    vmem_limit = int(min(96 << 20, max(32 << 20, 2 * footprint + (4 << 20))))

    out_nhwc = pl.pallas_call(
        partial(_bottleneck_kernel, H=H, W=W),
        out_shape=jax.ShapeDtypeStruct((N, H, W, Cout), jnp.float32),
        grid=(N,),
        in_specs=[
            pl.BlockSpec((1, H, W, Cin), lambda n: (n, 0, 0, 0)),
            full((Cin, Cmid)), full((1, Cmid)),
            full((3, 3, Cmid, Cmid)), full((1, Cmid)),
            full((Cmid, Cout)), full((1, Cout)),
        ],
        out_specs=pl.BlockSpec((1, H, W, Cout), lambda n: (n, 0, 0, 0)),
        scratch_shapes=[
            pltpu.VMEM((H + 2, W + 2 * PADW, Cmid), jnp.bfloat16),
        ],
        compiler_params=pltpu.CompilerParams(
            dimension_semantics=("parallel",),
            vmem_limit_bytes=vmem_limit),
    )(x, w1, b1, w2, b2, w3, b3)

    return jnp.transpose(out_nhwc, (0, 3, 1, 2))                  # back to NCHW


# ---------------------------- pure-JAX reference -----------------------------
def bottleneck_ref(x_nchw, params):
    """Reference mirroring the kernel's bf16-operand / f32-accumulate numerics
    (same folded eval-mode BN)."""
    x = jnp.transpose(x_nchw, (0, 2, 3, 1)).astype(jnp.bfloat16)
    w1, b1, w2, b2, w3, b3 = _prepare(params)

    def conv(h_bf16, w_bf16, pad):
        return jax.lax.conv_general_dilated(
            h_bf16.astype(jnp.float32), w_bf16.astype(jnp.float32),
            window_strides=(1, 1), padding=[(pad, pad), (pad, pad)],
            dimension_numbers=("NHWC", "HWIO", "NHWC"),
            precision=jax.lax.Precision.HIGHEST)

    w1h = w1.reshape(1, 1, *w1.shape)
    w3h = w3.reshape(1, 1, *w3.shape)
    h = jnp.maximum(conv(x, w1h, 0) + b1, 0.0).astype(jnp.bfloat16)
    h = jnp.maximum(conv(h, w2, 1) + b2, 0.0).astype(jnp.bfloat16)
    h = conv(h, w3h, 0) + b3 + x.astype(jnp.float32)
    return jnp.transpose(jnp.maximum(h, 0.0), (0, 3, 1, 2))


# ---------------------------------- driver -----------------------------------
def make_params(key, in_channel, out_channel):
    expansion = 4
    c_exp = out_channel * expansion
    ks = jax.random.split(key, 16)

    def conv_init(k, shape):
        fan_in = shape[1] * shape[2] * shape[3]
        return jax.random.normal(k, shape, jnp.float32) / jnp.sqrt(fan_in)

    def bn_init(k, c):
        k1, k2, k3, k4 = jax.random.split(k, 4)
        gamma = jax.random.uniform(k1, (c,), jnp.float32, 0.5, 1.5)
        beta = 0.1 * jax.random.normal(k2, (c,), jnp.float32)
        mean = 0.1 * jax.random.normal(k3, (c,), jnp.float32)
        var = jax.random.uniform(k4, (c,), jnp.float32, 0.5, 1.5)
        return (gamma, beta, mean, var)

    return {
        "conv1_w": conv_init(ks[0], (out_channel, in_channel, 1, 1)),
        "bn1": bn_init(ks[1], out_channel),
        "conv2_w": conv_init(ks[2], (out_channel, out_channel, 3, 3)),
        "bn2": bn_init(ks[3], out_channel),
        "conv3_w": conv_init(ks[4], (c_exp, out_channel, 1, 1)),
        "bn3": bn_init(ks[5], c_exp),
    }


if __name__ == "__main__":
    key = jax.random.PRNGKey(0)
    k_x, k_p = jax.random.split(key)

    N, in_channel, out_channel, H, W = 2, 16, 4, 16, 16   # in = out*expansion
    x = jax.random.normal(k_x, (N, in_channel, H, W), jnp.float32)
    params = make_params(k_p, in_channel, out_channel)

    out = jax.block_until_ready(bottleneck_pallas(x, params))
    ref = jax.block_until_ready(bottleneck_ref(x, params))

    assert out.shape == (N, out_channel * 4, H, W), out.shape
    assert jnp.allclose(out, ref, atol=1e-2, rtol=1e-2), (
        float(jnp.max(jnp.abs(out - ref))))
    print("KERNEL_OK")
</pallas_src>

<mosaic_0001>
module attributes {stable_mosaic.version = 11 : i64} {
  func.func @_bottleneck_kernel(%arg0: i32, %arg1: memref<1x16x16x16xbf16, #tpu.memory_space<vmem>>, %arg2: memref<16x4xbf16, #tpu.memory_space<vmem>>, %arg3: memref<1x4xf32, #tpu.memory_space<vmem>>, %arg4: memref<3x3x4x4xbf16, #tpu.memory_space<vmem>>, %arg5: memref<1x4xf32, #tpu.memory_space<vmem>>, %arg6: memref<4x16xbf16, #tpu.memory_space<vmem>>, %arg7: memref<1x16xf32, #tpu.memory_space<vmem>>, %arg8: memref<1x16x16x16xf32, #tpu.memory_space<vmem>>, %arg9: memref<18x32x4xbf16, #tpu.memory_space<vmem>>) attributes {dimension_semantics = [#tpu.dimension_semantics<parallel>], iteration_bounds = array<i64: 2>, scalar_prefetch = 0 : i64, scratch_operands = 1 : i64, tpu.core_type = #tpu.core_type<tc>, window_params = [{transform_indices = @transform_0, window_bounds = array<i64: 1, 16, 16, 16>}, {pipeline_mode = #tpu.pipeline_mode<synchronous>, transform_indices = @transform_1, window_bounds = array<i64: 16, 4>}, {pipeline_mode = #tpu.pipeline_mode<synchronous>, transform_indices = @transform_2, window_bounds = array<i64: 1, 4>}, {pipeline_mode = #tpu.pipeline_mode<synchronous>, transform_indices = @transform_3, window_bounds = array<i64: 3, 3, 4, 4>}, {pipeline_mode = #tpu.pipeline_mode<synchronous>, transform_indices = @transform_4, window_bounds = array<i64: 1, 4>}, {pipeline_mode = #tpu.pipeline_mode<synchronous>, transform_indices = @transform_5, window_bounds = array<i64: 4, 16>}, {pipeline_mode = #tpu.pipeline_mode<synchronous>, transform_indices = @transform_6, window_bounds = array<i64: 1, 16>}, {transform_indices = @transform_7, window_bounds = array<i64: 1, 16, 16, 16>}]} {
    %cst = arith.constant 0.000000e+00 : bf16
    %0 = vector.broadcast %cst : bf16 to vector<1x32x4xbf16>
    %c0 = arith.constant 0 : index
    %c0_0 = arith.constant 0 : index
    %c0_1 = arith.constant 0 : index
    %1 = vector.load %arg9[%c0, %c0_0, %c0_1] : memref<18x32x4xbf16, #tpu.memory_space<vmem>>, vector<1x32x4xbf16>
    tpu.vector_store %arg9[%c0, %c0_0, %c0_1], %0 {strides = array<i32>} : memref<18x32x4xbf16, #tpu.memory_space<vmem>>, vector<1x32x4xbf16>,
    %c17 = arith.constant 17 : index
    %c0_2 = arith.constant 0 : index
    %c0_3 = arith.constant 0 : index
    %2 = vector.load %arg9[%c17, %c0_2, %c0_3] : memref<18x32x4xbf16, #tpu.memory_space<vmem>>, vector<1x32x4xbf16>
    tpu.vector_store %arg9[%c17, %c0_2, %c0_3], %0 {strides = array<i32>} : memref<18x32x4xbf16, #tpu.memory_space<vmem>>, vector<1x32x4xbf16>,
    %cst_4 = arith.constant 0.000000e+00 : bf16
    %3 = vector.broadcast %cst_4 : bf16 to vector<16x8x4xbf16>
    %c1 = arith.constant 1 : index
    %c0_5 = arith.constant 0 : index
    %c0_6 = arith.constant 0 : index
    %4 = vector.load %arg9[%c1, %c0_5, %c0_6] : memref<18x32x4xbf16, #tpu.memory_space<vmem>>, vector<16x8x4xbf16>
    tpu.vector_store %arg9[%c1, %c0_5, %c0_6], %3 {strides = array<i32>} : memref<18x32x4xbf16, #tpu.memory_space<vmem>>, vector<16x8x4xbf16>,
    %c1_7 = arith.constant 1 : index
    %c24 = arith.constant 24 : index
    %c0_8 = arith.constant 0 : index
    %5 = vector.load %arg9[%c1_7, %c24, %c0_8] : memref<18x32x4xbf16, #tpu.memory_space<vmem>>, vector<16x8x4xbf16>
    tpu.vector_store %arg9[%c1_7, %c24, %c0_8], %3 {strides = array<i32>} : memref<18x32x4xbf16, #tpu.memory_space<vmem>>, vector<16x8x4xbf16>,
    %c0_9 = arith.constant 0 : index
    %c0_10 = arith.constant 0 : index
    %c0_11 = arith.constant 0 : index
    %c0_12 = arith.constant 0 : index
    %6 = vector.load %arg1[%c0_9, %c0_10, %c0_11, %c0_12] : memref<1x16x16x16xbf16, #tpu.memory_space<vmem>>, vector<1x16x16x16xbf16>
    %7 = vector.shape_cast %6 : vector<1x16x16x16xbf16> to vector<16x16x16xbf16>
    %8 = vector.shape_cast %7 : vector<16x16x16xbf16> to vector<256x16xbf16>
    %c0_13 = arith.constant 0 : index
    %c0_14 = arith.constant 0 : index
    %9 = vector.load %arg2[%c0_13, %c0_14] : memref<16x4xbf16, #tpu.memory_space<vmem>>, vector<16x4xbf16>
    %cst_15 = arith.constant dense<0.000000e+00> : vector<256x4xf32>
    %10 = tpu.matmul %8, %9, %cst_15 {dimension_numbers = #tpu.dot_dimension_numbers<[1], [0], [0], [1], [0, 0, 1, 1], [], []>} : vector<256x16xbf16>, vector<16x4xbf16>, vector<256x4xf32> -> vector<256x4xf32>
    %c0_16 = arith.constant 0 : index
    %c0_17 = arith.constant 0 : index
    %11 = vector.load %arg3[%c0_16, %c0_17] : memref<1x4xf32, #tpu.memory_space<vmem>>, vector<1x4xf32>
    %12 = vector.broadcast %11 : vector<1x4xf32> to vector<256x4xf32>
    %13 = arith.addf %10, %12 : vector<256x4xf32>
    %cst_18 = arith.constant 0.000000e+00 : f32
    %14 = vector.broadcast %cst_18 : f32 to vector<256x4xf32>
    %15 = arith.maximumf %13, %14 : vector<256x4xf32>
    %16 = vector.shape_cast %15 : vector<256x4xf32> to vector<16x16x4xf32>
    %17 = arith.truncf %16 : vector<16x16x4xf32> to vector<16x16x4xbf16>
    %c1_19 = arith.constant 1 : index
    %c8 = arith.constant 8 : index
    %c0_20 = arith.constant 0 : index
    %18 = vector.load %arg9[%c1_19, %c8, %c0_20] : memref<18x32x4xbf16, #tpu.memory_space<vmem>>, vector<16x16x4xbf16>
    tpu.vector_store %arg9[%c1_19, %c8, %c0_20], %17 {strides = array<i32>} : memref<18x32x4xbf16, #tpu.memory_space<vmem>>, vector<16x16x4xbf16>,
    %cst_21 = arith.constant 0.000000e+00 : f32
    %19 = vector.broadcast %cst_21 : f32 to vector<256x4xf32>
    %c0_22 = arith.constant 0 : index
    %c7 = arith.constant 7 : index
    %c0_23 = arith.constant 0 : index
    %20 = vector.load %arg9[%c0_22, %c7, %c0_23] : memref<18x32x4xbf16, #tpu.memory_space<vmem>>, vector<16x16x4xbf16>
    %21 = vector.shape_cast %20 : vector<16x16x4xbf16> to vector<256x4xbf16>
    %c0_24 = arith.constant 0 : index
    %c0_25 = arith.constant 0 : index
    %c0_26 = arith.constant 0 : index
    %c0_27 = arith.constant 0 : index
    %22 = vector.load %arg4[%c0_24, %c0_25, %c0_26, %c0_27] : memref<3x3x4x4xbf16, #tpu.memory_space<vmem>>, vector<1x1x4x4xbf16>
    %23 = vector.shape_cast %22 : vector<1x1x4x4xbf16> to vector<4x4xbf16>
    %cst_28 = arith.constant dense<0.000000e+00> : vector<256x4xf32>
    %24 = tpu.matmul %21, %23, %cst_28 {dimension_numbers = #tpu.dot_dimension_numbers<[1], [0], [0], [1], [0, 0, 1, 1], [], []>} : vector<256x4xbf16>, vector<4x4xbf16>, vector<256x4xf32> -> vector<256x4xf32>
    %25 = arith.addf %19, %24 : vector<256x4xf32>
    %c0_29 = arith.constant 0 : index
    %c8_30 = arith.constant 8 : index
    %c0_31 = arith.constant 0 : index
    %26 = vector.load %arg9[%c0_29, %c8_30, %c0_31] : memref<18x32x4xbf16, #tpu.memory_space<vmem>>, vector<16x16x4xbf16>
    %27 = vector.shape_cast %26 : vector<16x16x4xbf16> to vector<256x4xbf16>
    %c0_32 = arith.constant 0 : index
    %c1_33 = arith.constant 1 : index
    %c0_34 = arith.constant 0 : index
    %c0_35 = arith.constant 0 : index
    %28 = vector.load %arg4[%c0_32, %c1_33, %c0_34, %c0_35] : memref<3x3x4x4xbf16, #tpu.memory_space<vmem>>, vector<1x1x4x4xbf16>
    %29 = vector.shape_cast %28 : vector<1x1x4x4xbf16> to vector<4x4xbf16>
    %cst_36 = arith.constant dense<0.000000e+00> : vector<256x4xf32>
    %30 = tpu.matmul %27, %29, %cst_36 {dimension_numbers = #tpu.dot_dimension_numbers<[1], [0], [0], [1], [0, 0, 1, 1], [], []>} : vector<256x4xbf16>, vector<4x4xbf16>, vector<256x4xf32> -> vector<256x4xf32>
    %31 = arith.addf %25, %30 : vector<256x4xf32>
    %c0_37 = arith.constant 0 : index
    %c9 = arith.constant 9 : index
    %c0_38 = arith.constant 0 : index
    %32 = vector.load %arg9[%c0_37, %c9, %c0_38] : memref<18x32x4xbf16, #tpu.memory_space<vmem>>, vector<16x16x4xbf16>
    %33 = vector.shape_cast %32 : vector<16x16x4xbf16> to vector<256x4xbf16>
    %c0_39 = arith.constant 0 : index
    %c2 = arith.constant 2 : index
    %c0_40 = arith.constant 0 : index
    %c0_41 = arith.constant 0 : index
    %34 = vector.load %arg4[%c0_39, %c2, %c0_40, %c0_41] : memref<3x3x4x4xbf16, #tpu.memory_space<vmem>>, vector<1x1x4x4xbf16>
    %35 = vector.shape_cast %34 : vector<1x1x4x4xbf16> to vector<4x4xbf16>
    %cst_42 = arith.constant dense<0.000000e+00> : vector<256x4xf32>
    %36 = tpu.matmul %33, %35, %cst_42 {dimension_numbers = #tpu.dot_dimension_numbers<[1], [0], [0], [1], [0, 0, 1, 1], [], []>} : vector<256x4xbf16>, vector<4x4xbf16>, vector<256x4xf32> -> vector<256x4xf32>
    %37 = arith.addf %31, %36 : vector<256x4xf32>
    %c1_43 = arith.constant 1 : index
    %c7_44 = arith.constant 7 : index
    %c0_45 = arith.constant 0 : index
    %38 = vector.load %arg9[%c1_43, %c7_44, %c0_45] : memref<18x32x4xbf16, #tpu.memory_space<vmem>>, vector<16x16x4xbf16>
    %39 = vector.shape_cast %38 : vector<16x16x4xbf16> to vector<256x4xbf16>
    %c1_46 = arith.constant 1 : index
    %c0_47 = arith.constant 0 : index
    %c0_48 = arith.constant 0 : index
    %c0_49 = arith.constant 0 : index
    %40 = vector.load %arg4[%c1_46, %c0_47, %c0_48, %c0_49] : memref<3x3x4x4xbf16, #tpu.memory_space<vmem>>, vector<1x1x4x4xbf16>
    %41 = vector.shape_cast %40 : vector<1x1x4x4xbf16> to vector<4x4xbf16>
    %cst_50 = arith.constant dense<0.000000e+00> : vector<256x4xf32>
    %42 = tpu.matmul %39, %41, %cst_50 {dimension_numbers = #tpu.dot_dimension_numbers<[1], [0], [0], [1], [0, 0, 1, 1], [], []>} : vector<256x4xbf16>, vector<4x4xbf16>, vector<256x4xf32> -> vector<256x4xf32>
    %43 = arith.addf %37, %42 : vector<256x4xf32>
    %c1_51 = arith.constant 1 : index
    %c8_52 = arith.constant 8 : index
    %c0_53 = arith.constant 0 : index
    %44 = vector.load %arg9[%c1_51, %c8_52, %c0_53] : memref<18x32x4xbf16, #tpu.memory_space<vmem>>, vector<16x16x4xbf16>
    %45 = vector.shape_cast %44 : vector<16x16x4xbf16> to vector<256x4xbf16>
    %c1_54 = arith.constant 1 : index
    %c1_55 = arith.constant 1 : index
    %c0_56 = arith.constant 0 : index
    %c0_57 = arith.constant 0 : index
    %46 = vector.load %arg4[%c1_54, %c1_55, %c0_56, %c0_57] : memref<3x3x4x4xbf16, #tpu.memory_space<vmem>>, vector<1x1x4x4xbf16>
    %47 = vector.shape_cast %46 : vector<1x1x4x4xbf16> to vector<4x4xbf16>
    %cst_58 = arith.constant dense<0.000000e+00> : vector<256x4xf32>
    %48 = tpu.matmul %45, %47, %cst_58 {dimension_numbers = #tpu.dot_dimension_numbers<[1], [0], [0], [1], [0, 0, 1, 1], [], []>} : vector<256x4xbf16>, vector<4x4xbf16>, vector<256x4xf32> -> vector<256x4xf32>
    %49 = arith.addf %43, %48 : vector<256x4xf32>
    %c1_59 = arith.constant 1 : index
    %c9_60 = arith.constant 9 : index
    %c0_61 = arith.constant 0 : index
    %50 = vector.load %arg9[%c1_59, %c9_60, %c0_61] : memref<18x32x4xbf16, #tpu.memory_space<vmem>>, vector<16x16x4xbf16>
    %51 = vector.shape_cast %50 : vector<16x16x4xbf16> to vector<256x4xbf16>
    %c1_62 = arith.constant 1 : index
    %c2_63 = arith.constant 2 : index
    %c0_64 = arith.constant 0 : index
    %c0_65 = arith.constant 0 : index
    %52 = vector.load %arg4[%c1_62, %c2_63, %c0_64, %c0_65] : memref<3x3x4x4xbf16, #tpu.memory_space<vmem>>, vector<1x1x4x4xbf16>
    %53 = vector.shape_cast %52 : vector<1x1x4x4xbf16> to vector<4x4xbf16>
    %cst_66 = arith.constant dense<0.000000e+00> : vector<256x4xf32>
    %54 = tpu.matmul %51, %53, %cst_66 {dimension_numbers = #tpu.dot_dimension_numbers<[1], [0], [0], [1], [0, 0, 1, 1], [], []>} : vector<256x4xbf16>, vector<4x4xbf16>, vector<256x4xf32> -> vector<256x4xf32>
    %55 = arith.addf %49, %54 : vector<256x4xf32>
    %c2_67 = arith.constant 2 : index
    %c7_68 = arith.constant 7 : index
    %c0_69 = arith.constant 0 : index
    %56 = vector.load %arg9[%c2_67, %c7_68, %c0_69] : memref<18x32x4xbf16, #tpu.memory_space<vmem>>, vector<16x16x4xbf16>
    %57 = vector.shape_cast %56 : vector<16x16x4xbf16> to vector<256x4xbf16>
    %c2_70 = arith.constant 2 : index
    %c0_71 = arith.constant 0 : index
    %c0_72 = arith.constant 0 : index
    %c0_73 = arith.constant 0 : index
    %58 = vector.load %arg4[%c2_70, %c0_71, %c0_72, %c0_73] : memref<3x3x4x4xbf16, #tpu.memory_space<vmem>>, vector<1x1x4x4xbf16>
    %59 = vector.shape_cast %58 : vector<1x1x4x4xbf16> to vector<4x4xbf16>
    %cst_74 = arith.constant dense<0.000000e+00> : vector<256x4xf32>
    %60 = tpu.matmul %57, %59, %cst_74 {dimension_numbers = #tpu.dot_dimension_numbers<[1], [0], [0], [1], [0, 0, 1, 1], [], []>} : vector<256x4xbf16>, vector<4x4xbf16>, vector<256x4xf32> -> vector<256x4xf32>
    %61 = arith.addf %55, %60 : vector<256x4xf32>
    %c2_75 = arith.constant 2 : index
    %c8_76 = arith.constant 8 : index
    %c0_77 = arith.constant 0 : index
    %62 = vector.load %arg9[%c2_75, %c8_76, %c0_77] : memref<18x32x4xbf16, #tpu.memory_space<vmem>>, vector<16x16x4xbf16>
    %63 = vector.shape_cast %62 : vector<16x16x4xbf16> to vector<256x4xbf16>
    %c2_78 = arith.constant 2 : index
    %c1_79 = arith.constant 1 : index
    %c0_80 = arith.constant 0 : index
    %c0_81 = arith.constant 0 : index
    %64 = vector.load %arg4[%c2_78, %c1_79, %c0_80, %c0_81] : memref<3x3x4x4xbf16, #tpu.memory_space<vmem>>, vector<1x1x4x4xbf16>
    %65 = vector.shape_cast %64 : vector<1x1x4x4xbf16> to vector<4x4xbf16>
    %cst_82 = arith.constant dense<0.000000e+00> : vector<256x4xf32>
    %66 = tpu.matmul %63, %65, %cst_82 {dimension_numbers = #tpu.dot_dimension_numbers<[1], [0], [0], [1], [0, 0, 1, 1], [], []>} : vector<256x4xbf16>, vector<4x4xbf16>, vector<256x4xf32> -> vector<256x4xf32>
    %67 = arith.addf %61, %66 : vector<256x4xf32>
    %c2_83 = arith.constant 2 : index
    %c9_84 = arith.constant 9 : index
    %c0_85 = arith.constant 0 : index
    %68 = vector.load %arg9[%c2_83, %c9_84, %c0_85] : memref<18x32x4xbf16, #tpu.memory_space<vmem>>, vector<16x16x4xbf16>
    %69 = vector.shape_cast %68 : vector<16x16x4xbf16> to vector<256x4xbf16>
    %c2_86 = arith.constant 2 : index
    %c2_87 = arith.constant 2 : index
    %c0_88 = arith.constant 0 : index
    %c0_89 = arith.constant 0 : index
    %70 = vector.load %arg4[%c2_86, %c2_87, %c0_88, %c0_89] : memref<3x3x4x4xbf16, #tpu.memory_space<vmem>>, vector<1x1x4x4xbf16>
    %71 = vector.shape_cast %70 : vector<1x1x4x4xbf16> to vector<4x4xbf16>
    %cst_90 = arith.constant dense<0.000000e+00> : vector<256x4xf32>
    %72 = tpu.matmul %69, %71, %cst_90 {dimension_numbers = #tpu.dot_dimension_numbers<[1], [0], [0], [1], [0, 0, 1, 1], [], []>} : vector<256x4xbf16>, vector<4x4xbf16>, vector<256x4xf32> -> vector<256x4xf32>
    %73 = arith.addf %67, %72 : vector<256x4xf32>
    %c0_91 = arith.constant 0 : index
    %c0_92 = arith.constant 0 : index
    %74 = vector.load %arg5[%c0_91, %c0_92] : memref<1x4xf32, #tpu.memory_space<vmem>>, vector<1x4xf32>
    %75 = vector.broadcast %74 : vector<1x4xf32> to vector<256x4xf32>
    %76 = arith.addf %73, %75 : vector<256x4xf32>
    %cst_93 = arith.constant 0.000000e+00 : f32
    %77 = vector.broadcast %cst_93 : f32 to vector<256x4xf32>
    %78 = arith.maximumf %76, %77 : vector<256x4xf32>
    %79 = arith.truncf %78 : vector<256x4xf32> to vector<256x4xbf16>
    %c0_94 = arith.constant 0 : index
    %c0_95 = arith.constant 0 : index
    %80 = vector.load %arg6[%c0_94, %c0_95] : memref<4x16xbf16, #tpu.memory_space<vmem>>, vector<4x16xbf16>
    %cst_96 = arith.constant dense<0.000000e+00> : vector<256x16xf32>
    %81 = tpu.matmul %79, %80, %cst_96 {dimension_numbers = #tpu.dot_dimension_numbers<[1], [0], [0], [1], [0, 0, 1, 1], [], []>} : vector<256x4xbf16>, vector<4x16xbf16>, vector<256x16xf32> -> vector<256x16xf32>
    %c0_97 = arith.constant 0 : index
    %c0_98 = arith.constant 0 : index
    %82 = vector.load %arg7[%c0_97, %c0_98] : memref<1x16xf32, #tpu.memory_space<vmem>>, vector<1x16xf32>
    %83 = vector.broadcast %82 : vector<1x16xf32> to vector<256x16xf32>
    %84 = arith.addf %81, %83 : vector<256x16xf32>
    %85 = arith.extf %8 : vector<256x16xbf16> to vector<256x16xf32>
    %86 = arith.addf %84, %85 : vector<256x16xf32>
    %cst_99 = arith.constant 0.000000e+00 : f32
    %87 = vector.broadcast %cst_99 : f32 to vector<256x16xf32>
    %88 = arith.maximumf %86, %87 : vector<256x16xf32>
    %89 = vector.shape_cast %88 : vector<256x16xf32> to vector<1x16x16x16xf32>
    %c0_100 = arith.constant 0 : index
    %c0_101 = arith.constant 0 : index
    %c0_102 = arith.constant 0 : index
    %c0_103 = arith.constant 0 : index
    %90 = vector.load %arg8[%c0_100, %c0_101, %c0_102, %c0_103] : memref<1x16x16x16xf32, #tpu.memory_space<vmem>>, vector<1x16x16x16xf32>
    tpu.vector_store %arg8[%c0_100, %c0_101, %c0_102, %c0_103], %89 {strides = array<i32>} : memref<1x16x16x16xf32, #tpu.memory_space<vmem>>, vector<1x16x16x16xf32>,
    return
  }
  func.func @transform_0(%arg0: i32) -> (i32, i32, i32, i32) {
    %c0_i32 = arith.constant 0 : i32
    %c0_i32_0 = arith.constant 0 : i32
    %c0_i32_1 = arith.constant 0 : i32
    %c0_i32_2 = arith.constant 0 : i32
    return %arg0, %c0_i32, %c0_i32_0, %c0_i32_1 : i32, i32, i32, i32
  }
  func.func @transform_1(%arg0: i32) -> (i32, i32) {
    %c0_i32 = arith.constant 0 : i32
    %c0_i32_0 = arith.constant 0 : i32
    %c0_i32_1 = arith.constant 0 : i32
    return %c0_i32, %c0_i32_0 : i32, i32
  }
  func.func @transform_2(%arg0: i32) -> (i32, i32) {
    %c0_i32 = arith.constant 0 : i32
    %c0_i32_0 = arith.constant 0 : i32
    %c0_i32_1 = arith.constant 0 : i32
    return %c0_i32, %c0_i32_0 : i32, i32
  }
  func.func @transform_3(%arg0: i32) -> (i32, i32, i32, i32) {
    %c0_i32 = arith.constant 0 : i32
    %c0_i32_0 = arith.constant 0 : i32
    %c0_i32_1 = arith.constant 0 : i32
    %c0_i32_2 = arith.constant 0 : i32
    %c0_i32_3 = arith.constant 0 : i32
    return %c0_i32, %c0_i32_0, %c0_i32_1, %c0_i32_2 : i32, i32, i32, i32
  }
  func.func @transform_4(%arg0: i32) -> (i32, i32) {
    %c0_i32 = arith.constant 0 : i32
    %c0_i32_0 = arith.constant 0 : i32
    %c0_i32_1 = arith.constant 0 : i32
    return %c0_i32, %c0_i32_0 : i32, i32
  }
  func.func @transform_5(%arg0: i32) -> (i32, i32) {
    %c0_i32 = arith.constant 0 : i32
    %c0_i32_0 = arith.constant 0 : i32
    %c0_i32_1 = arith.constant 0 : i32
    return %c0_i32, %c0_i32_0 : i32, i32
  }
  func.func @transform_6(%arg0: i32) -> (i32, i32) {
    %c0_i32 = arith.constant 0 : i32
    %c0_i32_0 = arith.constant 0 : i32
    %c0_i32_1 = arith.constant 0 : i32
    return %c0_i32, %c0_i32_0 : i32, i32
  }
  func.func @transform_7(%arg0: i32) -> (i32, i32, i32, i32) {
    %c0_i32 = arith.constant 0 : i32
    %c0_i32_0 = arith.constant 0 : i32
    %c0_i32_1 = arith.constant 0 : i32
    %c0_i32_2 = arith.constant 0 : i32
    return %arg0, %c0_i32, %c0_i32_0, %c0_i32_1 : i32, i32, i32, i32
  }
}

</mosaic_0001>

<bundles_post_ra>
// kernel: tpu_custom_call.1
= control target key start
LH: loop header
LB: loop body
LE: loop exit
PB: predicated region body
PF: predicated region fallthrough
CT: control target
= control target key end

     0   :  { %12 = vsyncpa [#allocation4], 0  ;;  %s8320_s0 = inlined_call_operand.hbm [shape: bf16[2,16,16,16], index: 0, kind: input, shape index: {}]   ;;  %s8321_s1 = inlined_call_operand.vmem [shape: bf16[16,4], index: 1, kind: input, shape index: {}]   ;;  %s8322_s2 = inlined_call_operand.vmem [shape: f32[1,4], index: 2, kind: input, shape index: {}]   ;;  %s8323_s3 = inlined_call_operand.vmem [shape: bf16[3,3,4,4], index: 3, kind: input, shape index: {}]   ;;  %s8324_s4 = inlined_call_operand.vmem [shape: f32[1,4], index: 4, kind: input, shape index: {}]   ;;  %s8325_s5 = inlined_call_operand.vmem [shape: bf16[4,16], index: 5, kind: input, shape index: {}]   ;;  %s8326_s6 = inlined_call_operand.vmem [shape: f32[1,16], index: 6, kind: input, shape index: {}]   ;;  %s8327_s7 = inlined_call_operand.hbm [shape: f32[2,16,16,16], index: 7, kind: output, shape index: {}]  }
   0x1   :  { %14 = vsyncpa [#allocation4 + $0x1], 0 }
   0x2   :  { %15 = vsyncpa [#allocation5], 0 }
   0x3   :  { %17 = vsyncpa [#allocation5 + $0x1], 0  ;;  %s6868_s24 = smov 0   ;;  %s6870_s25 = smov 0  }
   0x4   :  { %s6872_s26 = smov 0   ;;  %s6874_s27 = smov 0  }
   0x5 LB: > { %s6889_s28 = sadd.s32 4294967295, %s6819_s27   ;;  %s5544_s29 = sadd.s32 4294967294, %s6819_s27   ;;  %s6819_s27 = sphi %s6874_s27, %s8340_s27   ;;  %s6815_s26 = sphi %s6872_s26, %s8339_s26   ;;  %s6811_s25 = sphi %s6870_s25, %s8338_s25   ;;  %s6807_s24 = sphi %s6868_s24, %s8337_s24  }
   0x6   : > { %s6893_s30 = sadd.s32 1, %s6819_s27   ;;  %s30_s8 = sadd.s32 1, %s6815_s26 }
   0x7   : > { %s27_s9 = ssub.s32 %s6819_s27, %s6893_s30  ;;  %p37_p0 = scmp.ne.s32.totalorder %s6815_s26, %s6811_s25 }
   0x8   : > { %p28_p1 = scmp.eq.s32.totalorder %s27_s9, 0  ;;  %p38_p2 = scmp.eq.s32.totalorder %s6819_s27, 0 }
   0x9   : > { %p43_p3 = scmp.ne.s32.totalorder %s6811_s25, %s6807_s24  ;;  %p44_p4 = scmp.eq.s32.totalorder %s6889_s28, 0 }
   0xa   : > { %s6905_s10 = scalar_select %p28_p1, %s6815_s26, %s30_s8  }
   0xb   : > { %p6907_p5 = por %p38_p2, %p37_p0  ;;  %p6911_p6 = por %p44_p4, %p43_p3 }
   0xc   : > { %p193_p7 = scmp.eq.s32.totalorder %s6889_s28, 1  ;;  %p199_p8 = scmp.eq.s32.totalorder %s5544_s29, 1 }
   0xd   : > { %p6606_p10 = scmp.lt.s32.totalorder %s6819_s27, 2  ;;  %s237_s15 = sand.u32 1, %s6815_s26  }
   0xe   : > { %p6918_p11 = por %p193_p7, %p37_p0  ;;  %p6922_p12 = por %p199_p8, %p43_p3 }
   0xf   : > { %s5762_s16 = sshll.u32 %s6819_s27, 11  ;;  %s5547_s17 = sshll.u32 %s237_s15, 7 }
  0x10   : > { %s8331_s13 = scalar_select %p6918_p11, 1, 0 }
  0x11   : > { %s8332_s14 = scalar_select %p6922_p12, 1, 0 }
  0x12   : > { %s6931_s20 = scalar_lea.hbm %s8320_s0, %s5762_s16  ;;  %s241_s21 = scalar_lea.vmem [#allocation3], %s5547_s17 }
  0x13   : > { %s248_s22 = sshll.u32 %s241_s21, 4  ;;  %p6935_p13 = pnand %p6606_p10, %p6907_p5  ;;  %s6939_s22 = int_to_ptr.vmem [resolvable:$true] %s248_s22 }
  0x14   : > { %s6941_s29 = scalar_lea.sflag [#allocation4], %s237_s15  ;;  %s6723_s8 = scalar_lea.hbm %s6931_s20, 2048 }
  0x15   : > { %p6724_p0 = scmp.ne.s32.totalorder %s6931_s20, %s6723_s8  ;;  %p6725_p1 = pneg %p6935_p13 }
  0x16   : > { %s6728_s16 = scalar_lea.hbm %s8320_s0, 4096  ;;  %p6729_p4 = scmp.lt.u32.totalorder %s6931_s20, %s8320_s0 }
  0x17   : > { %p6726_p2 = pnand %p6725_p1, %p6724_p0  ;;  %p6730_p5 = scmp.lt.u32.totalorder %s6728_s16, %s6723_s8 }
  0x18   : > { %p6732_p8 = scmp.lt.u32.totalorder %s6723_s8, %s6931_s20 }
  0x19   : > { %p6727_p3 = pneg %p6726_p2  ;;  %p6731_p7 = por %p6730_p5, %p6729_p4 }
  0x1b   : > { %p6733_p10 = por %p6732_p8, %p6731_p7 }
  0x1d   : > { %p6734_p9 = pnand %p6733_p10, %p6727_p3 }
  0x1f   : > { %6737 = shalt.err (!%p6734_p9)
}
  0x20   : > { %s6738_s15 = scalar_lea.vmem %s6939_s22, 2048  ;;  %s6821_s19 = smov [#allocation3]  }
  0x21   : > { %p6739_p0 = scmp.ne.s32.totalorder %s6939_s22, %s6738_s15  ;;  %s6743_s21 = sshll.u32 %s6821_s19, 4  ;;  %s6744_s21 = int_to_ptr.vmem [resolvable:$false] %s6743_s21 }
  0x22   : > { %s6745_s9 = scalar_lea.vmem %s6744_s21, 4096  ;;  %p6746_p11 = scmp.lt.s32.totalorder %s6939_s22, %s6744_s21 }
  0x23   : > { %p6741_p2 = pnand %p6739_p0, %p6725_p1  ;;  %p6747_p4 = scmp.lt.s32.totalorder %s6745_s9, %s6738_s15 }
  0x25   : > { %p6742_p12 = pneg %p6741_p2  ;;  %p6748_p5 = por %p6747_p4, %p6746_p11 }
  0x27   : > { %p6749_p7 = pnand %p6748_p5, %p6742_p12 }
  0x29   : > { %6752 = shalt.err (!%p6749_p7)
}
  0x2a   : > { %s6822_s8 = smov 64   ;;  %s6823_s11 = smov 4  }
  0x2b   : > { %6601 = dma.hbm_to_vmem [thread:$0]  (!%p6935_p13), %s6931_s20, 2048, %s6939_s22, %s6941_s29, %s6822_s8, %s6822_s8, %s6823_s11  }
  0x2c   : > { %p5550_p9 = scmp.ge.s32.totalorder %s6819_s27, 1  ;;  %p256_p1 = scmp.lt.s32.totalorder %s6819_s27, 3 }
  0x2e   : > { %p257_p3 = pnand %p5550_p9, %p256_p1 }
  0x2f   : > { %s6972_s16 = sand.u32 (!%p257_p3), 1, %s6811_s25  }
  0x30   : > { %260 = sbr.rel (%p257_p3) target bundleno = 1159 (0x487), region = 48  ;;  %s5551_s17 = sshll.u32 (!%p257_p3), %s6972_s16, 7 }
  0x31   : > { %s263_s18 = scalar_lea.sflag (!%p257_p3), [#allocation4], %s6972_s16  ;;  %s6976_s15 = scalar_lea.vmem (!%p257_p3), [#allocation3], %s5551_s17 }
  0x37   : > { %6798 = dma.done.wait (%p6911_p6), %s263_s18, 2048  }
  0x38   : > { %6800 = vsyncadd (%p6911_p6), %s263_s18, 4294965248  ;;  %v6645_v0 = vld [vmem:[%s8321_s1] sm:$0xff]   ;;  %vm466_vm0 = vcmask 130048   ;;  %v341_v2 = vld [vmem:[%s6976_s15 + $0x8] sm:$0xff]   ;;  %vm305_vm1 = vcmask 27648   ;;  %vm322_vm2 = vcmask 31748  }
  0x39   : > { %v339_v1 = vld [vmem:[%s6976_s15] sm:$0xff]   ;;  %v343_v3 = vld [vmem:[%s6976_s15 + $0x10] sm:$0xff]   ;;  %5951 = vmatprep.subr.bf16.mxu0 %v6645_v0  ;;  %v345_v4 = vld [vmem:[%s6976_s15 + $0x18] sm:$0xff]   ;;  %vm298_vm3 = vcmask 31744   ;;  %v6824_v17 = vmov 0   ;;  %vm1257_vm4 = vcmask 1041408  }
  0x3a   : > { %5952 = vmatpush3.bf16.msra.mxu0 %v6645_v0  ;;  %5953 = vmatprep.mubr.msk.bf16.mxu0 %vm466_vm0, %v339_v1  ;;  %v347_v5 = vld [vmem:[%s6976_s15 + $0x20] sm:$0xff]   ;;  %v349_v6 = vld [vmem:[%s6976_s15 + $0x28] sm:$0xff]   ;;  %v351_v7 = vld [vmem:[%s6976_s15 + $0x30] sm:$0xff]   ;;  %299 = vst.msk [vmem:[#allocation2] sm:$0xff] %vm298_vm3, %v6824_v17  ;;  %vm1158_vm5 = vcmask 1043456   ;;  %s5552_s8 = sshll.u32 %s6972_s16, 8 }
  0x3b   : > { %v353_v8 = vld [vmem:[%s6976_s15 + $0x38] sm:$0xff]   ;;  %v355_v9 = vld [vmem:[%s6976_s15 + $0x40] sm:$0xff]   ;;  %v357_v10 = vld [vmem:[%s6976_s15 + $0x48] sm:$0xff]   ;;  %300 = vst.msk [vmem:[#allocation2 + $0x8] sm:$0xff] %vm298_vm3, %v6824_v17  ;;  %vm836_vm6 = vsmask.f32 4352 }
  0x3c   : > { %v359_v11 = vld [vmem:[%s6976_s15 + $0x50] sm:$0xff]   ;;  %v361_v12 = vld [vmem:[%s6976_s15 + $0x58] sm:$0xff]   ;;  %v363_v13 = vld [vmem:[%s6976_s15 + $0x60] sm:$0xff]   ;;  %302 = vst.msk [vmem:[#allocation2 + $0x110] sm:$0xff] %vm298_vm3, %v6824_v17  ;;  %vm1650_vm7 = vsmask.f32 3328 }
  0x3d   : > { %5954 = vmatmul.mubr.msk.bf16.vlgmr.msra.gmra.mrb[0].mxu0 %vm466_vm0, %v341_v2  ;;  %v365_v14 = vld [vmem:[%s6976_s15 + $0x68] sm:$0xff]   ;;  %v367_v15 = vld [vmem:[%s6976_s15 + $0x70] sm:$0xff]   ;;  %v369_v16 = vld [vmem:[%s6976_s15 + $0x78] sm:$0xff]   ;;  %303 = vst.msk [vmem:[#allocation2 + $0x118] sm:$0xff] %vm298_vm3, %v6824_v17  ;;  %s8161_s11 = scalar_lea.vmem [#allocation6], %s5552_s8  ;;  %p8334_p11 = scmp.ne.s32.totalorder %s8331_s13, 0 }
  0x3e   : > { %5957 = vmatprep.mubr.msk.bf16.mxu0 %vm466_vm0, %v343_v3  ;;  %306 = vst.msk [vmem:[#allocation2 + $0x10] sm:$0xf] %vm305_vm1, %v6824_v17  ;;  %307 = vst.msk [vmem:[#allocation2 + $0x20] sm:$0xf] %vm305_vm1, %v6824_v17  ;;  %v5587_v18 = vld [vmem:[%s8323_s3 + $0x2] sm:$0x3] }
  0x3f   : > { %308 = vst.msk [vmem:[#allocation2 + $0x30] sm:$0xf] %vm305_vm1, %v6824_v17  ;;  %309 = vst.msk [vmem:[#allocation2 + $0x40] sm:$0xf] %vm305_vm1, %v6824_v17  ;;  %6583 = vmatprep.subr.msk.bf16.mxu0 %vm1257_vm4, %v5587_v18  ;;  %v1259_v20 = vsel %vm1257_vm4, %v5587_v18, 0  ;;  %s5471_s17 = sshll.u32 %s8161_s11, 4  ;;  %s8270_s17 = int_to_ptr.vmem [resolvable:$true] %s5471_s17 }
  0x40   : > { %310 = vst.msk [vmem:[#allocation2 + $0x50] sm:$0xf] %vm305_vm1, %v6824_v17  ;;  %311 = vst.msk [vmem:[#allocation2 + $0x60] sm:$0xf] %vm305_vm1, %v6824_v17  ;;  %5986 = vmatpush3.bf16.msra.mxu0 %v1259_v20  ;;  %v5637_v25 = vld [vmem:[%s8323_s3 + $0x6] sm:$0x3] }
  0x41   : > { %312 = vst.msk [vmem:[#allocation2 + $0x70] sm:$0xf] %vm305_vm1, %v6824_v17  ;;  %313 = vst.msk [vmem:[#allocation2 + $0x80] sm:$0xf] %vm305_vm1, %v6824_v17  ;;  %v1110_v21 = vld [vmem:[#allocation2] sm:$0xf0]  ;;  %6587 = vmatprep.subr.msk.bf16.mxu1 %vm1257_vm4, %v5637_v25 }
  0x42   : > { %314 = vst.msk [vmem:[#allocation2 + $0x90] sm:$0xf] %vm305_vm1, %v6824_v17  ;;  %315 = vst.msk [vmem:[#allocation2 + $0xa0] sm:$0xf] %vm305_vm1, %v6824_v17  ;;  %v7056_v19 = vld [vmem:[#allocation2 + $0x8] sm:$0xf] }
  0x43   : > { %316 = vst.msk [vmem:[#allocation2 + $0xb0] sm:$0xf] %vm305_vm1, %v6824_v17  ;;  %317 = vst.msk [vmem:[#allocation2 + $0xc0] sm:$0xf] %vm305_vm1, %v6824_v17  ;;  %v1160_v22 = vrot.slane %v7056_v19, 4  ;;  %v1159_v23 = vrot.slane %v1110_v21, 4 }
  0x44   : > { %318 = vst.msk [vmem:[#allocation2 + $0xd0] sm:$0xf] %vm305_vm1, %v6824_v17  ;;  %319 = vst.msk [vmem:[#allocation2 + $0xe0] sm:$0xf] %vm305_vm1, %v6824_v17  ;;  %v7068_v26 = vsel %vm1257_vm4, %v5637_v25, 0  ;;  %s6753_s12 = scalar_lea.vmem %s8270_s17, 4096 }
  0x45   : > { %5958 = vmatmul.mubr.msk.bf16.gmra.mrb[4].mxu0 %vm466_vm0, %v345_v4  ;;  %320 = vst.msk [vmem:[#allocation2 + $0xf0] sm:$0xf] %vm305_vm1, %v6824_v17  ;;  %321 = vst.msk [vmem:[#allocation2 + $0x100] sm:$0xf] %vm305_vm1, %v6824_v17  ;;  %v1161_v24 = vsel %vm1158_vm5, %v1159_v23, %v1160_v22  ;;  %6326 = vmatpush3.bf16.msra.mxu1 %v7068_v26  ;;  %v7074_v27 = vld [vmem:[%s8323_s3 + $0x8] sm:$0x3]  ;;  %p6754_p6 = scmp.ne.s32.totalorder %s8270_s17, %s6753_s12 }
  0x46   : > { %5961 = vmatprep.mubr.msk.bf16.mxu0 %vm466_vm0, %v347_v5  ;;  %323 = vst.msk [vmem:[#allocation2 + $0x18] sm:$0xf0] %vm322_vm2, %v6824_v17  ;;  %324 = vst.msk [vmem:[#allocation2 + $0x28] sm:$0xf0] %vm322_vm2, %v6824_v17  ;;  %6588 = vmatprep.subr.msk.bf16.mxu1 %vm1257_vm4, %v7074_v27  ;;  %v1109_v28 = vld [vmem:[%s8323_s3] sm:$0x3] }
  0x47   : > { %325 = vst.msk [vmem:[#allocation2 + $0x38] sm:$0xf0] %vm322_vm2, %v6824_v17  ;;  %326 = vst.msk [vmem:[#allocation2 + $0x48] sm:$0xf0] %vm322_vm2, %v6824_v17  ;;  %6584 = vmatprep.subr.msk.bf16.mxu0 %vm1257_vm4, %v1109_v28  ;;  %v7085_v29 = vld [vmem:[%s8322_s2] ss:$0 sm:$0xff]  ;;  %p6755_p12 = pnand %p6754_p6, %p8334_p11 }
  0x48   : > { %327 = vst.msk [vmem:[#allocation2 + $0x58] sm:$0xf0] %vm322_vm2, %v6824_v17  ;;  %328 = vst.msk [vmem:[#allocation2 + $0x68] sm:$0xf0] %vm322_vm2, %v6824_v17  ;;  %v804_v54 = vld [vmem:[#allocation2] sm:$0xf8] }
  0x49   : > { %329 = vst.msk [vmem:[#allocation2 + $0x78] sm:$0xf0] %vm322_vm2, %v6824_v17  ;;  %330 = vst.msk [vmem:[#allocation2 + $0x88] sm:$0xf0] %vm322_vm2, %v6824_v17  ;;  %v838_v60 = vshrl.u32 %v804_v54, 16  ;;  %v1471_v63 = vsel %vm1257_vm4, %v1109_v28, 0  ;;  %p6756_p13 = pneg %p6755_p12 }
  0x4a   : > { %331 = vst.msk [vmem:[#allocation2 + $0x98] sm:$0xf0] %vm322_vm2, %v6824_v17  ;;  %332 = vst.msk [vmem:[#allocation2 + $0xa8] sm:$0xf0] %vm322_vm2, %v6824_v17  ;;  %v841_v0 = vshll.u32 %v804_v54, 16  ;;  %v846_v4 = vshrl.u32 %v7056_v19, 16 }
  0x4b   : > { %333 = vst.msk [vmem:[#allocation2 + $0xb8] sm:$0xf0] %vm322_vm2, %v6824_v17  ;;  %334 = vst.msk [vmem:[#allocation2 + $0xc8] sm:$0xf0] %vm322_vm2, %v6824_v17  ;;  %v849_v5 = vshll.u32 %v7056_v19, 16  ;;  %s6825_s23 = smov [#allocation6]  }
  0x4c   : > { %335 = vst.msk [vmem:[#allocation2 + $0xd8] sm:$0xf0] %vm322_vm2, %v6824_v17  ;;  %336 = vst.msk [vmem:[#allocation2 + $0xe8] sm:$0xf0] %vm322_vm2, %v6824_v17  ;;  %v7117_v19 = vrot.slane %v841_v0, 4  ;;  %s6757_s29 = sshll.u32 %s6825_s23, 4  ;;  %s6758_s29 = int_to_ptr.vmem [resolvable:$false] %s6757_s29 }
  0x4d   : > { %5962 = vmatmul.mubr.msk.bf16.gmra.mrb[8].mxu0 %vm466_vm0, %v349_v6  ;;  %337 = vst.msk [vmem:[#allocation2 + $0xf8] sm:$0xf0] %vm322_vm2, %v6824_v17  ;;  %338 = vst.msk [vmem:[#allocation2 + $0x108] sm:$0xf0] %vm322_vm2, %v6824_v17  ;;  %s6759_s19 = scalar_lea.vmem %s6758_s29, 8192  ;;  %p6760_p8 = scmp.lt.s32.totalorder %s8270_s17, %s6758_s29 }
  0x4e   : > { %5965 = vmatprep.mubr.msk.bf16.mxu0 %vm466_vm0, %v351_v7  ;;  %p6761_p10 = scmp.lt.s32.totalorder %s6759_s19, %s6753_s12 }
  0x50   : > { %p6762_p0 = por %p6761_p10, %p6760_p8 }
  0x52   : > { %p6763_p2 = pnand %p6762_p0, %p6756_p13 }
  0x55   : > { %5966 = vmatmul.mubr.msk.bf16.gmra.mrb[12].mxu0 %vm466_vm0, %v353_v8 }
  0x56   : > { %5969 = vmatprep.mubr.msk.bf16.mxu0 %vm466_vm0, %v355_v9 }
  0x5d   : > { %5970 = vmatmul.mubr.msk.bf16.gmra.mrb[16].mxu0 %vm466_vm0, %v357_v10 }
  0x5e   : > { %5973 = vmatprep.mubr.msk.bf16.mxu0 %vm466_vm0, %v359_v11 }
  0x65   : > { %5974 = vmatmul.mubr.msk.bf16.gmra.mrb[20].mxu0 %vm466_vm0, %v361_v12 }
  0x66   : > { %5977 = vmatprep.mubr.msk.bf16.mxu0 %vm466_vm0, %v363_v13 }
  0x6d   : > { %5978 = vmatmul.mubr.msk.bf16.gmra.mrb[24].mxu0 %vm466_vm0, %v365_v14 }
  0x6e   : > { %5981 = vmatprep.mubr.msk.bf16.mxu0 %vm466_vm0, %v367_v15  ;;  %v7111_v15 = vrot.slane %v838_v60, 3 }
  0x75   : > { %5982 = vmatmul.mubr.msk.bf16.gmra.mrb[28].mxu0 %vm466_vm0, %v369_v16 }
  0x76   : > { %5987 = vmatprep.mubr.msk.bf16.mxu0 %vm298_vm3, %v1161_v24  ;;  %v7123_v24 = vld [vmem:[%s8323_s3 + $0xa] sm:$0x3] }
 0x110   : > { %v5955_v30 = vpop.f32.mrb[0].mxu0 }
 0x111   : > { %v558_v31 = vadd.f32 %v5955_v30, %v7085_v29  ;;  %v549_v32 = vpop.f32.mrb[1].mxu0 }
 0x112   : > { %v550_v33 = vadd.f32 %v7085_v29, %v549_v32  ;;  %v5956_v34 = vpop.f32.mrb[2].mxu0 }
 0x113   : > { %v561_v35 = vadd.f32 %v5956_v34, %v7085_v29  ;;  %v552_v36 = vpop.f32.mrb[3].mxu0  ;;  %v678_v38 = vmax.f32 %v558_v31, 0.0 }
 0x114   : > { %v553_v37 = vadd.f32 %v7085_v29, %v552_v36  ;;  %v676_v40 = vmax.f32 %v550_v33, 0.0  ;;  %v7131_v36 = vrot.slane %v849_v5, 4 }
 0x115   : > { %v679_v39 = vmax.f32 %v561_v35, 0.0  ;;  %v7129_v35 = vrot.slane %v846_v4, 3 }
 0x116   : > { %v677_v41 = vmax.f32 %v553_v37, 0.0 }
 0x117   : > { %v709_v42 = vpack.c.bf16 %v679_v39, %v678_v38  ;;  %v7136_v39 = vsel %vm1257_vm4, %v7074_v27, 0  ;;  %v5620_v27 = vld [vmem:[%s8323_s3 + $0x4] sm:$0x3] }
 0x118   : > { %v708_v43 = vpack.c.bf16 %v677_v41, %v676_v40  ;;  %v5959_v44 = vpop.f32.mrb[4].mxu0  ;;  %v7140_v41 = vsel %vm1257_vm4, %v7123_v24, 0 }
 0x119   : > { %v741_v45 = vrot.slane %v709_v42, 4  ;;  %v574_v46 = vadd.f32 %v5959_v44, %v7085_v29  ;;  %v565_v47 = vpop.f32.mrb[5].mxu0 }
 0x11a   : > { %v740_v48 = vrot.slane %v708_v43, 4  ;;  %v566_v49 = vadd.f32 %v7085_v29, %v565_v47  ;;  %v5960_v50 = vpop.f32.mrb[6].mxu0 }
 0x11b   : > { %774 = vst.msk [vmem:[#allocation2 + $0x20] sm:$0xf0] %vm322_vm2, %v741_v45  ;;  %v577_v51 = vadd.f32 %v5960_v50, %v7085_v29  ;;  %v568_v52 = vpop.f32.mrb[7].mxu0  ;;  %v682_v55 = vmax.f32 %v574_v46, 0.0 }
 0x11c   : > { %775 = vst.msk [vmem:[#allocation2 + $0x28] sm:$0xf] %vm305_vm1, %v741_v45  ;;  %773 = vst.msk [vmem:[#allocation2 + $0x18] sm:$0xf] %vm305_vm1, %v740_v48  ;;  %v569_v53 = vadd.f32 %v7085_v29, %v568_v52  ;;  %v680_v57 = vmax.f32 %v566_v49, 0.0 }
 0x11d   : > { %772 = vst.msk [vmem:[#allocation2 + $0x10] sm:$0xf0] %vm322_vm2, %v740_v48  ;;  %v683_v56 = vmax.f32 %v577_v51, 0.0 }
 0x11e   : > { %v681_v58 = vmax.f32 %v569_v53, 0.0 }
 0x11f   : > { %v711_v59 = vpack.c.bf16 %v683_v56, %v682_v55 }
 0x120   : > { %v710_v61 = vpack.c.bf16 %v681_v58, %v680_v57  ;;  %v5963_v62 = vpop.f32.mrb[8].mxu0  ;;  %v844_v57 = vor.u32 %v7117_v19, %v7111_v15  ;;  %v852_v58 = vor.u32 %v7131_v36, %v7129_v35 }
 0x121   : > { %v743_v1 = vrot.slane %v711_v59, 4  ;;  %v590_v2 = vadd.f32 %v5963_v62, %v7085_v29  ;;  %v581_v3 = vpop.f32.mrb[9].mxu0 }
 0x122   : > { %v742_v6 = vrot.slane %v710_v61, 4  ;;  %v582_v7 = vadd.f32 %v7085_v29, %v581_v3  ;;  %v5964_v8 = vpop.f32.mrb[10].mxu0  ;;  %v1112_v10 = vld [vmem:[#allocation2 + $0x20] sm:$0xf0] }
 0x123   : > { %v7104_v9 = vld [vmem:[#allocation2 + $0x28] sm:$0xf]  ;;  %778 = vst.msk [vmem:[#allocation2 + $0x40] sm:$0xf0] %vm322_vm2, %v743_v1  ;;  %v593_v11 = vadd.f32 %v5964_v8, %v7085_v29  ;;  %v584_v12 = vpop.f32.mrb[11].mxu0  ;;  %v686_v20 = vmax.f32 %v590_v2, 0.0 }
 0x124   : > { %779 = vst.msk [vmem:[#allocation2 + $0x48] sm:$0xf] %vm305_vm1, %v743_v1  ;;  %v7109_v13 = vld [vmem:[#allocation2 + $0x18] sm:$0xf]  ;;  %v1111_v14 = vld [vmem:[#allocation2 + $0x10] sm:$0xf0]  ;;  %v585_v16 = vadd.f32 %v7085_v29, %v584_v12 }
 0x125   : > { %776 = vst.msk [vmem:[#allocation2 + $0x30] sm:$0xf0] %vm322_vm2, %v742_v6  ;;  %v1162_v17 = vrot.slane %v1111_v14, 4  ;;  %v1163_v18 = vrot.slane %v7109_v13, 4  ;;  %v687_v21 = vmax.f32 %v593_v11, 0.0  ;;  %v1165_v22 = vrot.slane %v1112_v10, 4 }
 0x126   : > { %777 = vst.msk [vmem:[#allocation2 + $0x38] sm:$0xf] %vm305_vm1, %v742_v6  ;;  %v1166_v23 = vrot.slane %v7104_v9, 4  ;;  %v684_v25 = vmax.f32 %v582_v7, 0.0  ;;  %v685_v28 = vmax.f32 %v585_v16, 0.0  ;;  %v863_v32 = vshrl.u32 %v7109_v13, 16 }
 0x127   : > { %v1164_v30 = vsel %vm1158_vm5, %v1162_v17, %v1163_v18  ;;  %v806_v31 = vld [vmem:[#allocation2 + $0x10] sm:$0xf8]  ;;  %v713_v33 = vpack.c.bf16 %v687_v21, %v686_v20  ;;  %v7145_v47 = vld [vmem:[#allocation2 + $0x20] sm:$0xf8]  ;;  %v866_v59 = vshll.u32 %v7109_v13, 16 }
 0x128   : > { %5988 = vmatmul.mubr.msk.bf16.vlgmr.msra.gmra.mrb[32].mxu0 %vm298_vm3, %v1164_v30  ;;  %v1167_v34 = vsel %vm1158_vm5, %v1165_v22, %v1166_v23  ;;  %v712_v37 = vpack.c.bf16 %v685_v28, %v684_v25  ;;  %v5967_v38 = vpop.f32.mrb[12].mxu0  ;;  %v855_v40 = vshrl.u32 %v806_v31, 16  ;;  %v858_v45 = vshll.u32 %v806_v31, 16  ;;  %v7173_v5 = vld [vmem:[#allocation2 + $0x10] sm:$0xf0] }
 0x129   : > { %5991 = vmatprep.mubr.msk.bf16.mxu0 %vm298_vm3, %v1167_v34  ;;  %6020 = vmatpush3.bf16.msra.mxu0 %v1471_v63  ;;  %v745_v42 = vrot.slane %v713_v33, 4  ;;  %v606_v43 = vadd.f32 %v5967_v38, %v7085_v29  ;;  %v597_v44 = vpop.f32.mrb[13].mxu0  ;;  %v7143_v46 = vrot.slane %v863_v32, 3  ;;  %v7168_v63 = vld [vmem:[#allocation2 + $0x18] sm:$0xf]  ;;  %v872_v10 = vshrl.u32 %v7145_v47, 16 }
 0x12a   : > { %v744_v48 = vrot.slane %v712_v37, 4  ;;  %v598_v49 = vadd.f32 %v7085_v29, %v597_v44  ;;  %v5968_v50 = vpop.f32.mrb[14].mxu0  ;;  %v1114_v52 = vld [vmem:[#allocation2 + $0x40] sm:$0xf0]  ;;  %6585 = vmatprep.subr.msk.bf16.mxu0 %vm1257_vm4, %v5620_v27  ;;  %v7170_v0 = vrot.slane %v855_v40, 3  ;;  %v7179_v13 = vrot.slane %v858_v45, 4 }
 0x12b   : > { %v7151_v51 = vld [vmem:[#allocation2 + $0x48] sm:$0xf]  ;;  %782 = vst.msk [vmem:[#allocation2 + $0x60] sm:$0xf0] %vm322_vm2, %v745_v42  ;;  %v609_v53 = vadd.f32 %v5968_v50, %v7085_v29  ;;  %v600_v54 = vpop.f32.mrb[15].mxu0  ;;  %v690_v1 = vmax.f32 %v606_v43, 0.0  ;;  %v7195_v34 = vsel %vm836_vm6, %v844_v57, %v852_v58 }
 0x12c   : > { %783 = vst.msk [vmem:[#allocation2 + $0x68] sm:$0xf] %vm305_vm1, %v745_v42  ;;  %v1113_v56 = vld [vmem:[#allocation2 + $0x30] sm:$0xf0]  ;;  %781 = vst.msk [vmem:[#allocation2 + $0x58] sm:$0xf] %vm305_vm1, %v744_v48  ;;  %v601_v60 = vadd.f32 %v7085_v29, %v600_v54  ;;  %v861_v42 = vor.u32 %v7179_v13, %v7170_v0 }
 0x12d   : > { %v7157_v55 = vld [vmem:[#allocation2 + $0x38] sm:$0xf]  ;;  %780 = vst.msk [vmem:[#allocation2 + $0x50] sm:$0xf0] %vm322_vm2, %v744_v48  ;;  %v1168_v61 = vrot.slane %v1113_v56, 4  ;;  %v691_v2 = vmax.f32 %v609_v53, 0.0 }
 0x12e   : > { %v1169_v62 = vrot.slane %v7157_v55, 4  ;;  %v1171_v3 = vrot.slane %v1114_v52, 4  ;;  %v1172_v4 = vrot.slane %v7151_v51, 4  ;;  %v688_v6 = vmax.f32 %v598_v49, 0.0  ;;  %v7197_v35 = vld [vmem:[#allocation2 + $0x20] sm:$0xf0] }
 0x12f   : > { %v689_v7 = vmax.f32 %v601_v60, 0.0  ;;  %v715_v11 = vpack.c.bf16 %v691_v2, %v690_v1  ;;  %v7181_v14 = vrot.slane %v866_v59, 4  ;;  %v2767_v17 = vrot.slane %v7173_v5, 4  ;;  %v7209_v45 = vld [vmem:[#allocation2 + $0x28] sm:$0xf] }
 0x130   : > { %v1170_v8 = vsel %vm1158_vm5, %v1168_v61, %v1169_v62  ;;  %v1173_v12 = vsel %vm1158_vm5, %v1171_v3, %v1172_v4  ;;  %v5971_v16 = vpop.f32.mrb[16].mxu0  ;;  %v2768_v18 = vrot.slane %v7168_v63, 4  ;;  %v875_v19 = vshll.u32 %v7145_v47, 16  ;;  %v7217_v50 = vld [vmem:[#allocation2 + $0x38] sm:$0xf] }
 0x131   : > { %5992 = vmatmul.mubr.msk.bf16.gmra.mrb[36].mxu0 %vm298_vm3, %v1170_v8  ;;  %v714_v15 = vpack.c.bf16 %v689_v7, %v688_v6  ;;  %v747_v20 = vrot.slane %v715_v11, 4  ;;  %v622_v21 = vadd.f32 %v5971_v16, %v7085_v29  ;;  %v613_v22 = vpop.f32.mrb[17].mxu0  ;;  %v7188_v23 = vrot.slane %v872_v10, 3  ;;  %v7220_v54 = vld [vmem:[#allocation2 + $0x30] sm:$0xf0] }
 0x132   : > { %5995 = vmatprep.mubr.msk.bf16.mxu0 %vm298_vm3, %v1173_v12  ;;  %v880_v25 = vshrl.u32 %v7104_v9, 16  ;;  %v614_v30 = vadd.f32 %v7085_v29, %v613_v22  ;;  %v5972_v31 = vpop.f32.mrb[18].mxu0  ;;  %v1116_v33 = vld [vmem:[#allocation2 + $0x60] sm:$0xf0]  ;;  %v869_v43 = vor.u32 %v7181_v14, %v7143_v46  ;;  %v883_v44 = vshll.u32 %v7104_v9, 16 }
 0x133   : > { %v746_v28 = vrot.slane %v714_v15, 4  ;;  %v7192_v32 = vld [vmem:[#allocation2 + $0x68] sm:$0xf]  ;;  %786 = vst.msk [vmem:[#allocation2 + $0x80] sm:$0xf0] %vm322_vm2, %v747_v20  ;;  %v625_v36 = vadd.f32 %v5972_v31, %v7085_v29  ;;  %v616_v37 = vpop.f32.mrb[19].mxu0 }
 0x134   : > { %787 = vst.msk [vmem:[#allocation2 + $0x88] sm:$0xf] %vm305_vm1, %v747_v20  ;;  %v7202_v38 = vld [vmem:[#allocation2 + $0x58] sm:$0xf]  ;;  %v1115_v40 = vld [vmem:[#allocation2 + $0x50] sm:$0xf0]  ;;  %v617_v47 = vadd.f32 %v7085_v29, %v616_v37  ;;  %v7246_v22 = vsel %vm836_vm6, %v861_v42, %v869_v43 }
 0x135   : > { %784 = vst.msk [vmem:[#allocation2 + $0x70] sm:$0xf0] %vm322_vm2, %v746_v28  ;;  %v1174_v27 = vrot.slane %v1115_v40, 4  ;;  %v1175_v48 = vrot.slane %v7202_v38, 4  ;;  %v7215_v49 = vrot.slane %v875_v19, 4  ;;  %v694_v52 = vmax.f32 %v622_v21, 0.0 }
 0x136   : > { %785 = vst.msk [vmem:[#allocation2 + $0x78] sm:$0xf] %vm305_vm1, %v746_v28  ;;  %v695_v53 = vmax.f32 %v625_v36, 0.0  ;;  %v1177_v46 = vrot.slane %v1116_v33, 4  ;;  %v1178_v9 = vrot.slane %v7192_v32, 4  ;;  %v692_v56 = vmax.f32 %v614_v30, 0.0 }
 0x137   : > { %v693_v57 = vmax.f32 %v617_v47, 0.0  ;;  %v1176_v58 = vsel %vm1158_vm5, %v1174_v27, %v1175_v48  ;;  %v7223_v59 = vrot.slane %v880_v25, 3  ;;  %v810_v60 = vld [vmem:[#allocation2 + $0x30] sm:$0xf8]  ;;  %v7227_v0 = vrot.slane %v883_v44, 4 }
 0x138   : > { %v717_v61 = vpack.c.bf16 %v695_v53, %v694_v52  ;;  %v1179_v62 = vsel %vm1158_vm5, %v1177_v46, %v1178_v9  ;;  %v2770_v1 = vrot.slane %v7197_v35, 4  ;;  %v5975_v3 = vpop.f32.mrb[20].mxu0  ;;  %v2771_v4 = vrot.slane %v7209_v45, 4  ;;  %v7261_v37 = vld [vmem:[#allocation2 + $0x40] sm:$0xf8] }
 0x139   : > { %5996 = vmatmul.mubr.msk.bf16.gmra.mrb[40].mxu0 %vm298_vm3, %v1176_v58  ;;  %v716_v2 = vpack.c.bf16 %v693_v57, %v692_v56  ;;  %v2773_v6 = vrot.slane %v7220_v54, 4  ;;  %v2774_v7 = vrot.slane %v7217_v50, 4  ;;  %v638_v10 = vadd.f32 %v5975_v3, %v7085_v29  ;;  %v629_v11 = vpop.f32.mrb[21].mxu0 }
 0x13a   : > { %5999 = vmatprep.mubr.msk.bf16.mxu0 %vm298_vm3, %v1179_v62  ;;  %v749_v8 = vrot.slane %v717_v61, 4  ;;  %v889_v12 = vshrl.u32 %v810_v60, 16  ;;  %v892_v13 = vshll.u32 %v810_v60, 16  ;;  %v630_v15 = vadd.f32 %v7085_v29, %v629_v11  ;;  %v5976_v16 = vpop.f32.mrb[22].mxu0  ;;  %v1118_v20 = vld [vmem:[#allocation2 + $0x80] sm:$0xf0] }
 0x13b   : > { %v748_v14 = vrot.slane %v716_v2, 4  ;;  %v7236_v19 = vld [vmem:[#allocation2 + $0x88] sm:$0xf]  ;;  %v7243_v21 = vsel %vm1158_vm5, %v2767_v17, %v2768_v18  ;;  %v698_v25 = vmax.f32 %v638_v10, 0.0  ;;  %v641_v28 = vadd.f32 %v5976_v16, %v7085_v29  ;;  %v632_v30 = vpop.f32.mrb[23].mxu0 }
 0x13c   : > { %790 = vst.msk [vmem:[#allocation2 + $0xa0] sm:$0xf0] %vm322_vm2, %v749_v8  ;;  %v1117_v33 = vld [vmem:[#allocation2 + $0x70] sm:$0xf0]  ;;  %v878_v63 = vor.u32 %v7215_v49, %v7188_v23  ;;  %v886_v5 = vor.u32 %v7227_v0, %v7223_v59  ;;  %v696_v17 = vmax.f32 %v630_v15, 0.0  ;;  %v633_v18 = vadd.f32 %v7085_v29, %v632_v30 }
 0x13d   : > { %791 = vst.msk [vmem:[#allocation2 + $0xa8] sm:$0xf] %vm305_vm1, %v749_v8  ;;  %v7251_v31 = vld [vmem:[#allocation2 + $0x78] sm:$0xf]  ;;  %789 = vst.msk [vmem:[#allocation2 + $0x98] sm:$0xf] %vm305_vm1, %v748_v14  ;;  %v7276_v9 = vsel %vm1158_vm5, %v2770_v1, %v2771_v4  ;;  %v7293_v4 = vsel %vm1158_vm5, %v2773_v6, %v2774_v7 }
 0x13e   : > { %788 = vst.msk [vmem:[#allocation2 + $0x90] sm:$0xf0] %vm322_vm2, %v748_v14  ;;  %v1180_v35 = vrot.slane %v1117_v33, 4  ;;  %v1181_v36 = vrot.slane %v7251_v31, 4  ;;  %v699_v40 = vmax.f32 %v641_v28, 0.0  ;;  %v1183_v42 = vrot.slane %v1118_v20, 4 }
 0x13f   : > { %v1184_v43 = vrot.slane %v7236_v19, 4  ;;  %v7264_v23 = vrot.slane %v889_v12, 3  ;;  %v697_v44 = vmax.f32 %v633_v18, 0.0  ;;  %v7267_v47 = vrot.slane %v892_v13, 4 }
 0x140   : > { %v1182_v45 = vsel %vm1158_vm5, %v1180_v35, %v1181_v36  ;;  %v897_v27 = vshrl.u32 %v7157_v55, 16  ;;  %v719_v48 = vpack.c.bf16 %v699_v40, %v698_v25  ;;  %v900_v50 = vshll.u32 %v7157_v55, 16  ;;  %v5979_v46 = vpop.f32.mrb[24].mxu0 }
 0x141   : > { %6000 = vmatmul.mubr.msk.bf16.gmra.mrb[44].mxu0 %vm298_vm3, %v1182_v45  ;;  %v1185_v49 = vsel %vm1158_vm5, %v1183_v42, %v1184_v43  ;;  %v906_v52 = vshrl.u32 %v7261_v37, 16  ;;  %v718_v53 = vpack.c.bf16 %v697_v44, %v696_v17  ;;  %v909_v56 = vshll.u32 %v7261_v37, 16  ;;  %v645_v59 = vpop.f32.mrb[25].mxu0 }
 0x142   : > { %6003 = vmatprep.mubr.msk.bf16.mxu0 %vm298_vm3, %v1185_v49  ;;  %v7278_v54 = vrot.slane %v897_v27, 3  ;;  %v751_v57 = vrot.slane %v719_v48, 4  ;;  %v654_v58 = vadd.f32 %v5979_v46, %v7085_v29  ;;  %v7282_v60 = vrot.slane %v900_v50, 4  ;;  %v5980_v0 = vpop.f32.mrb[26].mxu0 }
 0x143   : > { %v7284_v55 = vrot.slane %v906_v52, 3  ;;  %v750_v61 = vrot.slane %v718_v53, 4  ;;  %v646_v62 = vadd.f32 %v7085_v29, %v645_v59  ;;  %v1120_v1 = vld [vmem:[#allocation2 + $0xa0] sm:$0xf0]  ;;  %v7290_v3 = vsel %vm836_vm6, %v878_v63, %v886_v5  ;;  %v648_v11 = vpop.f32.mrb[27].mxu0 }
 0x144   : > { %v7287_v2 = vld [vmem:[#allocation2 + $0xa8] sm:$0xf]  ;;  %794 = vst.msk [vmem:[#allocation2 + $0xc0] sm:$0xf0] %vm322_vm2, %v751_v57  ;;  %v702_v8 = vmax.f32 %v654_v58, 0.0  ;;  %v657_v10 = vadd.f32 %v5980_v0, %v7085_v29  ;;  %v895_v14 = vor.u32 %v7267_v47, %v7264_v23  ;;  %v903_v15 = vor.u32 %v7282_v60, %v7278_v54 }
 0x145   : > { %795 = vst.msk [vmem:[#allocation2 + $0xc8] sm:$0xf] %vm305_vm1, %v751_v57  ;;  %v7298_v12 = vld [vmem:[#allocation2 + $0x98] sm:$0xf]  ;;  %v1119_v13 = vld [vmem:[#allocation2 + $0x90] sm:$0xf0]  ;;  %v649_v7 = vadd.f32 %v7085_v29, %v648_v11 }
 0x146   : > { %792 = vst.msk [vmem:[#allocation2 + $0xb0] sm:$0xf0] %vm322_vm2, %v750_v61  ;;  %v700_v6 = vmax.f32 %v646_v62, 0.0  ;;  %v1186_v16 = vrot.slane %v1119_v13, 4  ;;  %v1187_v20 = vrot.slane %v7298_v12, 4  ;;  %v703_v28 = vmax.f32 %v657_v10, 0.0 }
 0x147   : > { %793 = vst.msk [vmem:[#allocation2 + $0xb8] sm:$0xf] %vm305_vm1, %v750_v61  ;;  %v2185_v25 = vld [vmem:[#allocation2 + $0x90] sm:$0xf8]  ;;  %v1189_v30 = vrot.slane %v1120_v1, 4  ;;  %v1190_v33 = vrot.slane %v7287_v2, 4 }
 0x148   : > { %v7309_v63 = vld [vmem:[#allocation2 + $0x98] sm:$0xf]  ;;  %v2338_v5 = vshrl.u32 %v2185_v25, 16  ;;  %v701_v17 = vmax.f32 %v649_v7, 0.0  ;;  %v1188_v18 = vsel %vm1158_vm5, %v1186_v16, %v1187_v20  ;;  %v2341_v35 = vshll.u32 %v2185_v25, 16  ;;  %v5983_v48 = vpop.f32.mrb[28].mxu0 }
 0x149   : > { %v2346_v36 = vshrl.u32 %v7309_v63, 16  ;;  %v2187_v40 = vld [vmem:[#allocation2 + $0xa0] sm:$0xf8]  ;;  %v721_v42 = vpack.c.bf16 %v703_v28, %v702_v8  ;;  %6004 = vmatmul.mubr.msk.bf16.gmra.mrb[48].mxu0 %vm298_vm3, %v1188_v18  ;;  %v1191_v43 = vsel %vm1158_vm5, %v1189_v30, %v1190_v33  ;;  %v2349_v45 = vshll.u32 %v7309_v63, 16  ;;  %v661_v57 = vpop.f32.mrb[29].mxu0 }
 0x14a   : > { %v2340_v44 = vrot.slane %v2338_v5, 3  ;;  %v720_v27 = vpack.c.bf16 %v701_v17, %v700_v6  ;;  %6007 = vmatprep.mubr.msk.bf16.mxu0 %vm298_vm3, %v1191_v43  ;;  %v2343_v49 = vrot.slane %v2341_v35, 4  ;;  %v2355_v52 = vshrl.u32 %v2187_v40, 16  ;;  %v7318_v59 = vld [vmem:[#allocation2 + $0xa8] sm:$0xf]  ;;  %v5984_v1 = vpop.f32.mrb[30].mxu0 }
 0x14b   : > { %v2348_v50 = vrot.slane %v2346_v36, 3  ;;  %v753_v53 = vrot.slane %v721_v42, 4  ;;  %v670_v46 = vadd.f32 %v5983_v48, %v7085_v29  ;;  %v2351_v58 = vrot.slane %v2349_v45, 4  ;;  %v664_v7 = vpop.f32.mrb[31].mxu0  ;;  %v1122_v42 = vld [vmem:[#allocation2 + $0xc0] sm:$0xf0] }
 0x14c   : > { %v2358_v61 = vshll.u32 %v2187_v40, 16  ;;  %v752_v62 = vrot.slane %v720_v27, 4  ;;  %v662_v0 = vadd.f32 %v7085_v29, %v661_v57  ;;  %v2344_v8 = vor.u32 %v2343_v49, %v2340_v44  ;;  %v7321_v11 = vld [vmem:[#allocation2 + $0xc8] sm:$0xf] }
 0x14d   : > { %v2357_v10 = vrot.slane %v2355_v52, 3  ;;  %798 = vst.msk [vmem:[#allocation2 + $0xe0] sm:$0xf0] %vm322_vm2, %v753_v53  ;;  %v706_v13 = vmax.f32 %v670_v46, 0.0  ;;  %v673_v6 = vadd.f32 %v5984_v1, %v7085_v29  ;;  %v2352_v16 = vor.u32 %v2351_v58, %v2348_v50  ;;  %v1121_v17 = vld [vmem:[#allocation2 + $0xb0] sm:$0xf0] }
 0x14e   : > { %799 = vst.msk [vmem:[#allocation2 + $0xe8] sm:$0xf] %vm305_vm1, %v753_v53  ;;  %v2360_v20 = vrot.slane %v2358_v61, 4  ;;  %v7326_v25 = vld [vmem:[#allocation2 + $0xb8] sm:$0xf]  ;;  %v704_v28 = vmax.f32 %v662_v0, 0.0  ;;  %v665_v30 = vadd.f32 %v7085_v29, %v664_v7 }
 0x14f   : > { %796 = vst.msk [vmem:[#allocation2 + $0xd0] sm:$0xf0] %vm322_vm2, %v752_v62  ;;  %v2363_v33 = vshrl.u32 %v7318_v59, 16  ;;  %v2366_v5 = vshll.u32 %v7318_v59, 16  ;;  %v707_v18 = vmax.f32 %v673_v6, 0.0  ;;  %v2353_v35 = vsel %vm836_vm6, %v2344_v8, %v2352_v16 }
 0x150   : > { %797 = vst.msk [vmem:[#allocation2 + $0xd8] sm:$0xf] %vm305_vm1, %v752_v62  ;;  %v2361_v36 = vor.u32 %v2360_v20, %v2357_v10  ;;  %v1192_v40 = vrot.slane %v1121_v17, 4  ;;  %v2189_v43 = vld [vmem:[#allocation2 + $0xb0] sm:$0xf8]  ;;  %v705_v44 = vmax.f32 %v665_v30, 0.0  ;;  %6105 = vmatprep.mubr.msk.bf16.mxu1 %vm298_vm3, %v2353_v35 }
 0x151   : > { %v2365_v45 = vrot.slane %v2363_v33, 3  ;;  %v2368_v27 = vrot.slane %v2366_v5, 4  ;;  %v1193_v48 = vrot.slane %v7326_v25, 4  ;;  %v7336_v29 = vld [vmem:[#allocation2 + $0xb8] sm:$0xf]  ;;  %v723_v49 = vpack.c.bf16 %v707_v18, %v706_v13 }
 0x152   : > { %v1195_v50 = vrot.slane %v1122_v42, 4  ;;  %v1196_v52 = vrot.slane %v7321_v11, 4  ;;  %v2372_v53 = vshrl.u32 %v2189_v43, 16  ;;  %v722_v46 = vpack.c.bf16 %v705_v44, %v704_v28  ;;  %v2191_v62 = vld [vmem:[#allocation2 + $0xc0] sm:$0xf8] }
 0x153   : > { %v2369_v57 = vor.u32 %v2368_v27, %v2365_v45  ;;  %v1194_v58 = vsel %vm1158_vm5, %v1192_v40, %v1193_v48  ;;  %v2375_v61 = vshll.u32 %v2189_v43, 16  ;;  %v7340_v0 = vld [vmem:[#allocation2 + $0xc8] sm:$0xf]  ;;  %v755_v1 = vrot.slane %v723_v49, 4 }
 0x154   : > { %6008 = vmatmul.mubr.msk.bf16.gmra.mrb[52].mxu0 %vm298_vm3, %v1194_v58  ;;  %v1197_v8 = vsel %vm1158_vm5, %v1195_v50, %v1196_v52  ;;  %v2374_v10 = vrot.slane %v2372_v53, 3  ;;  %v2380_v13 = vshrl.u32 %v7336_v29, 16  ;;  %v754_v6 = vrot.slane %v722_v46, 4  ;;  %v1124_v49 = vld [vmem:[#allocation2 + $0xe0] sm:$0xf0] }
 0x155   : > { %v2370_v7 = vsel %vm836_vm6, %v2361_v36, %v2369_v57  ;;  %6011 = vmatprep.mubr.msk.bf16.mxu0 %vm298_vm3, %v1197_v8  ;;  %v2377_v16 = vrot.slane %v2375_v61, 4  ;;  %v2383_v20 = vshll.u32 %v7336_v29, 16  ;;  %v7348_v28 = vld [vmem:[#allocation2 + $0xe8] sm:$0xf]  ;;  %802 = vst.msk [vmem:[#allocation2 + $0x100] sm:$0xf0] %vm322_vm2, %v755_v1 }
 0x156   : > { %803 = vst.msk [vmem:[#allocation2 + $0x108] sm:$0xf] %vm305_vm1, %v755_v1  ;;  %6106 = vmatmul.mubr.msk.bf16.vlgmr.msra.gmra.mrb[0].mxu1 %vm298_vm3, %v2370_v7  ;;  %v2382_v30 = vrot.slane %v2380_v13, 3  ;;  %v2389_v33 = vshrl.u32 %v2191_v62, 16  ;;  %v2392_v5 = vshll.u32 %v2191_v62, 16  ;;  %v2397_v17 = vshrl.u32 %v7340_v0, 16 }
 0x157   : > { %v7354_v18 = vld [vmem:[#allocation2 + $0xd8] sm:$0xf]  ;;  %800 = vst.msk [vmem:[#allocation2 + $0xf0] sm:$0xf0] %vm322_vm2, %v754_v6  ;;  %6122 = vmatpush3.bf16.msra.mxu1 %v7136_v39  ;;  %v2378_v35 = vor.u32 %v2377_v16, %v2374_v10  ;;  %v2385_v36 = vrot.slane %v2383_v20, 4  ;;  %v2400_v40 = vshll.u32 %v7340_v0, 16 }
 0x158   : > { %801 = vst.msk [vmem:[#allocation2 + $0xf8] sm:$0xf] %vm305_vm1, %v754_v6  ;;  %v1123_v42 = vld [vmem:[#allocation2 + $0xd0] sm:$0xf0]  ;;  %v1199_v43 = vrot.slane %v7354_v18, 4  ;;  %v2391_v44 = vrot.slane %v2389_v33, 3  ;;  %6589 = vmatprep.subr.msk.bf16.mxu1 %vm1257_vm4, %v7123_v24 }
 0x159   : > { %v2394_v45 = vrot.slane %v2392_v5, 4  ;;  %v2399_v27 = vrot.slane %v2397_v17, 3  ;;  %v1198_v48 = vrot.slane %v1123_v42, 4  ;;  %v2386_v50 = vor.u32 %v2385_v36, %v2382_v30  ;;  %v2193_v46 = vld [vmem:[#allocation2 + $0xd0] sm:$0xf8] }
 0x15a   : > { %v2402_v52 = vrot.slane %v2400_v40, 4  ;;  %v1201_v53 = vrot.slane %v1124_v49, 4  ;;  %v1202_v39 = vrot.slane %v7348_v28, 4  ;;  %v7365_v61 = vld [vmem:[#allocation2 + $0xd8] sm:$0xf]  ;;  %v2406_v62 = vshrl.u32 %v2193_v46, 16 }
 0x15b   : > { %v2395_v57 = vor.u32 %v2394_v45, %v2391_v44  ;;  %v1200_v58 = vsel %vm1158_vm5, %v1198_v48, %v1199_v43  ;;  %v2409_v1 = vshll.u32 %v2193_v46, 16  ;;  %v2195_v8 = vld [vmem:[#allocation2 + $0xe0] sm:$0xf8]  ;;  %v2387_v10 = vsel %vm836_vm6, %v2378_v35, %v2386_v50  ;;  %v7370_v7 = vld [vmem:[#allocation2 + $0xe8] sm:$0xf] }
 0x15c   : > { %v2403_v13 = vor.u32 %v2402_v52, %v2399_v27  ;;  %v1203_v6 = vsel %vm1158_vm5, %v1201_v53, %v1202_v39  ;;  %v2414_v24 = vshrl.u32 %v7365_v61, 16  ;;  %6109 = vmatprep.mubr.msk.bf16.mxu1 %vm298_vm3, %v2387_v10  ;;  %6012 = vmatmul.mubr.msk.bf16.gmra.mrb[56].mxu0 %vm298_vm3, %v1200_v58  ;;  %v2408_v16 = vrot.slane %v2406_v62, 3  ;;  %v2199_v40 = vld [vmem:[#allocation2 + $0x100] sm:$0xf8] }
 0x15d   : > { %v2411_v20 = vrot.slane %v2409_v1, 4  ;;  %v2417_v30 = vshll.u32 %v7365_v61, 16  ;;  %v2423_v33 = vshrl.u32 %v2195_v8, 16  ;;  %6015 = vmatprep.mubr.msk.bf16.mxu0 %vm298_vm3, %v1203_v6  ;;  %v2426_v35 = vshll.u32 %v2195_v8, 16 }
 0x15e   : > { %v2404_v5 = vsel %vm836_vm6, %v2395_v57, %v2403_v13  ;;  %v2416_v17 = vrot.slane %v2414_v24, 3  ;;  %v2431_v36 = vshrl.u32 %v7370_v7, 16  ;;  %v2434_v45 = vshll.u32 %v7370_v7, 16  ;;  %v1125_v50 = vld [vmem:[#allocation2 + $0xf0] sm:$0xf0] }
 0x15f   : > { %6110 = vmatmul.mubr.msk.bf16.gmra.mrb[4].mxu1 %vm298_vm3, %v2404_v5  ;;  %v2412_v42 = vor.u32 %v2411_v20, %v2408_v16  ;;  %v2419_v43 = vrot.slane %v2417_v30, 4  ;;  %v2425_v44 = vrot.slane %v2423_v33, 3  ;;  %v7380_v27 = vld [vmem:[#allocation2 + $0xf8] sm:$0xf]  ;;  %v2428_v48 = vrot.slane %v2426_v35, 4 }
 0x160   : > { %v2433_v49 = vrot.slane %v2431_v36, 3  ;;  %v1205_v52 = vrot.slane %v7380_v27, 4  ;;  %v2457_v53 = vshrl.u32 %v2199_v40, 16  ;;  %v2436_v46 = vrot.slane %v2434_v45, 4  ;;  %v2197_v58 = vld [vmem:[#allocation2 + $0xf0] sm:$0xf8] }
 0x161   : > { %v2420_v39 = vor.u32 %v2419_v43, %v2416_v17  ;;  %v1204_v57 = vrot.slane %v1125_v50, 4  ;;  %v7383_v62 = vld [vmem:[#allocation2 + $0xf8] sm:$0xf]  ;;  %v7392_v1 = vsel %vm836_vm6, %v895_v14, %v903_v15  ;;  %v2429_v8 = vor.u32 %v2428_v48, %v2425_v44  ;;  %v7395_v24 = vld [vmem:[#allocation2 + $0x108] sm:$0xf] }
 0x162   : > { %v2440_v10 = vshrl.u32 %v2197_v58, 16  ;;  %v2443_v13 = vshll.u32 %v2197_v58, 16  ;;  %v2448_v6 = vshrl.u32 %v7383_v62, 16  ;;  %v2437_v20 = vor.u32 %v2436_v46, %v2433_v49  ;;  %v2176_v15 = vld [vmem:[#allocation2 + $0x48] sm:$0xf] }
 0x163   : > { %v2421_v16 = vsel %vm836_vm6, %v2412_v42, %v2420_v39  ;;  %v1206_v30 = vsel %vm1158_vm5, %v1204_v57, %v1205_v52  ;;  %v2451_v54 = vshll.u32 %v7383_v62, 16  ;;  %v2459_v14 = vrot.slane %v2457_v53, 3  ;;  %v7401_v33 = vld [vmem:[#allocation2 + $0x40] sm:$0xf0]  ;;  %v2178_v42 = vld [vmem:[#allocation2 + $0x58] sm:$0xf] }
 0x164   : > { %6113 = vmatprep.mubr.msk.bf16.mxu1 %vm298_vm3, %v2421_v16  ;;  %v2442_v23 = vrot.slane %v2440_v10, 3  ;;  %v2445_v47 = vrot.slane %v2443_v13, 4  ;;  %v2450_v60 = vrot.slane %v2448_v6, 3  ;;  %v2438_v5 = vsel %vm836_vm6, %v2429_v8, %v2437_v20  ;;  %6016 = vmatmul.mubr.msk.bf16.gmra.mrb[60].mxu0 %vm298_vm3, %v1206_v30  ;;  %v7412_v49 = vld [vmem:[#allocation2 + $0x50] sm:$0xf0] }
 0x165   : > { %v2453_v17 = vrot.slane %v2451_v54, 4  ;;  %v2460_v35 = vshll.u32 %v2199_v40, 16  ;;  %v2465_v36 = vshrl.u32 %v7395_v24, 16  ;;  %v2468_v44 = vshll.u32 %v7395_v24, 16  ;;  %6021 = vmatprep.mubr.msk.bf16.mxu0 %vm298_vm3, %v7195_v34  ;;  %v814_v39 = vld [vmem:[#allocation2 + $0x50] sm:$0xf8] }
 0x166   : > { %v2446_v43 = vor.u32 %v2445_v47, %v2442_v23  ;;  %v911_v45 = vrot.slane %v909_v56, 4  ;;  %v914_v48 = vshrl.u32 %v7151_v51, 16  ;;  %v917_v53 = vshll.u32 %v7151_v51, 16  ;;  %v816_v51 = vld [vmem:[#allocation2 + $0x60] sm:$0xf8] }
 0x167   : > { %6114 = vmatmul.mubr.msk.bf16.gmra.mrb[8].mxu1 %vm298_vm3, %v2438_v5  ;;  %v2454_v50 = vor.u32 %v2453_v17, %v2450_v60  ;;  %v2462_v40 = vrot.slane %v2460_v35, 4  ;;  %v2467_v52 = vrot.slane %v2465_v36, 3  ;;  %v2470_v46 = vrot.slane %v2468_v44, 4  ;;  %v2180_v47 = vld [vmem:[#allocation2 + $0x68] sm:$0xf] }
 0x168   : > { %v912_v57 = vor.u32 %v911_v45, %v7284_v55  ;;  %v916_v58 = vrot.slane %v914_v48, 3  ;;  %v2776_v34 = vrot.slane %v7401_v33, 4  ;;  %v919_v8 = vrot.slane %v917_v53, 4  ;;  %v7430_v17 = vld [vmem:[#allocation2 + $0x60] sm:$0xf0] }
 0x169   : > { %v2455_v37 = vsel %vm836_vm6, %v2446_v43, %v2454_v50  ;;  %v2463_v56 = vor.u32 %v2462_v40, %v2459_v14  ;;  %v2777_v10 = vrot.slane %v2176_v15, 4  ;;  %v2471_v13 = vor.u32 %v2470_v46, %v2467_v52  ;;  %v2182_v35 = vld [vmem:[#allocation2 + $0x78] sm:$0xf]  ;;  %v7435_v45 = vld [vmem:[#allocation2 + $0x70] sm:$0xf0] }
 0x16a   : > { %6117 = vmatprep.mubr.msk.bf16.mxu1 %vm298_vm3, %v2455_v37  ;;  %v2779_v6 = vrot.slane %v7412_v49, 4  ;;  %v2780_v16 = vrot.slane %v2178_v42, 4  ;;  %v923_v20 = vshrl.u32 %v814_v39, 16  ;;  %v920_v30 = vor.u32 %v919_v8, %v916_v58  ;;  %v818_v52 = vld [vmem:[#allocation2 + $0x70] sm:$0xf8] }
 0x16b   : > { %v7422_v54 = vsel %vm1158_vm5, %v2776_v34, %v2777_v10  ;;  %v926_v55 = vshll.u32 %v814_v39, 16  ;;  %v931_v23 = vshrl.u32 %v7202_v38, 16  ;;  %v2472_v60 = vsel %vm836_vm6, %v2463_v56, %v2471_v13  ;;  %v820_v10 = vld [vmem:[#allocation2 + $0x80] sm:$0xf8] }
 0x16c   : > { %v7427_v14 = vsel %vm1158_vm5, %v2779_v6, %v2780_v16  ;;  %v925_v15 = vrot.slane %v923_v20, 3  ;;  %v934_v5 = vshll.u32 %v7202_v38, 16  ;;  %6022 = vmatmul.mubr.msk.bf16.vlgmr.msra.gmra.mrb[32].mxu0 %vm298_vm3, %v7246_v22  ;;  %v921_v36 = vsel %vm836_vm6, %v912_v57, %v920_v30 }
 0x16d   : > { %v928_v42 = vrot.slane %v926_v55, 4  ;;  %v933_v43 = vrot.slane %v931_v23, 3  ;;  %v940_v44 = vshrl.u32 %v816_v51, 16  ;;  %6025 = vmatprep.mubr.msk.bf16.mxu0 %vm298_vm3, %v7290_v3  ;;  %v943_v50 = vshll.u32 %v816_v51, 16  ;;  %v2184_v51 = vld [vmem:[#allocation2 + $0x88] sm:$0xf] }
 0x16e   : > { %v936_v48 = vrot.slane %v934_v5, 4  ;;  %v948_v38 = vshrl.u32 %v7192_v32, 16  ;;  %v951_v40 = vshll.u32 %v7192_v32, 16  ;;  %v2782_v39 = vrot.slane %v7430_v17, 4 }
 0x16f   : > { %6118 = vmatmul.mubr.msk.bf16.gmra.mrb[12].mxu1 %vm298_vm3, %v2472_v60  ;;  %v929_v22 = vor.u32 %v928_v42, %v925_v15  ;;  %v942_v53 = vrot.slane %v940_v44, 3  ;;  %v2783_v46 = vrot.slane %v2180_v47, 4  ;;  %v945_v58 = vrot.slane %v943_v50, 4  ;;  %v7455_v47 = vld [vmem:[#allocation2 + $0x80] sm:$0xf0] }
 0x170   : > { %6123 = vmatprep.mubr.msk.bf16.mxu1 %vm298_vm3, %v7243_v21  ;;  %v937_v57 = vor.u32 %v936_v48, %v933_v43  ;;  %v950_v3 = vrot.slane %v948_v38, 3  ;;  %v953_v34 = vrot.slane %v951_v40, 4  ;;  %v2785_v32 = vrot.slane %v7435_v45, 4  ;;  %v7458_v42 = vld [vmem:[#allocation2 + $0x90] sm:$0xf0] }
 0x171   : > { %v7446_v37 = vsel %vm1158_vm5, %v2782_v39, %v2783_v46  ;;  %v2786_v56 = vrot.slane %v2182_v35, 4  ;;  %v957_v8 = vshrl.u32 %v818_v52, 16  ;;  %v946_v6 = vor.u32 %v945_v58, %v942_v53  ;;  %v822_v38 = vld [vmem:[#allocation2 + $0x90] sm:$0xf8]  ;;  %v7469_v53 = vld [vmem:[%s8323_s3 + $0xc] sm:$0x3] }
 0x172   : > { %v938_v13 = vsel %vm836_vm6, %v929_v22, %v937_v57  ;;  %v954_v16 = vor.u32 %v953_v34, %v950_v3  ;;  %v960_v20 = vshll.u32 %v818_v52, 16  ;;  %v965_v55 = vshrl.u32 %v7251_v31, 16  ;;  %v824_v34 = vld [vmem:[#allocation2 + $0xa0] sm:$0xf8] }
 0x173   : > { %v7451_v21 = vsel %vm1158_vm5, %v2785_v32, %v2786_v56  ;;  %v959_v30 = vrot.slane %v957_v8, 3  ;;  %v968_v23 = vshll.u32 %v7251_v31, 16  ;;  %v974_v5 = vshrl.u32 %v820_v10, 16 }
 0x174   : > { %v955_v60 = vsel %vm836_vm6, %v946_v6, %v954_v16  ;;  %v962_v15 = vrot.slane %v960_v20, 4  ;;  %v977_v35 = vshll.u32 %v820_v10, 16  ;;  %6026 = vmatmul.mubr.msk.bf16.gmra.mrb[36].mxu0 %vm298_vm3, %v7392_v1  ;;  %v967_v43 = vrot.slane %v965_v55, 3  ;;  %v7489_v6 = vld [vmem:[#allocation2 + $0xa0] sm:$0xf0] }
 0x175   : > { %v970_v44 = vrot.slane %v968_v23, 4  ;;  %v982_v48 = vshrl.u32 %v7236_v19, 16  ;;  %v985_v50 = vshll.u32 %v7236_v19, 16  ;;  %6029 = vmatprep.mubr.msk.bf16.mxu0 %vm298_vm3, %v921_v36  ;;  %v976_v40 = vrot.slane %v974_v5, 3  ;;  %v7492_v55 = vld [vmem:[#allocation2 + $0xb0] sm:$0xf0] }
 0x176   : > { %v963_v31 = vor.u32 %v962_v15, %v959_v30  ;;  %v979_v52 = vrot.slane %v977_v35, 4  ;;  %v2788_v22 = vrot.slane %v7455_v47, 4  ;;  %v2789_v19 = vrot.slane %v2184_v51, 4 }
 0x177   : > { %6124 = vmatmul.mubr.msk.bf16.vlgmr.msra.gmra.mrb[16].mxu1 %vm298_vm3, %v7276_v9  ;;  %v971_v1 = vor.u32 %v970_v44, %v967_v43  ;;  %v984_v39 = vrot.slane %v982_v48, 3  ;;  %v987_v46 = vrot.slane %v985_v50, 4  ;;  %v2791_v57 = vrot.slane %v7458_v42, 4  ;;  %v826_v43 = vld [vmem:[#allocation2 + $0xb0] sm:$0xf8] }
 0x178   : > { %6156 = vmatpush3.bf16.msra.mxu1 %v7140_v41  ;;  %6127 = vmatprep.mubr.msk.bf16.mxu1 %vm298_vm3, %v7293_v4  ;;  %v980_v36 = vor.u32 %v979_v52, %v976_v40  ;;  %v2792_v58 = vrot.slane %v7309_v63, 4  ;;  %v991_v3 = vshrl.u32 %v822_v38, 16  ;;  %v7480_v9 = vsel %vm1158_vm5, %v2788_v22, %v2789_v19 }
 0x179   : > { %v972_v32 = vsel %vm836_vm6, %v963_v31, %v971_v1  ;;  %v988_v56 = vor.u32 %v987_v46, %v984_v39  ;;  %v994_v8 = vshll.u32 %v822_v38, 16  ;;  %6590 = vmatprep.subr.msk.bf16.mxu1 %vm1257_vm4, %v7469_v53  ;;  %v999_v10 = vshrl.u32 %v7298_v12, 16  ;;  %v828_v39 = vld [vmem:[#allocation2 + $0xc0] sm:$0xf8] }
 0x17a   : > { %v7485_v41 = vsel %vm1158_vm5, %v2791_v57, %v2792_v58  ;;  %v993_v4 = vrot.slane %v991_v3, 3  ;;  %v1002_v63 = vshll.u32 %v7298_v12, 16  ;;  %v1008_v51 = vshrl.u32 %v824_v34, 16  ;;  %v7517_v58 = vld [vmem:[#allocation2 + $0xc0] sm:$0xf0] }
 0x17b   : > { %v989_v16 = vsel %vm836_vm6, %v980_v36, %v988_v56  ;;  %v996_v20 = vrot.slane %v994_v8, 4  ;;  %v1011_v30 = vshll.u32 %v824_v34, 16  ;;  %v1001_v23 = vrot.slane %v999_v10, 3  ;;  %v7520_v8 = vld [vmem:[#allocation2 + $0xd0] sm:$0xf0] }
 0x17c   : > { %v1004_v15 = vrot.slane %v1002_v63, 4  ;;  %v1016_v5 = vshrl.u32 %v7287_v2, 16  ;;  %v1019_v35 = vshll.u32 %v7287_v2, 16  ;;  %6030 = vmatmul.mubr.msk.bf16.gmra.mrb[40].mxu0 %vm298_vm3, %v938_v13  ;;  %v1010_v12 = vrot.slane %v1008_v51, 3  ;;  %v830_v51 = vld [vmem:[#allocation2 + $0xd0] sm:$0xf8] }
 0x17d   : > { %v997_v44 = vor.u32 %v996_v20, %v993_v4  ;;  %v1013_v48 = vrot.slane %v1011_v30, 4  ;;  %v2794_v50 = vrot.slane %v7489_v6, 4  ;;  %6033 = vmatprep.mubr.msk.bf16.mxu0 %vm298_vm3, %v955_v60  ;;  %v2795_v52 = vrot.slane %v7318_v59, 4 }
 0x17e   : > { %v1005_v38 = vor.u32 %v1004_v15, %v1001_v23  ;;  %v1018_v31 = vrot.slane %v1016_v5, 3  ;;  %v1021_v40 = vrot.slane %v1019_v35, 4  ;;  %v2797_v2 = vrot.slane %v7492_v55, 4 }
 0x17f   : > { %6128 = vmatmul.mubr.msk.bf16.gmra.mrb[20].mxu1 %vm298_vm3, %v7422_v54  ;;  %v1014_v22 = vor.u32 %v1013_v48, %v1010_v12  ;;  %v2798_v13 = vrot.slane %v7336_v29, 4  ;;  %v1025_v1 = vshrl.u32 %v826_v43, 16  ;;  %v7510_v19 = vsel %vm1158_vm5, %v2794_v50, %v2795_v52 }
 0x180   : > { %6131 = vmatprep.mubr.msk.bf16.mxu1 %vm298_vm3, %v7427_v14  ;;  %v7507_v60 = vsel %vm836_vm6, %v997_v44, %v1005_v38  ;;  %v1022_v46 = vor.u32 %v1021_v40, %v1018_v31  ;;  %v1028_v59 = vshll.u32 %v826_v43, 16  ;;  %v1033_v57 = vshrl.u32 %v7326_v25, 16  ;;  %v832_v38 = vld [vmem:[#allocation2 + $0xe0] sm:$0xf8] }
 0x181   : > { %v7513_v54 = vsel %vm1158_vm5, %v2797_v2, %v2798_v13  ;;  %v1027_v36 = vrot.slane %v1025_v1, 3  ;;  %v1036_v29 = vshll.u32 %v7326_v25, 16  ;;  %v1042_v34 = vshrl.u32 %v828_v39, 16 }
 0x182   : > { %v1023_v14 = vsel %vm836_vm6, %v1014_v22, %v1022_v46  ;;  %v1030_v3 = vrot.slane %v1028_v59, 4  ;;  %v1045_v56 = vshll.u32 %v828_v39, 16  ;;  %v1035_v4 = vrot.slane %v1033_v57, 3  ;;  %v7550_v46 = vld [vmem:[#allocation2 + $0xf0] sm:$0xf0] }
 0x183   : > { %v1038_v10 = vrot.slane %v1036_v29, 4  ;;  %v1050_v63 = vshrl.u32 %v7321_v11, 16  ;;  %v1053_v20 = vshll.u32 %v7321_v11, 16  ;;  %v1044_v23 = vrot.slane %v1042_v34, 3  ;;  %v834_v29 = vld [vmem:[#allocation2 + $0xf0] sm:$0xf8] }
 0x184   : > { %v1031_v30 = vor.u32 %v1030_v3, %v1027_v36  ;;  %v1047_v15 = vrot.slane %v1045_v56, 4  ;;  %v2800_v25 = vrot.slane %v7517_v58, 4  ;;  %6034 = vmatmul.mubr.msk.bf16.gmra.mrb[44].mxu0 %vm298_vm3, %v972_v32  ;;  %v2801_v44 = vrot.slane %v7340_v0, 4 }
 0x185   : > { %v1039_v5 = vor.u32 %v1038_v10, %v1035_v4  ;;  %v1052_v35 = vrot.slane %v1050_v63, 3  ;;  %v1055_v43 = vrot.slane %v1053_v20, 4  ;;  %6037 = vmatprep.mubr.msk.bf16.mxu0 %vm298_vm3, %v989_v16  ;;  %v2803_v48 = vrot.slane %v7520_v8, 4 }
 0x186   : > { %v1048_v12 = vor.u32 %v1047_v15, %v1044_v23  ;;  %v2804_v11 = vrot.slane %v7365_v61, 4  ;;  %v1059_v50 = vshrl.u32 %v830_v51, 16  ;;  %v7536_v40 = vsel %vm1158_vm5, %v2800_v25, %v2801_v44  ;;  %v7560_v15 = vld [vmem:[#allocation2 + $0x100] sm:$0xf0] }
 0x187   : > { %6132 = vmatmul.mubr.msk.bf16.gmra.mrb[24].mxu1 %vm298_vm3, %v7446_v37  ;;  %v7533_v31 = vsel %vm836_vm6, %v1031_v30, %v1039_v5  ;;  %v1056_v32 = vor.u32 %v1055_v43, %v1052_v35  ;;  %v1062_v0 = vshll.u32 %v830_v51, 16  ;;  %v1067_v52 = vshrl.u32 %v7354_v18, 16  ;;  %v7545_v37 = vld [vmem:[#allocation2 + $0xe0] sm:$0xf0] }
 0x188   : > { %6135 = vmatprep.mubr.msk.bf16.mxu1 %vm298_vm3, %v7451_v21  ;;  %v7541_v16 = vsel %vm1158_vm5, %v2803_v48, %v2804_v11  ;;  %v1061_v61 = vrot.slane %v1059_v50, 3  ;;  %v1070_v22 = vshll.u32 %v7354_v18, 16  ;;  %v1076_v1 = vshrl.u32 %v832_v38, 16 }
 0x189   : > { %v7548_v2 = vsel %vm836_vm6, %v1048_v12, %v1056_v32  ;;  %v1064_v13 = vrot.slane %v1062_v0, 4  ;;  %v1079_v39 = vshll.u32 %v832_v38, 16  ;;  %v1069_v59 = vrot.slane %v1067_v52, 3  ;;  %v6679_v0 = vld [vmem:[#allocation2 + $0x10] sm:$0xf0] }
 0x18a   : > { %v1072_v21 = vrot.slane %v1070_v22, 4  ;;  %v1084_v36 = vshrl.u32 %v7348_v28, 16  ;;  %v1087_v57 = vshll.u32 %v7348_v28, 16  ;;  %v1078_v34 = vrot.slane %v1076_v1, 3  ;;  %v1634_v1 = vld [vmem:[#allocation2 + $0x8] sm:$0x1f] }
 0x18b   : > { %v1065_v3 = vor.u32 %v1064_v13, %v1061_v61  ;;  %v1081_v18 = vrot.slane %v1079_v39, 4  ;;  %v2806_v56 = vrot.slane %v7545_v37, 4  ;;  %v2807_v20 = vrot.slane %v7370_v7, 4  ;;  %v6680_v39 = vld [vmem:[%s8323_s3 + $0x6] sm:$0x3] }
 0x18c   : > { %v1073_v4 = vor.u32 %v1072_v21, %v1069_v59  ;;  %v1086_v10 = vrot.slane %v1084_v36, 3  ;;  %v1089_v63 = vrot.slane %v1087_v57, 4  ;;  %6038 = vmatmul.mubr.msk.bf16.gmra.mrb[48].mxu0 %vm298_vm3, %v7507_v60  ;;  %v2809_v30 = vrot.slane %v7550_v46, 4  ;;  %v6681_v57 = vld [vmem:[#allocation2] sm:$0xf0] }
 0x18d   : > { %v1082_v51 = vor.u32 %v1081_v18, %v1078_v34  ;;  %v2810_v23 = vrot.slane %v7383_v62, 4  ;;  %v1093_v28 = vshrl.u32 %v834_v29, 16  ;;  %6041 = vmatprep.mubr.msk.bf16.mxu0 %vm298_vm3, %v1023_v14  ;;  %v7567_v7 = vsel %vm1158_vm5, %v2806_v56, %v2807_v20  ;;  %v3061_v14 = vld [vmem:[#allocation2 + $0x18] sm:$0x1f] }
 0x18e   : > { %v7564_v25 = vsel %vm836_vm6, %v1065_v3, %v1073_v4  ;;  %v1090_v5 = vor.u32 %v1089_v63, %v1086_v10  ;;  %v1096_v35 = vshll.u32 %v834_v29, 16  ;;  %v1101_v43 = vshrl.u32 %v7380_v27, 16  ;;  %v1635_v56 = vld [vmem:[#allocation2 + $0x18] sm:$0x1f] }
 0x18f   : > { %6136 = vmatmul.mubr.msk.bf16.gmra.mrb[28].mxu1 %vm298_vm3, %v7480_v9  ;;  %v7572_v60 = vsel %vm1158_vm5, %v2809_v30, %v2810_v23  ;;  %v1095_v62 = vrot.slane %v1093_v28, 3  ;;  %v1104_v44 = vshll.u32 %v7380_v27, 16  ;;  %v6678_v9 = vld [vmem:[%s8323_s3 + $0x4] sm:$0x3]  ;;  %v2812_v50 = vrot.slane %v7560_v15, 4 }
 0x190   : > { %6139 = vmatprep.mubr.msk.bf16.mxu1 %vm298_vm3, %v7485_v41  ;;  %v7579_v12 = vsel %vm836_vm6, %v1082_v51, %v1090_v5  ;;  %v1098_v48 = vrot.slane %v1096_v35, 4  ;;  %v1974_v11 = vsel %vm1257_vm4, %v6678_v9, 0  ;;  %v1103_v38 = vrot.slane %v1101_v43, 3  ;;  %v6682_v28 = vld [vmem:[#allocation2 + $0x10] sm:$0xf0] }
 0x191   : > { %v1106_v32 = vrot.slane %v1104_v44, 4  ;;  %6054 = vmatpush3.bf16.msra.mxu0 %v1974_v11  ;;  %v2813_v27 = vrot.slane %v7395_v24, 4  ;;  %v3078_v61 = vshrl.u32 %v6679_v0, 16  ;;  %v3081_v52 = vshll.u32 %v6679_v0, 16  ;;  %v1636_v44 = vld [vmem:[#allocation2 + $0x28] sm:$0x1f] }
 0x192   : > { %v1099_v41 = vor.u32 %v1098_v48, %v1095_v62  ;;  %v3086_v22 = vshrl.u32 %v3061_v14, 16  ;;  %v3089_v13 = vshll.u32 %v3061_v14, 16  ;;  %6586 = vmatprep.subr.msk.bf16.mxu0 %vm1257_vm4, %v6680_v39  ;;  %v1652_v24 = vshrl.u32 %v6681_v57, 16 }
 0x193   : > { %v1107_v59 = vor.u32 %v1106_v32, %v1103_v38  ;;  %v7592_v21 = vsel %vm1158_vm5, %v2812_v50, %v2813_v27  ;;  %v3080_v36 = vrot.slane %v3078_v61, 4  ;;  %v3083_v29 = vrot.slane %v3081_v52, 5  ;;  %v6683_v32 = vld [vmem:[#allocation2 + $0x20] sm:$0xf0]  ;;  %v3062_v52 = vld [vmem:[#allocation2 + $0x28] sm:$0x1f] }
 0x194   : > { %v3088_v3 = vrot.slane %v3086_v22, 4  ;;  %v3091_v34 = vrot.slane %v3089_v13, 5  ;;  %v1655_v18 = vshll.u32 %v6681_v57, 16  ;;  %6042 = vmatmul.mubr.msk.bf16.gmra.mrb[52].mxu0 %vm298_vm3, %v7533_v31  ;;  %v1654_v10 = vrot.slane %v1652_v24, 4 }
 0x195   : > { %v7597_v4 = vsel %vm836_vm6, %v1099_v41, %v1107_v59  ;;  %v1660_v63 = vshrl.u32 %v1634_v1, 16  ;;  %v1663_v20 = vshll.u32 %v1634_v1, 16  ;;  %6045 = vmatprep.mubr.msk.bf16.mxu0 %vm298_vm3, %v7548_v2  ;;  %v3084_v51 = vor.u32 %v3083_v29, %v3080_v36  ;;  %v6684_v1 = vld [vmem:[#allocation2 + $0x20] sm:$0xf0] }
 0x196   : > { %v3092_v30 = vor.u32 %v3091_v34, %v3088_v3  ;;  %v1657_v23 = vrot.slane %v1655_v18, 5  ;;  %v1669_v5 = vshrl.u32 %v6682_v28, 16  ;;  %v1672_v31 = vshll.u32 %v6682_v28, 16  ;;  %v6685_v28 = vld [vmem:[#allocation2 + $0x30] sm:$0xf0] }
 0x197   : > { %6140 = vmatmul.mubr.msk.bf16.gmra.mrb[0].mxu1 %vm298_vm3, %v7510_v19  ;;  %v1662_v35 = vrot.slane %v1660_v63, 4  ;;  %v1665_v62 = vrot.slane %v1663_v20, 5  ;;  %v1677_v43 = vshrl.u32 %v1635_v56, 16  ;;  %v1680_v9 = vshll.u32 %v1635_v56, 16  ;;  %v3063_v56 = vld [vmem:[#allocation2 + $0x38] sm:$0x1f] }
 0x198   : > { %6143 = vmatprep.mubr.msk.bf16.mxu1 %vm298_vm3, %v7513_v54  ;;  %v7606_v14 = vsel %vm1650_vm7, %v3084_v51, %v3092_v30  ;;  %v1658_v2 = vor.u32 %v1657_v23, %v1654_v10  ;;  %v1671_v48 = vrot.slane %v1669_v5, 4  ;;  %v1674_v50 = vrot.slane %v1672_v31, 5 }
 0x199   : > { %v1666_v11 = vor.u32 %v1665_v62, %v1662_v35  ;;  %v1679_v38 = vrot.slane %v1677_v43, 4  ;;  %v1686_v27 = vshrl.u32 %v6683_v32, 16  ;;  %v1682_v19 = vrot.slane %v1680_v9, 5  ;;  %v1637_v43 = vld [vmem:[#allocation2 + $0x38] sm:$0x1f] }
 0x19a   : > { %v1689_v0 = vshll.u32 %v6683_v32, 16  ;;  %v1694_v61 = vshrl.u32 %v1636_v44, 16  ;;  %v1697_v41 = vshll.u32 %v1636_v44, 16  ;;  %v1675_v13 = vor.u32 %v1674_v50, %v1671_v48  ;;  %v6686_v48 = vld [vmem:[#allocation2 + $0x30] sm:$0xf0] }
 0x19b   : > { %v1667_v22 = vsel %vm1650_vm7, %v1658_v2, %v1666_v11  ;;  %v1688_v54 = vrot.slane %v1686_v27, 4  ;;  %v3095_v39 = vshrl.u32 %v6684_v1, 16  ;;  %v1683_v59 = vor.u32 %v1682_v19, %v1679_v38  ;;  %v1638_v32 = vld [vmem:[#allocation2 + $0x48] sm:$0x1f] }
 0x19c   : > { %v1691_v36 = vrot.slane %v1689_v0, 5  ;;  %v1696_v57 = vrot.slane %v1694_v61, 4  ;;  %v1699_v24 = vrot.slane %v1697_v41, 5  ;;  %6046 = vmatmul.mubr.msk.bf16.gmra.mrb[56].mxu0 %vm298_vm3, %v7564_v25  ;;  %v3098_v3 = vshll.u32 %v6684_v1, 16 }
 0x19d   : > { %v3097_v29 = vrot.slane %v3095_v39, 4  ;;  %v3103_v34 = vshrl.u32 %v3062_v52, 16  ;;  %v3106_v18 = vshll.u32 %v3062_v52, 16  ;;  %6049 = vmatprep.mubr.msk.bf16.mxu0 %vm298_vm3, %v7579_v12  ;;  %v7614_v10 = vsel %vm1650_vm7, %v1675_v13, %v1683_v59  ;;  %v6687_v13 = vld [vmem:[#allocation2 + $0x40] sm:$0xf0] }
 0x19e   : > { %v1692_v63 = vor.u32 %v1691_v36, %v1688_v54  ;;  %v1700_v20 = vor.u32 %v1699_v24, %v1696_v57  ;;  %v7618_v51 = vsel %vm1257_vm4, %v7469_v53, 0  ;;  %v3100_v25 = vrot.slane %v3098_v3, 5  ;;  %v3064_v57 = vld [vmem:[#allocation2 + $0x48] sm:$0x1f] }
 0x19f   : > { %6144 = vmatmul.mubr.msk.bf16.gmra.mrb[4].mxu1 %vm298_vm3, %v7536_v40  ;;  %v3105_v30 = vrot.slane %v3103_v34, 4  ;;  %v3108_v23 = vrot.slane %v3106_v18, 5  ;;  %v3112_v5 = vshrl.u32 %v6685_v28, 16  ;;  %v3115_v35 = vshll.u32 %v6685_v28, 16 }
 0x1a0   : > { %6147 = vmatprep.mubr.msk.bf16.mxu1 %vm298_vm3, %v7541_v16  ;;  %v7625_v12 = vsel %vm1650_vm7, %v1692_v63, %v1700_v20  ;;  %v3120_v62 = vshrl.u32 %v3063_v56, 16  ;;  %v3123_v31 = vshll.u32 %v3063_v56, 16  ;;  %v3101_v53 = vor.u32 %v3100_v25, %v3097_v29 }
 0x1a1   : > { %v3109_v44 = vor.u32 %v3108_v23, %v3105_v30  ;;  %v3114_v2 = vrot.slane %v3112_v5, 4  ;;  %v1703_v40 = vshrl.u32 %v6686_v48, 16  ;;  %v3117_v9 = vrot.slane %v3115_v35, 5  ;;  %v3065_v23 = vld [vmem:[#allocation2 + $0x58] sm:$0x1f] }
 0x1a2   : > { %v3122_v11 = vrot.slane %v3120_v62, 4  ;;  %v3125_v50 = vrot.slane %v3123_v31, 5  ;;  %v1706_v38 = vshll.u32 %v6686_v48, 16  ;;  %v1711_v19 = vshrl.u32 %v1637_v43, 16 }
 0x1a3   : > { %v7628_v27 = vsel %vm1650_vm7, %v3101_v53, %v3109_v44  ;;  %v1705_v16 = vrot.slane %v1703_v40, 4  ;;  %v1714_v0 = vshll.u32 %v1637_v43, 16  ;;  %v3118_v61 = vor.u32 %v3117_v9, %v3114_v2  ;;  %v1639_v40 = vld [vmem:[#allocation2 + $0x58] sm:$0x1f] }
 0x1a4   : > { %v3126_v41 = vor.u32 %v3125_v50, %v3122_v11  ;;  %v1708_v52 = vrot.slane %v1706_v38, 5  ;;  %v1720_v54 = vshrl.u32 %v6687_v13, 16  ;;  %6050 = vmatmul.mubr.msk.bf16.gmra.mrb[60].mxu0 %vm298_vm3, %v7597_v4  ;;  %v1713_v1 = vrot.slane %v1711_v19, 4  ;;  %v6688_v50 = vld [vmem:[#allocation2 + $0x50] sm:$0xf0] }
 0x1a5   : > { %v1716_v39 = vrot.slane %v1714_v0, 5  ;;  %v1723_v59 = vshll.u32 %v6687_v13, 16  ;;  %v1728_v36 = vshrl.u32 %v1638_v32, 16  ;;  %6055 = vmatprep.mubr.msk.bf16.mxu0 %vm298_vm3, %v1667_v22  ;;  %v1731_v34 = vshll.u32 %v1638_v32, 16 }
 0x1a6   : > { %v7634_v24 = vsel %vm1650_vm7, %v3118_v61, %v3126_v41  ;;  %v1709_v29 = vor.u32 %v1708_v52, %v1705_v16  ;;  %v1722_v3 = vrot.slane %v1720_v54, 4  ;;  %v3129_v4 = vshrl.u32 %v7401_v33, 16  ;;  %v1640_v61 = vld [vmem:[#allocation2 + $0x68] sm:$0x1f] }
 0x1a7   : > { %6148 = vmatmul.mubr.msk.bf16.gmra.mrb[8].mxu1 %vm298_vm3, %v7567_v7  ;;  %v1717_v18 = vor.u32 %v1716_v39, %v1713_v1  ;;  %v1725_v56 = vrot.slane %v1723_v59, 5  ;;  %v1730_v63 = vrot.slane %v1728_v36, 4  ;;  %v1733_v20 = vrot.slane %v1731_v34, 5  ;;  %v6689_v39 = vld [vmem:[#allocation2 + $0x60] sm:$0xf0] }
 0x1a8   : > { %6151 = vmatprep.mubr.msk.bf16.mxu1 %vm298_vm3, %v7572_v60  ;;  %v3132_v22 = vshll.u32 %v7401_v33, 16  ;;  %v3137_v25 = vshrl.u32 %v3064_v57, 16  ;;  %v3140_v30 = vshll.u32 %v3064_v57, 16  ;;  %v3131_v35 = vrot.slane %v3129_v4, 4 }
 0x1a9   : > { %v1718_v28 = vsel %vm1650_vm7, %v1709_v29, %v1717_v18  ;;  %v1726_v5 = vor.u32 %v1725_v56, %v1722_v3  ;;  %v3146_v7 = vshrl.u32 %v7412_v49, 16  ;;  %v1734_v62 = vor.u32 %v1733_v20, %v1730_v63  ;;  %v3066_v3 = vld [vmem:[#allocation2 + $0x68] sm:$0x1f] }
 0x1aa   : > { %v3134_v31 = vrot.slane %v3132_v22, 5  ;;  %v3139_v43 = vrot.slane %v3137_v25, 4  ;;  %v3142_v53 = vrot.slane %v3140_v30, 5  ;;  %v3149_v2 = vshll.u32 %v7412_v49, 16 }
 0x1ab   : > { %v3148_v44 = vrot.slane %v3146_v7, 4  ;;  %v3154_v60 = vshrl.u32 %v3065_v23, 16  ;;  %v3157_v48 = vshll.u32 %v3065_v23, 16  ;;  %v1735_v33 = vsel %vm1650_vm7, %v1726_v5, %v1734_v62  ;;  %v3067_v23 = vld [vmem:[#allocation2 + $0x78] sm:$0x1f] }
 0x1ac   : > { %v3135_v9 = vor.u32 %v3134_v31, %v3131_v35  ;;  %v3143_v11 = vor.u32 %v3142_v53, %v3139_v43  ;;  %v1737_v38 = vshrl.u32 %v6688_v50, 16  ;;  %6056 = vmatmul.mubr.msk.bf16.vlgmr.msra.gmra.mrb[32].mxu0 %vm298_vm3, %v7614_v10  ;;  %v3151_v32 = vrot.slane %v3149_v2, 5  ;;  %v1641_v2 = vld [vmem:[#allocation2 + $0x78] sm:$0x1f] }
 0x1ad   : > { %v3156_v16 = vrot.slane %v3154_v60, 4  ;;  %v3159_v19 = vrot.slane %v3157_v48, 5  ;;  %v1740_v0 = vshll.u32 %v6688_v50, 16  ;;  %6059 = vmatprep.mubr.msk.bf16.mxu0 %vm298_vm3, %v7625_v12  ;;  %v1745_v52 = vshrl.u32 %v1639_v40, 16  ;;  %6088 = vmatpush3.bf16.msra.mxu0 %v7068_v26 }
 0x1ae   : > { %v7651_v49 = vsel %vm1650_vm7, %v3135_v9, %v3143_v11  ;;  %v1739_v41 = vrot.slane %v1737_v38, 4  ;;  %v1748_v13 = vshll.u32 %v1639_v40, 16  ;;  %v3152_v10 = vor.u32 %v3151_v32, %v3148_v44  ;;  %v7671_v9 = vld [vmem:[%s8323_s3 + $0xe] sm:$0x3]  ;;  %v6690_v38 = vld [vmem:[#allocation2 + $0x70] sm:$0xf0] }
 0x1af   : > { %6152 = vmatmul.mubr.msk.bf16.gmra.mrb[12].mxu1 %vm298_vm3, %v7592_v21  ;;  %v3160_v54 = vor.u32 %v3159_v19, %v3156_v16  ;;  %v1742_v1 = vrot.slane %v1740_v0, 5  ;;  %v1754_v59 = vshrl.u32 %v6689_v39, 16  ;;  %v1747_v12 = vrot.slane %v1745_v52, 4  ;;  %v1642_v0 = vld [vmem:[#allocation2 + $0x88] sm:$0x1f] }
 0x1b0   : > { %6157 = vmatprep.mubr.msk.bf16.mxu1 %vm298_vm3, %v7606_v14  ;;  %v1750_v36 = vrot.slane %v1748_v13, 5  ;;  %v1757_v57 = vshll.u32 %v6689_v39, 16  ;;  %v1762_v29 = vshrl.u32 %v1640_v61, 16  ;;  %v1765_v56 = vshll.u32 %v1640_v61, 16 }
 0x1b1   : > { %v7659_v34 = vsel %vm1650_vm7, %v3152_v10, %v3160_v54  ;;  %v1743_v26 = vor.u32 %v1742_v1, %v1739_v41  ;;  %v1756_v18 = vrot.slane %v1754_v59, 4  ;;  %v3163_v20 = vshrl.u32 %v7430_v17, 16  ;;  %v6691_v54 = vld [vmem:[#allocation2 + $0x80] sm:$0xf0] }
 0x1b2   : > { %v1751_v21 = vor.u32 %v1750_v36, %v1747_v12  ;;  %v1759_v63 = vrot.slane %v1757_v57, 5  ;;  %v1764_v4 = vrot.slane %v1762_v29, 4  ;;  %v1767_v22 = vrot.slane %v1765_v56, 5  ;;  %v3068_v36 = vld [vmem:[#allocation2 + $0x88] sm:$0x1f] }
 0x1b3   : > { %v3166_v25 = vshll.u32 %v7430_v17, 16  ;;  %v3171_v14 = vshrl.u32 %v3066_v3, 16  ;;  %v3174_v30 = vshll.u32 %v3066_v3, 16  ;;  %v3165_v7 = vrot.slane %v3163_v20, 4 }
 0x1b4   : > { %v1752_v5 = vsel %vm1650_vm7, %v1743_v26, %v1751_v21  ;;  %v1760_v35 = vor.u32 %v1759_v63, %v1756_v18  ;;  %v3180_v62 = vshrl.u32 %v7435_v45, 16  ;;  %6060 = vmatmul.mubr.msk.bf16.gmra.mrb[36].mxu0 %vm298_vm3, %v1718_v28  ;;  %v1768_v31 = vor.u32 %v1767_v22, %v1764_v4 }
 0x1b5   : > { %v3168_v43 = vrot.slane %v3166_v25, 5  ;;  %v3173_v53 = vrot.slane %v3171_v14, 4  ;;  %v3176_v44 = vrot.slane %v3174_v30, 5  ;;  %6063 = vmatprep.mubr.msk.bf16.mxu0 %vm298_vm3, %v1735_v33  ;;  %v3183_v17 = vshll.u32 %v7435_v45, 16  ;;  %v3069_v14 = vld [vmem:[#allocation2 + $0x98] sm:$0x1f] }
 0x1b6   : > { %v3182_v60 = vrot.slane %v3180_v62, 4  ;;  %v3188_v48 = vshrl.u32 %v3067_v23, 16  ;;  %v3191_v40 = vshll.u32 %v3067_v23, 16  ;;  %v1769_v28 = vsel %vm1650_vm7, %v1760_v35, %v1768_v31 }
 0x1b7   : > { %6158 = vmatmul.mubr.msk.bf16.vlgmr.msra.gmra.mrb[16].mxu1 %vm298_vm3, %v7628_v27  ;;  %v3169_v11 = vor.u32 %v3168_v43, %v3165_v7  ;;  %v3177_v50 = vor.u32 %v3176_v44, %v3173_v53  ;;  %v1771_v32 = vshrl.u32 %v6690_v38, 16  ;;  %v3185_v45 = vrot.slane %v3183_v17, 5 }
 0x1b8   : > { %6190 = vmatpush3.bf16.msra.mxu1 %v7618_v51  ;;  %6161 = vmatprep.mubr.msk.bf16.mxu1 %vm298_vm3, %v7634_v24  ;;  %v3190_v33 = vrot.slane %v3188_v48, 4  ;;  %v3193_v16 = vrot.slane %v3191_v40, 5  ;;  %v1774_v19 = vshll.u32 %v6690_v38, 16  ;;  %v1779_v41 = vshrl.u32 %v1641_v2, 16  ;;  %v6692_v40 = vld [vmem:[#allocation2 + $0x90] sm:$0xf0] }
 0x1b9   : > { %v7680_v61 = vsel %vm1650_vm7, %v3169_v11, %v3177_v50  ;;  %v1773_v27 = vrot.slane %v1771_v32, 4  ;;  %v1782_v52 = vshll.u32 %v1641_v2, 16  ;;  %6591 = vmatprep.subr.msk.bf16.mxu1 %vm1257_vm4, %v7671_v9  ;;  %v3186_v13 = vor.u32 %v3185_v45, %v3182_v60  ;;  %v1643_v60 = vld [vmem:[#allocation2 + $0x98] sm:$0x1f]  ;;  %v1644_v32 = vld [vmem:[#allocation2 + $0xa8] sm:$0x1f] }
 0x1ba   : > { %v3194_v10 = vor.u32 %v3193_v16, %v3190_v33  ;;  %v1776_v51 = vrot.slane %v1774_v19, 5  ;;  %v1788_v1 = vshrl.u32 %v6691_v54, 16  ;;  %v1781_v24 = vrot.slane %v1779_v41, 4  ;;  %v6693_v41 = vld [vmem:[#allocation2 + $0xa0] sm:$0xf0] }
 0x1bb   : > { %v1784_v39 = vrot.slane %v1782_v52, 5  ;;  %v1791_v59 = vshll.u32 %v6691_v54, 16  ;;  %v1796_v12 = vshrl.u32 %v1642_v0, 16  ;;  %v1799_v26 = vshll.u32 %v1642_v0, 16 }
 0x1bc   : > { %v3195_v57 = vsel %vm1650_vm7, %v3186_v13, %v3194_v10  ;;  %v1777_v29 = vor.u32 %v1776_v51, %v1773_v27  ;;  %v1790_v3 = vrot.slane %v1788_v1, 4  ;;  %6064 = vmatmul.mubr.msk.bf16.gmra.mrb[40].mxu0 %vm298_vm3, %v1752_v5  ;;  %v3197_v63 = vshrl.u32 %v7455_v47, 16  ;;  %v3070_v1 = vld [vmem:[#allocation2 + $0xa8] sm:$0x1f] }
 0x1bd   : > { %v1785_v18 = vor.u32 %v1784_v39, %v1781_v24  ;;  %v1793_v56 = vrot.slane %v1791_v59, 5  ;;  %v1798_v21 = vrot.slane %v1796_v12, 4  ;;  %6067 = vmatprep.mubr.msk.bf16.mxu0 %vm298_vm3, %v1769_v28  ;;  %v1801_v4 = vrot.slane %v1799_v26, 5 }
 0x1be   : > { %v3200_v20 = vshll.u32 %v7455_v47, 16  ;;  %v3205_v22 = vshrl.u32 %v3068_v36, 16  ;;  %v3208_v25 = vshll.u32 %v3068_v36, 16  ;;  %v3199_v5 = vrot.slane %v3197_v63, 4 }
 0x1bf   : > { %6162 = vmatmul.mubr.msk.bf16.gmra.mrb[20].mxu1 %vm298_vm3, %v7651_v49  ;;  %v1786_v30 = vsel %vm1650_vm7, %v1777_v29, %v1785_v18  ;;  %v1794_v23 = vor.u32 %v1793_v56, %v1790_v3  ;;  %v3214_v35 = vshrl.u32 %v7458_v42, 16  ;;  %v1802_v7 = vor.u32 %v1801_v4, %v1798_v21  ;;  %v3071_v4 = vld [vmem:[#allocation2 + $0xb8] sm:$0x1f] }
 0x1c0   : > { %6165 = vmatprep.mubr.msk.bf16.mxu1 %vm298_vm3, %v7659_v34  ;;  %v3202_v62 = vrot.slane %v3200_v20, 5  ;;  %v3207_v31 = vrot.slane %v3205_v22, 4  ;;  %v3210_v43 = vrot.slane %v3208_v25, 5  ;;  %v3217_v53 = vshll.u32 %v7458_v42, 16 }
 0x1c1   : > { %v3216_v47 = vrot.slane %v3214_v35, 4  ;;  %v3222_v44 = vshrl.u32 %v3069_v14, 16  ;;  %v3225_v2 = vshll.u32 %v3069_v14, 16  ;;  %v1803_v49 = vsel %vm1650_vm7, %v1794_v23, %v1802_v7 }
 0x1c2   : > { %v3203_v17 = vor.u32 %v3202_v62, %v3199_v5  ;;  %v3211_v48 = vor.u32 %v3210_v43, %v3207_v31  ;;  %v1805_v28 = vshrl.u32 %v6692_v40, 16  ;;  %v3219_v11 = vrot.slane %v3217_v53, 5  ;;  %v1645_v31 = vld [vmem:[#allocation2 + $0xb8] sm:$0x1f]  ;;  %v6694_v53 = vld [vmem:[#allocation2 + $0xb0] sm:$0xf0] }
 0x1c3   : > { %v3224_v50 = vrot.slane %v3222_v44, 4  ;;  %v3227_v38 = vrot.slane %v3225_v2, 5  ;;  %v1808_v34 = vshll.u32 %v6692_v40, 16  ;;  %v1813_v16 = vshrl.u32 %v1643_v60, 16 }
 0x1c4   : > { %v3212_v45 = vsel %vm1650_vm7, %v3203_v17, %v3211_v48  ;;  %v1807_v33 = vrot.slane %v1805_v28, 4  ;;  %v1816_v19 = vshll.u32 %v1643_v60, 16  ;;  %6068 = vmatmul.mubr.msk.bf16.gmra.mrb[44].mxu0 %vm298_vm3, %v1786_v30  ;;  %v3220_v42 = vor.u32 %v3219_v11, %v3216_v47  ;;  %v1646_v48 = vld [vmem:[#allocation2 + $0xc8] sm:$0x1f] }
 0x1c5   : > { %v3228_v0 = vor.u32 %v3227_v38, %v3224_v50  ;;  %v1810_v27 = vrot.slane %v1808_v34, 5  ;;  %v1822_v52 = vshrl.u32 %v6693_v41, 16  ;;  %6071 = vmatprep.mubr.msk.bf16.mxu0 %vm298_vm3, %v1803_v49  ;;  %v1815_v13 = vrot.slane %v1813_v16, 4 }
 0x1c6   : > { %v1818_v10 = vrot.slane %v1816_v19, 5  ;;  %v1825_v51 = vshll.u32 %v6693_v41, 16  ;;  %v1830_v54 = vshrl.u32 %v1644_v32, 16  ;;  %v1833_v12 = vshll.u32 %v1644_v32, 16  ;;  %v6695_v32 = vld [vmem:[#allocation2 + $0xc0] sm:$0xf0] }
 0x1c7   : > { %6166 = vmatmul.mubr.msk.bf16.gmra.mrb[24].mxu1 %vm298_vm3, %v7680_v61  ;;  %v3229_v24 = vsel %vm1650_vm7, %v3220_v42, %v3228_v0  ;;  %v1811_v39 = vor.u32 %v1810_v27, %v1807_v33  ;;  %v1824_v59 = vrot.slane %v1822_v52, 4  ;;  %v3231_v26 = vshrl.u32 %v7489_v6, 16  ;;  %v3072_v27 = vld [vmem:[#allocation2 + $0xc8] sm:$0x1f] }
 0x1c8   : > { %6169 = vmatprep.mubr.msk.bf16.mxu1 %vm298_vm3, %v3195_v57  ;;  %v1819_v36 = vor.u32 %v1818_v10, %v1815_v13  ;;  %v1827_v29 = vrot.slane %v1825_v51, 5  ;;  %v1832_v3 = vrot.slane %v1830_v54, 4  ;;  %v1835_v18 = vrot.slane %v1833_v12, 5 }
 0x1c9   : > { %v3234_v56 = vshll.u32 %v7489_v6, 16  ;;  %v3239_v21 = vshrl.u32 %v3070_v1, 16  ;;  %v3242_v63 = vshll.u32 %v3070_v1, 16  ;;  %v3233_v22 = vrot.slane %v3231_v26, 4 }
 0x1ca   : > { %v1820_v61 = vsel %vm1650_vm7, %v1811_v39, %v1819_v36  ;;  %v1828_v20 = vor.u32 %v1827_v29, %v1824_v59  ;;  %v3248_v25 = vshrl.u32 %v7492_v55, 16  ;;  %v1836_v14 = vor.u32 %v1835_v18, %v1832_v3  ;;  %v3073_v36 = vld [vmem:[#allocation2 + $0xd8] sm:$0x1f] }
 0x1cb   : > { %v3236_v30 = vrot.slane %v3234_v56, 5  ;;  %v3241_v57 = vrot.slane %v3239_v21, 4  ;;  %v3244_v23 = vrot.slane %v3242_v63, 5  ;;  %v3251_v35 = vshll.u32 %v7492_v55, 16 }
 0x1cc   : > { %v3250_v5 = vrot.slane %v3248_v25, 4  ;;  %v3256_v7 = vshrl.u32 %v3071_v4, 16  ;;  %v3259_v62 = vshll.u32 %v3071_v4, 16  ;;  %6072 = vmatmul.mubr.msk.bf16.gmra.mrb[48].mxu0 %vm298_vm3, %v1820_v61  ;;  %v1837_v6 = vsel %vm1650_vm7, %v1828_v20, %v1836_v14  ;;  %v1647_v25 = vld [vmem:[#allocation2 + $0xd8] sm:$0x1f] }
 0x1cd   : > { %v3237_v43 = vor.u32 %v3236_v30, %v3233_v22  ;;  %v3245_v47 = vor.u32 %v3244_v23, %v3241_v57  ;;  %v1839_v44 = vshrl.u32 %v6694_v53, 16  ;;  %6075 = vmatprep.mubr.msk.bf16.mxu0 %vm298_vm3, %v1837_v6  ;;  %v3253_v2 = vrot.slane %v3251_v35, 5  ;;  %v6696_v23 = vld [vmem:[#allocation2 + $0xd0] sm:$0xf0]  ;;  %v1648_v6 = vld [vmem:[#allocation2 + $0xe8] sm:$0x1f] }
 0x1ce   : > { %v3258_v60 = vrot.slane %v3256_v7, 4  ;;  %v3261_v49 = vrot.slane %v3259_v62, 5  ;;  %v1842_v17 = vshll.u32 %v6694_v53, 16  ;;  %v1847_v28 = vshrl.u32 %v1645_v31, 16 }
 0x1cf   : > { %6170 = vmatmul.mubr.msk.bf16.gmra.mrb[28].mxu1 %vm298_vm3, %v3212_v45  ;;  %v3246_v55 = vsel %vm1650_vm7, %v3237_v43, %v3245_v47  ;;  %v1841_v40 = vrot.slane %v1839_v44, 4  ;;  %v1850_v11 = vshll.u32 %v1645_v31, 16  ;;  %v3254_v50 = vor.u32 %v3253_v2, %v3250_v5 }
 0x1d0   : > { %6173 = vmatprep.mubr.msk.bf16.mxu1 %vm298_vm3, %v3229_v24  ;;  %v3262_v38 = vor.u32 %v3261_v49, %v3258_v60  ;;  %v1844_v34 = vrot.slane %v1842_v17, 5  ;;  %v1856_v33 = vshrl.u32 %v6695_v32, 16  ;;  %v1849_v16 = vrot.slane %v1847_v28, 4  ;;  %v6697_v49 = vld [vmem:[#allocation2 + $0xe0] sm:$0xf0] }
 0x1d1   : > { %v1852_v19 = vrot.slane %v1850_v11, 5  ;;  %v1859_v42 = vshll.u32 %v6695_v32, 16  ;;  %v1864_v0 = vshrl.u32 %v1646_v48, 16  ;;  %v1867_v13 = vshll.u32 %v1646_v48, 16  ;;  %v3074_v11 = vld [vmem:[#allocation2 + $0xe8] sm:$0x1f] }
 0x1d2   : > { %v3263_v41 = vsel %vm1650_vm7, %v3254_v50, %v3262_v38  ;;  %v1845_v45 = vor.u32 %v1844_v34, %v1841_v40  ;;  %v1858_v52 = vrot.slane %v1856_v33, 4  ;;  %v3265_v1 = vshrl.u32 %v7517_v58, 16 }
 0x1d3   : > { %v1853_v10 = vor.u32 %v1852_v19, %v1849_v16  ;;  %v1861_v51 = vrot.slane %v1859_v42, 5  ;;  %v1866_v54 = vrot.slane %v1864_v0, 4  ;;  %v1869_v24 = vrot.slane %v1867_v13, 5 }
 0x1d4   : > { %v3268_v39 = vshll.u32 %v7517_v58, 16  ;;  %v3273_v59 = vshrl.u32 %v3072_v27, 16  ;;  %v3276_v12 = vshll.u32 %v3072_v27, 16  ;;  %v3267_v26 = vrot.slane %v3265_v1, 4 }
 0x1d5   : > { %v1854_v29 = vsel %vm1650_vm7, %v1845_v45, %v1853_v10  ;;  %v1862_v3 = vor.u32 %v1861_v51, %v1858_v52  ;;  %v3282_v18 = vshrl.u32 %v7520_v8, 16  ;;  %v1870_v56 = vor.u32 %v1869_v24, %v1866_v54  ;;  %v3075_v52 = vld [vmem:[#allocation2 + $0xf8] sm:$0x1f] }
 0x1d6   : > { %6076 = vmatmul.mubr.msk.bf16.gmra.mrb[52].mxu0 %vm298_vm3, %v1854_v29  ;;  %v3270_v21 = vrot.slane %v3268_v39, 5  ;;  %v3275_v63 = vrot.slane %v3273_v59, 4  ;;  %v3278_v4 = vrot.slane %v3276_v12, 5  ;;  %v3285_v58 = vshll.u32 %v7520_v8, 16 }
 0x1d7   : > { %6174 = vmatmul.mubr.msk.bf16.gmra.mrb[0].mxu1 %vm298_vm3, %v3246_v55  ;;  %v3284_v61 = vrot.slane %v3282_v18, 4  ;;  %v3290_v20 = vshrl.u32 %v3073_v36, 16  ;;  %v3293_v22 = vshll.u32 %v3073_v36, 16  ;;  %v1871_v14 = vsel %vm1650_vm7, %v1862_v3, %v1870_v56  ;;  %v1649_v3 = vld [vmem:[#allocation2 + $0xf8] sm:$0x1f] }
 0x1d8   : > { %6177 = vmatprep.mubr.msk.bf16.mxu1 %vm298_vm3, %v3263_v41  ;;  %v3271_v30 = vor.u32 %v3270_v21, %v3267_v26  ;;  %v3279_v57 = vor.u32 %v3278_v4, %v3275_v63  ;;  %v1873_v5 = vshrl.u32 %v6696_v23, 16  ;;  %6079 = vmatprep.mubr.msk.bf16.mxu0 %vm298_vm3, %v1871_v14  ;;  %v3287_v35 = vrot.slane %v3285_v58, 5  ;;  %v6698_v21 = vld [vmem:[#allocation2 + $0xf0] sm:$0xf0] }
 0x1d9   : > { %v3292_v7 = vrot.slane %v3290_v20, 4  ;;  %v3295_v62 = vrot.slane %v3293_v22, 5  ;;  %v1876_v31 = vshll.u32 %v6696_v23, 16  ;;  %v1881_v47 = vshrl.u32 %v1647_v25, 16  ;;  %v2169_v4 = vld [vmem:[#allocation2 + $0x10] sm:$0xf8] }
 0x1da   : > { %v3280_v8 = vsel %vm1650_vm7, %v3271_v30, %v3279_v57  ;;  %v1875_v43 = vrot.slane %v1873_v5, 4  ;;  %v1884_v53 = vshll.u32 %v1647_v25, 16  ;;  %v3288_v44 = vor.u32 %v3287_v35, %v3284_v61 }
 0x1db   : > { %v3296_v2 = vor.u32 %v3295_v62, %v3292_v7  ;;  %v1878_v60 = vrot.slane %v1876_v31, 5  ;;  %v1890_v17 = vshrl.u32 %v6697_v49, 16  ;;  %v1883_v48 = vrot.slane %v1881_v47, 4 }
 0x1dc   : > { %v1886_v55 = vrot.slane %v1884_v53, 5  ;;  %v1893_v40 = vshll.u32 %v6697_v49, 16  ;;  %v1898_v28 = vshrl.u32 %v1648_v6, 16  ;;  %v1901_v32 = vshll.u32 %v1648_v6, 16  ;;  %v6699_v6 = vld [vmem:[#allocation2 + $0x18] sm:$0xf] }
 0x1dd   : > { %v3297_v50 = vsel %vm1650_vm7, %v3288_v44, %v3296_v2  ;;  %v1879_v38 = vor.u32 %v1878_v60, %v1875_v43  ;;  %v1892_v34 = vrot.slane %v1890_v17, 4  ;;  %v3299_v42 = vshrl.u32 %v7545_v37, 16  ;;  %v3076_v43 = vld [vmem:[#allocation2 + $0x108] sm:$0x1f]  ;;  %v3596_v60 = vld [vmem:[#allocation2 + $0x20] sm:$0xf8] }
 0x1de   : > { %v1887_v33 = vor.u32 %v1886_v55, %v1883_v48  ;;  %v1895_v16 = vrot.slane %v1893_v40, 5  ;;  %v1900_v19 = vrot.slane %v1898_v28, 4  ;;  %v1903_v0 = vrot.slane %v1901_v32, 5 }
 0x1df   : > { %6178 = vmatmul.mubr.msk.bf16.gmra.mrb[4].mxu1 %vm298_vm3, %v3280_v8  ;;  %v3302_v27 = vshll.u32 %v7545_v37, 16  ;;  %v3307_v41 = vshrl.u32 %v3074_v11, 16  ;;  %v3310_v45 = vshll.u32 %v3074_v11, 16  ;;  %v3301_v51 = vrot.slane %v3299_v42, 4 }
 0x1e0   : > { %6181 = vmatprep.mubr.msk.bf16.mxu1 %vm298_vm3, %v3297_v50  ;;  %v1888_v13 = vsel %vm1650_vm7, %v1879_v38, %v1887_v33  ;;  %v1896_v10 = vor.u32 %v1895_v16, %v1892_v34  ;;  %v3316_v54 = vshrl.u32 %v7550_v46, 16  ;;  %v1904_v1 = vor.u32 %v1903_v0, %v1900_v19  ;;  %v7744_v38 = vld [vmem:[#allocation2 + $0x28] sm:$0xf]  ;;  %v2171_v19 = vld [vmem:[#allocation2 + $0x20] sm:$0xf8] }
 0x1e1   : > { %6080 = vmatmul.mubr.msk.bf16.gmra.mrb[56].mxu0 %vm298_vm3, %v1888_v13  ;;  %v3304_v24 = vrot.slane %v3302_v27, 5  ;;  %v3309_v39 = vrot.slane %v3307_v41, 4  ;;  %v3312_v59 = vrot.slane %v3310_v45, 5  ;;  %v3319_v37 = vshll.u32 %v7550_v46, 16 }
 0x1e2   : > { %v3318_v12 = vrot.slane %v3316_v54, 4  ;;  %v3324_v36 = vshrl.u32 %v3075_v52, 16  ;;  %v3327_v29 = vshll.u32 %v3075_v52, 16  ;;  %v1905_v26 = vsel %vm1650_vm7, %v1896_v10, %v1904_v1 }
 0x1e3   : > { %v3305_v18 = vor.u32 %v3304_v24, %v3301_v51  ;;  %v3313_v56 = vor.u32 %v3312_v59, %v3309_v39  ;;  %v1907_v63 = vshrl.u32 %v6698_v21, 16  ;;  %6083 = vmatprep.mubr.msk.bf16.mxu0 %vm298_vm3, %v1905_v26  ;;  %v3321_v61 = vrot.slane %v3319_v37, 5  ;;  %v2173_v24 = vld [vmem:[#allocation2 + $0x30] sm:$0xf8] }
 0x1e4   : > { %v3326_v58 = vrot.slane %v3324_v36, 4  ;;  %v3329_v20 = vrot.slane %v3327_v29, 5  ;;  %v1910_v22 = vshll.u32 %v6698_v21, 16  ;;  %v1915_v46 = vshrl.u32 %v1649_v3, 16 }
 0x1e5   : > { %v3314_v25 = vsel %vm1650_vm7, %v3305_v18, %v3313_v56  ;;  %v1909_v14 = vrot.slane %v1907_v63, 4  ;;  %v1918_v30 = vshll.u32 %v1649_v3, 16  ;;  %v3322_v57 = vor.u32 %v3321_v61, %v3318_v12  ;;  %v6700_v3 = vld [vmem:[#allocation2 + $0x28] sm:$0xf]  ;;  %v3598_v61 = vld [vmem:[#allocation2 + $0x30] sm:$0xf8] }
 0x1e6   : > { %v3330_v23 = vor.u32 %v3329_v20, %v3326_v58  ;;  %v1912_v5 = vrot.slane %v1910_v22, 5  ;;  %v2202_v35 = vshrl.u32 %v2169_v4, 16  ;;  %v1917_v7 = vrot.slane %v1915_v46, 4  ;;  %v7754_v46 = vld [vmem:[#allocation2 + $0x38] sm:$0xf] }
 0x1e7   : > { %6182 = vmatmul.mubr.msk.bf16.gmra.mrb[8].mxu1 %vm298_vm3, %v3314_v25  ;;  %v1920_v62 = vrot.slane %v1918_v30, 5  ;;  %v2205_v31 = vshll.u32 %v2169_v4, 16  ;;  %v2210_v8 = vshrl.u32 %v6699_v6, 16  ;;  %v2213_v2 = vshll.u32 %v6699_v6, 16  ;;  %v6701_v25 = vld [vmem:[#allocation2 + $0x38] sm:$0xf] }
 0x1e8   : > { %v3331_v47 = vsel %vm1650_vm7, %v3322_v57, %v3330_v23  ;;  %v1913_v53 = vor.u32 %v1912_v5, %v1909_v14  ;;  %v2204_v44 = vrot.slane %v2202_v35, 3  ;;  %v3333_v55 = vshrl.u32 %v7560_v15, 16  ;;  %v3600_v6 = vld [vmem:[#allocation2 + $0x40] sm:$0xf8] }
 0x1e9   : > { %6185 = vmatprep.mubr.msk.bf16.mxu1 %vm298_vm3, %v3331_v47  ;;  %v1921_v49 = vor.u32 %v1920_v62, %v1917_v7  ;;  %v2207_v17 = vrot.slane %v2205_v31, 4  ;;  %v2212_v48 = vrot.slane %v2210_v8, 3  ;;  %v2215_v40 = vrot.slane %v2213_v2, 4 }
 0x1ea   : > { %v3336_v28 = vshll.u32 %v7560_v15, 16  ;;  %v3341_v11 = vshrl.u32 %v3076_v43, 16  ;;  %v3344_v50 = vshll.u32 %v3076_v43, 16  ;;  %v3335_v33 = vrot.slane %v3333_v55, 4 }
 0x1eb   : > { %v1922_v34 = vsel %vm1650_vm7, %v1913_v53, %v1921_v49  ;;  %v2208_v32 = vor.u32 %v2207_v17, %v2204_v44  ;;  %v3629_v16 = vshrl.u32 %v3596_v60, 16  ;;  %v2216_v42 = vor.u32 %v2215_v40, %v2212_v48  ;;  %v7760_v44 = vld [vmem:[#allocation2 + $0x48] sm:$0xf]  ;;  %v2175_v48 = vld [vmem:[#allocation2 + $0x40] sm:$0xf8] }
 0x1ec   : > { %6084 = vmatmul.mubr.msk.bf16.gmra.mrb[60].mxu0 %vm298_vm3, %v1922_v34  ;;  %v3338_v0 = vrot.slane %v3336_v28, 5  ;;  %v3343_v27 = vrot.slane %v3341_v11, 4  ;;  %v3346_v41 = vrot.slane %v3344_v50, 5  ;;  %v3632_v52 = vshll.u32 %v3596_v60, 16 }
 0x1ed   : > { %v3631_v45 = vrot.slane %v3629_v16, 3  ;;  %v3637_v15 = vshrl.u32 %v7744_v38, 16  ;;  %v3640_v13 = vshll.u32 %v7744_v38, 16  ;;  %v2217_v10 = vsel %vm836_vm6, %v2208_v32, %v2216_v42 }
 0x1ee   : > { %v3339_v51 = vor.u32 %v3338_v0, %v3335_v33  ;;  %v3347_v54 = vor.u32 %v3346_v41, %v3343_v27  ;;  %v2219_v1 = vshrl.u32 %v2171_v19, 16  ;;  %6089 = vmatprep.mubr.msk.bf16.mxu0 %vm298_vm3, %v2217_v10  ;;  %v3634_v39 = vrot.slane %v3632_v52, 4  ;;  %v2177_v27 = vld [vmem:[#allocation2 + $0x50] sm:$0xf8] }
 0x1ef   : > { %v3639_v59 = vrot.slane %v3637_v15, 3  ;;  %v3642_v12 = vrot.slane %v3640_v13, 4  ;;  %v2222_v37 = vshll.u32 %v2171_v19, 16  ;;  %v2227_v26 = vshrl.u32 %v6700_v3, 16 }
 0x1f0   : > { %v3348_v36 = vsel %vm1650_vm7, %v3339_v51, %v3347_v54  ;;  %v2221_v29 = vrot.slane %v2219_v1, 3  ;;  %v2230_v18 = vshll.u32 %v6700_v3, 16  ;;  %v3635_v56 = vor.u32 %v3634_v39, %v3631_v45  ;;  %v6702_v51 = vld [vmem:[#allocation2 + $0x48] sm:$0xf]  ;;  %v7774_v1 = vld [vmem:[%s8323_s3 + $0x10] sm:$0x3] }
 0x1f1   : > { %6186 = vmatmul.mubr.msk.bf16.gmra.mrb[12].mxu1 %vm298_vm3, %v3348_v36  ;;  %v3643_v21 = vor.u32 %v3642_v12, %v3639_v59  ;;  %v2224_v63 = vrot.slane %v2222_v37, 4  ;;  %v2236_v4 = vshrl.u32 %v2173_v24, 16  ;;  %v2229_v58 = vrot.slane %v2227_v26, 3  ;;  %v3602_v37 = vld [vmem:[#allocation2 + $0x50] sm:$0xf8] }
 0x1f2   : > { %v2232_v20 = vrot.slane %v2230_v18, 4  ;;  %v2239_v22 = vshll.u32 %v2173_v24, 16  ;;  %v2244_v14 = vshrl.u32 %v6701_v25, 16  ;;  %v2247_v5 = vshll.u32 %v6701_v25, 16  ;;  %v6703_v26 = vld [vmem:[#allocation2 + $0x58] sm:$0xf] }
 0x1f3   : > { %v3644_v30 = vsel %vm836_vm6, %v3635_v56, %v3643_v21  ;;  %v2225_v57 = vor.u32 %v2224_v63, %v2221_v29  ;;  %v2238_v23 = vrot.slane %v2236_v4, 3  ;;  %v3646_v31 = vshrl.u32 %v3598_v61, 16  ;;  %v7777_v56 = vld [vmem:[#allocation2 + $0x58] sm:$0xf] }
 0x1f4   : > { %6191 = vmatprep.mubr.msk.bf16.mxu1 %vm298_vm3, %v3644_v30  ;;  %v2233_v35 = vor.u32 %v2232_v20, %v2229_v58  ;;  %v2241_v7 = vrot.slane %v2239_v22, 4  ;;  %v2246_v62 = vrot.slane %v2244_v14, 3  ;;  %v2249_v8 = vrot.slane %v2247_v5, 4  ;;  %v3604_v58 = vld [vmem:[#allocation2 + $0x60] sm:$0xf8] }
 0x1f5   : > { %v3649_v43 = vshll.u32 %v3598_v61, 16  ;;  %v3654_v47 = vshrl.u32 %v7754_v46, 16  ;;  %v3657_v53 = vshll.u32 %v7754_v46, 16  ;;  %v3648_v49 = vrot.slane %v3646_v31, 3 }
 0x1f6   : > { %v2234_v2 = vsel %vm836_vm6, %v2225_v57, %v2233_v35  ;;  %v2242_v60 = vor.u32 %v2241_v7, %v2238_v23  ;;  %v4293_v17 = vsel %vm1257_vm4, %v7671_v9, 0  ;;  %v2250_v55 = vor.u32 %v2249_v8, %v2246_v62  ;;  %v7784_v35 = vld [vmem:[#allocation2 + $0x68] sm:$0xf]  ;;  %v2179_v8 = vld [vmem:[#allocation2 + $0x60] sm:$0xf8] }
 0x1f7   : > { %6090 = vmatmul.mubr.msk.bf16.vlgmr.msra.gmra.mrb[32].mxu0 %vm298_vm3, %v2234_v2  ;;  %v3651_v40 = vrot.slane %v3649_v43, 4  ;;  %v3656_v28 = vrot.slane %v3654_v47, 3  ;;  %v3659_v11 = vrot.slane %v3657_v53, 4  ;;  %v3663_v50 = vshrl.u32 %v3600_v6, 16 }
 0x1f8   : > { %v3666_v34 = vshll.u32 %v3600_v6, 16  ;;  %v3671_v32 = vshrl.u32 %v7760_v44, 16  ;;  %v3674_v33 = vshll.u32 %v7760_v44, 16  ;;  %v2251_v16 = vsel %vm836_vm6, %v2242_v60, %v2250_v55 }
 0x1f9   : > { %v3652_v19 = vor.u32 %v3651_v40, %v3648_v49  ;;  %v3660_v42 = vor.u32 %v3659_v11, %v3656_v28  ;;  %v2253_v0 = vshrl.u32 %v2175_v48, 16  ;;  %6093 = vmatprep.mubr.msk.bf16.mxu0 %vm298_vm3, %v2251_v16  ;;  %v3665_v9 = vrot.slane %v3663_v50, 3  ;;  %v2181_v50 = vld [vmem:[#allocation2 + $0x70] sm:$0xf8] }
 0x1fa   : > { %v3668_v41 = vrot.slane %v3666_v34, 4  ;;  %v3673_v45 = vrot.slane %v3671_v32, 3  ;;  %v3676_v52 = vrot.slane %v3674_v33, 4  ;;  %v2256_v10 = vshll.u32 %v2175_v48, 16 }
 0x1fb   : > { %v3661_v15 = vsel %vm836_vm6, %v3652_v19, %v3660_v42  ;;  %v2255_v13 = vrot.slane %v2253_v0, 3  ;;  %v2261_v54 = vshrl.u32 %v6702_v51, 16  ;;  %v2264_v59 = vshll.u32 %v6702_v51, 16  ;;  %v6704_v0 = vld [vmem:[#allocation2 + $0x68] sm:$0xf] }
 0x1fc   : > { %6192 = vmatmul.mubr.msk.bf16.vlgmr.msra.gmra.mrb[16].mxu1 %vm298_vm3, %v3661_v15  ;;  %v3669_v24 = vor.u32 %v3668_v41, %v3665_v9  ;;  %v3677_v39 = vor.u32 %v3676_v52, %v3673_v45  ;;  %v2270_v12 = vshrl.u32 %v2177_v27, 16  ;;  %v2258_v36 = vrot.slane %v2256_v10, 4 }
 0x1fd   : > { %6224 = vmatpush3.bf16.msra.mxu1 %v4293_v17  ;;  %v2263_v29 = vrot.slane %v2261_v54, 3  ;;  %v2273_v3 = vshll.u32 %v2177_v27, 16  ;;  %v2278_v18 = vshrl.u32 %v6703_v26, 16  ;;  %v2266_v63 = vrot.slane %v2264_v59, 4 }
 0x1fe   : > { %v3678_v21 = vsel %vm836_vm6, %v3669_v24, %v3677_v39  ;;  %v2272_v4 = vrot.slane %v2270_v12, 3  ;;  %v2281_v61 = vshll.u32 %v6703_v26, 16  ;;  %6592 = vmatprep.subr.msk.bf16.mxu1 %vm1257_vm4, %v7774_v1  ;;  %v2259_v20 = vor.u32 %v2258_v36, %v2255_v13  ;;  %v3606_v13 = vld [vmem:[#allocation2 + $0x70] sm:$0xf8]  ;;  %v7795_v39 = vld [vmem:[#allocation2 + $0x78] sm:$0xf] }
 0x1ff   : > { %6195 = vmatprep.mubr.msk.bf16.mxu1 %vm298_vm3, %v3678_v21  ;;  %v2275_v22 = vrot.slane %v2273_v3, 4  ;;  %v2280_v25 = vrot.slane %v2278_v18, 3  ;;  %v3680_v14 = vshrl.u32 %v3602_v37, 16  ;;  %v2267_v30 = vor.u32 %v2266_v63, %v2263_v29  ;;  %v3608_v63 = vld [vmem:[#allocation2 + $0x80] sm:$0xf8] }
 0x200   : > { %v2283_v57 = vrot.slane %v2281_v61, 4  ;;  %v3683_v23 = vshll.u32 %v3602_v37, 16  ;;  %v3688_v5 = vshrl.u32 %v7777_v56, 16  ;;  %v3691_v31 = vshll.u32 %v7777_v56, 16  ;;  %v6705_v37 = vld [vmem:[#allocation2 + $0x78] sm:$0xf] }
 0x201   : > { %v2276_v7 = vor.u32 %v2275_v22, %v2272_v4  ;;  %v3682_v62 = vrot.slane %v3680_v14, 3  ;;  %v3697_v6 = vshrl.u32 %v3604_v58, 16  ;;  %v2268_v43 = vsel %vm836_vm6, %v2259_v20, %v2267_v30  ;;  %v7800_v22 = vld [vmem:[#allocation2 + $0x88] sm:$0xf] }
 0x202   : > { %v2284_v47 = vor.u32 %v2283_v57, %v2280_v25  ;;  %v3685_v53 = vrot.slane %v3683_v23, 4  ;;  %v3690_v2 = vrot.slane %v3688_v5, 3  ;;  %6094 = vmatmul.mubr.msk.bf16.gmra.mrb[36].mxu0 %vm298_vm3, %v2268_v43  ;;  %v3693_v60 = vrot.slane %v3691_v31, 4  ;;  %v2183_v23 = vld [vmem:[#allocation2 + $0x80] sm:$0xf8] }
 0x203   : > { %v3699_v49 = vrot.slane %v3697_v6, 3  ;;  %v3700_v17 = vshll.u32 %v3604_v58, 16  ;;  %v3705_v48 = vshrl.u32 %v7784_v35, 16  ;;  %v3708_v28 = vshll.u32 %v7784_v35, 16 }
 0x204   : > { %v2285_v55 = vsel %vm836_vm6, %v2276_v7, %v2284_v47  ;;  %v3686_v40 = vor.u32 %v3685_v53, %v3682_v62  ;;  %v2287_v11 = vshrl.u32 %v2179_v8, 16  ;;  %v3694_v34 = vor.u32 %v3693_v60, %v3690_v2 }
 0x205   : > { %6097 = vmatprep.mubr.msk.bf16.mxu0 %vm298_vm3, %v2285_v55  ;;  %v3702_v32 = vrot.slane %v3700_v17, 4  ;;  %v3707_v33 = vrot.slane %v3705_v48, 3  ;;  %v2290_v16 = vshll.u32 %v2179_v8, 16  ;;  %v3710_v19 = vrot.slane %v3708_v28, 4  ;;  %v3610_v17 = vld [vmem:[#allocation2 + $0x90] sm:$0xf8] }
 0x206   : > { %v2289_v42 = vrot.slane %v2287_v11, 3  ;;  %v2295_v27 = vshrl.u32 %v6704_v0, 16  ;;  %v2298_v9 = vshll.u32 %v6704_v0, 16  ;;  %v3695_v41 = vsel %vm836_vm6, %v3686_v40, %v3694_v34  ;;  %v6706_v34 = vld [vmem:[#allocation2 + $0x88] sm:$0xf] }
 0x207   : > { %v3703_v45 = vor.u32 %v3702_v32, %v3699_v49  ;;  %v2292_v52 = vrot.slane %v2290_v16, 4  ;;  %v2304_v15 = vshrl.u32 %v2181_v50, 16  ;;  %6196 = vmatmul.mubr.msk.bf16.gmra.mrb[20].mxu1 %vm298_vm3, %v3695_v41  ;;  %v3711_v10 = vor.u32 %v3710_v19, %v3707_v33  ;;  %v7809_v16 = vld [vmem:[#allocation2 + $0x98] sm:$0xf] }
 0x208   : > { %v2297_v51 = vrot.slane %v2295_v27, 3  ;;  %v2300_v54 = vrot.slane %v2298_v9, 4  ;;  %v2307_v24 = vshll.u32 %v2181_v50, 16  ;;  %v2312_v36 = vshrl.u32 %v6705_v37, 16  ;;  %v3612_v9 = vld [vmem:[#allocation2 + $0xa0] sm:$0xf8] }
 0x209   : > { %v2293_v59 = vor.u32 %v2292_v52, %v2289_v42  ;;  %v2306_v12 = vrot.slane %v2304_v15, 3  ;;  %v2315_v29 = vshll.u32 %v6705_v37, 16  ;;  %v3712_v3 = vsel %vm836_vm6, %v3703_v45, %v3711_v10 }
 0x20a   : > { %v2301_v26 = vor.u32 %v2300_v54, %v2297_v51  ;;  %v2309_v18 = vrot.slane %v2307_v24, 4  ;;  %v3714_v21 = vshrl.u32 %v3606_v13, 16  ;;  %6199 = vmatprep.mubr.msk.bf16.mxu1 %vm298_vm3, %v3712_v3  ;;  %v2314_v4 = vrot.slane %v2312_v36, 3 }
 0x20b   : > { %v2317_v61 = vrot.slane %v2315_v29, 4  ;;  %v3717_v58 = vshll.u32 %v3606_v13, 16  ;;  %v3722_v20 = vshrl.u32 %v7795_v39, 16  ;;  %v3725_v57 = vshll.u32 %v7795_v39, 16  ;;  %v7813_v13 = vld [vmem:[#allocation2 + $0xa8] sm:$0xf] }
 0x20c   : > { %v2302_v25 = vsel %vm836_vm6, %v2293_v59, %v2301_v26  ;;  %v2310_v14 = vor.u32 %v2309_v18, %v2306_v12  ;;  %v3716_v30 = vrot.slane %v3714_v21, 3  ;;  %v3731_v31 = vshrl.u32 %v3608_v63, 16  ;;  %v3614_v29 = vld [vmem:[#allocation2 + $0xb0] sm:$0xf8] }
 0x20d   : > { %6098 = vmatmul.mubr.msk.bf16.gmra.mrb[40].mxu0 %vm298_vm3, %v2302_v25  ;;  %v2318_v5 = vor.u32 %v2317_v61, %v2314_v4  ;;  %v3719_v7 = vrot.slane %v3717_v58, 4  ;;  %v3724_v62 = vrot.slane %v3722_v20, 3  ;;  %v3727_v6 = vrot.slane %v3725_v57, 4  ;;  %v3616_v25 = vld [vmem:[#allocation2 + $0xc0] sm:$0xf8] }
 0x20e   : > { %v3734_v8 = vshll.u32 %v3608_v63, 16  ;;  %v3739_v43 = vshrl.u32 %v7800_v22, 16  ;;  %v3742_v47 = vshll.u32 %v7800_v22, 16  ;;  %v3733_v60 = vrot.slane %v3731_v31, 3  ;;  %v7820_v63 = vld [vmem:[#allocation2 + $0xb8] sm:$0xf] }
 0x20f   : > { %v2319_v53 = vsel %vm836_vm6, %v2310_v14, %v2318_v5  ;;  %v3720_v2 = vor.u32 %v3719_v7, %v3716_v30  ;;  %v2321_v49 = vshrl.u32 %v2183_v23, 16  ;;  %v3728_v48 = vor.u32 %v3727_v6, %v3724_v62  ;;  %v7827_v6 = vld [vmem:[#allocation2 + $0xc8] sm:$0xf] }
 0x210   : > { %6101 = vmatprep.mubr.msk.bf16.mxu0 %vm298_vm3, %v2319_v53  ;;  %v3736_v55 = vrot.slane %v3734_v8, 4  ;;  %v3741_v40 = vrot.slane %v3739_v43, 3  ;;  %v3744_v28 = vrot.slane %v3742_v47, 4  ;;  %v2324_v50 = vshll.u32 %v2183_v23, 16 }
 0x211   : > { %v2323_v11 = vrot.slane %v2321_v49, 3  ;;  %v2329_v32 = vshrl.u32 %v6706_v34, 16  ;;  %v2332_v33 = vshll.u32 %v6706_v34, 16  ;;  %v3729_v19 = vsel %vm836_vm6, %v3720_v2, %v3728_v48  ;;  %v3618_v2 = vld [vmem:[#allocation2 + $0xd0] sm:$0xf8] }
 0x212   : > { %v3737_v42 = vor.u32 %v3736_v55, %v3733_v60  ;;  %v3745_v0 = vor.u32 %v3744_v28, %v3741_v40  ;;  %v3748_v27 = vshrl.u32 %v3610_v17, 16  ;;  %6200 = vmatmul.mubr.msk.bf16.gmra.mrb[24].mxu1 %vm298_vm3, %v3729_v19  ;;  %v2326_v41 = vrot.slane %v2324_v50, 4  ;;  %v7833_v50 = vld [vmem:[#allocation2 + $0xd8] sm:$0xf] }
 0x213   : > { %v2331_v45 = vrot.slane %v2329_v32, 3  ;;  %v2334_v52 = vrot.slane %v2332_v33, 4  ;;  %v3751_v15 = vshll.u32 %v3610_v17, 16  ;;  %v3756_v54 = vshrl.u32 %v7809_v16, 16 }
 0x214   : > { %v3746_v10 = vsel %vm836_vm6, %v3737_v42, %v3745_v0  ;;  %v3750_v51 = vrot.slane %v3748_v27, 3  ;;  %v3759_v24 = vshll.u32 %v7809_v16, 16  ;;  %v2327_v59 = vor.u32 %v2326_v41, %v2323_v11  ;;  %v3620_v42 = vld [vmem:[#allocation2 + $0xe0] sm:$0xf8] }
 0x215   : > { %6203 = vmatprep.mubr.msk.bf16.mxu1 %vm298_vm3, %v3746_v10  ;;  %v2335_v12 = vor.u32 %v2334_v52, %v2331_v45  ;;  %v3753_v37 = vrot.slane %v3751_v15, 4  ;;  %v3765_v36 = vshrl.u32 %v3612_v9, 16  ;;  %v3758_v3 = vrot.slane %v3756_v54, 3  ;;  %v7837_v45 = vld [vmem:[#allocation2 + $0xe8] sm:$0xf] }
 0x216   : > { %v3761_v26 = vrot.slane %v3759_v24, 4  ;;  %v3768_v18 = vshll.u32 %v3612_v9, 16  ;;  %v3773_v21 = vshrl.u32 %v7813_v13, 16  ;;  %v3776_v20 = vshll.u32 %v7813_v13, 16 }
 0x217   : > { %v2336_v4 = vsel %vm836_vm6, %v2327_v59, %v2335_v12  ;;  %v3754_v61 = vor.u32 %v3753_v37, %v3750_v51  ;;  %v3767_v58 = vrot.slane %v3765_v36, 3  ;;  %v3782_v23 = vshrl.u32 %v3614_v29, 16 }
 0x218   : > { %6102 = vmatmul.mubr.msk.bf16.gmra.mrb[44].mxu0 %vm298_vm3, %v2336_v4  ;;  %v3762_v14 = vor.u32 %v3761_v26, %v3758_v3  ;;  %v3770_v30 = vrot.slane %v3768_v18, 4  ;;  %v3775_v57 = vrot.slane %v3773_v21, 3  ;;  %v3778_v5 = vrot.slane %v3776_v20, 4  ;;  %v3622_v21 = vld [vmem:[#allocation2 + $0xf0] sm:$0xf8] }
 0x219   : > { %v3785_v7 = vshll.u32 %v3614_v29, 16  ;;  %v3790_v62 = vshrl.u32 %v7820_v63, 16  ;;  %v3793_v31 = vshll.u32 %v7820_v63, 16  ;;  %v3784_v47 = vrot.slane %v3782_v23, 3  ;;  %v7846_v20 = vld [vmem:[#allocation2 + $0xf8] sm:$0xf] }
 0x21a   : > { %v3763_v8 = vsel %vm836_vm6, %v3754_v61, %v3762_v14  ;;  %v3771_v43 = vor.u32 %v3770_v30, %v3767_v58  ;;  %v3799_v53 = vshrl.u32 %v3616_v25, 16  ;;  %v3779_v60 = vor.u32 %v3778_v5, %v3775_v57  ;;  %v7849_v30 = vld [vmem:[#allocation2 + $0x108] sm:$0xf] }
 0x21b   : > { %6204 = vmatmul.mubr.msk.bf16.gmra.mrb[28].mxu1 %vm298_vm3, %v3763_v8  ;;  %v3787_v49 = vrot.slane %v3785_v7, 4  ;;  %v3792_v17 = vrot.slane %v3790_v62, 3  ;;  %v3795_v48 = vrot.slane %v3793_v31, 4  ;;  %v3802_v40 = vshll.u32 %v3616_v25, 16  ;;  %v3624_v25 = vld [vmem:[#allocation2 + $0x100] sm:$0xf8] }
 0x21c   : > { %v3801_v55 = vrot.slane %v3799_v53, 3  ;;  %v3807_v28 = vshrl.u32 %v7827_v6, 16  ;;  %v3810_v11 = vshll.u32 %v7827_v6, 16  ;;  %v3780_v34 = vsel %vm836_vm6, %v3771_v43, %v3779_v60 }
 0x21d   : > { %v3788_v32 = vor.u32 %v3787_v49, %v3784_v47  ;;  %v3796_v33 = vor.u32 %v3795_v48, %v3792_v17  ;;  %v3816_v19 = vshrl.u32 %v3618_v2, 16  ;;  %6207 = vmatprep.mubr.msk.bf16.mxu1 %vm298_vm3, %v3780_v34  ;;  %v3804_v0 = vrot.slane %v3802_v40, 4  ;;  %v3626_v48 = vld [vmem:[#allocation2 + $0x110] sm:$0xf8] }
 0x21e   : > { %v3809_v27 = vrot.slane %v3807_v28, 3  ;;  %v3812_v9 = vrot.slane %v3810_v11, 4  ;;  %v3819_v41 = vshll.u32 %v3618_v2, 16  ;;  %v3824_v15 = vshrl.u32 %v7833_v50, 16 }
 0x21f   : > { %v3818_v52 = vrot.slane %v3816_v19, 3  ;;  %v3827_v10 = vshll.u32 %v7833_v50, 16  ;;  %v3805_v51 = vor.u32 %v3804_v0, %v3801_v55  ;;  %v3833_v59 = vshrl.u32 %v3620_v42, 16  ;;  %v7856_v55 = vld [vmem:[#allocation2 + $0x118] sm:$0xf] }
 0x220   : > { %v3813_v54 = vor.u32 %v3812_v9, %v3809_v27  ;;  %v3821_v24 = vrot.slane %v3819_v41, 4  ;;  %v3826_v12 = vrot.slane %v3824_v15, 3  ;;  %v3836_v36 = vshll.u32 %v3620_v42, 16 }
 0x221   : > { %v3829_v37 = vrot.slane %v3827_v10, 4  ;;  %v3841_v29 = vshrl.u32 %v7837_v45, 16  ;;  %v3797_v3 = vsel %vm836_vm6, %v3788_v32, %v3796_v33  ;;  %v3835_v26 = vrot.slane %v3833_v59, 3 }
 0x222   : > { %v3844_v18 = vshll.u32 %v7837_v45, 16  ;;  %v3814_v4 = vsel %vm836_vm6, %v3805_v51, %v3813_v54  ;;  %v3838_v61 = vrot.slane %v3836_v36, 4  ;;  %v3822_v57 = vor.u32 %v3821_v24, %v3818_v52 }
 0x223   : > { %6208 = vmatmul.mubr.msk.bf16.gmra.mrb[0].mxu1 %vm298_vm3, %v3797_v3  ;;  %v3843_v58 = vrot.slane %v3841_v29, 3  ;;  %v3830_v23 = vor.u32 %v3829_v37, %v3826_v12  ;;  %v3850_v5 = vshrl.u32 %v3622_v21, 16  ;;  %v3853_v7 = vshll.u32 %v3622_v21, 16 }
 0x224   : > { %6211 = vmatprep.mubr.msk.bf16.mxu1 %vm298_vm3, %v3814_v4  ;;  %v3846_v14 = vrot.slane %v3844_v18, 4  ;;  %v3839_v62 = vor.u32 %v3838_v61, %v3835_v26  ;;  %v3858_v31 = vshrl.u32 %v7846_v20, 16  ;;  %v3861_v8 = vshll.u32 %v7846_v20, 16  ;;  %v7867_v26 = vld [vmem:[#allocation2 + $0x20] sm:$0xf0] }
 0x225   : > { %v3867_v43 = vshrl.u32 %v3624_v25, 16  ;;  %v3870_v53 = vshll.u32 %v3624_v25, 16  ;;  %v3875_v2 = vshrl.u32 %v7849_v30, 16  ;;  %v3878_v60 = vshll.u32 %v7849_v30, 16  ;;  %v7877_v25 = vld [vmem:[#allocation2 + $0x40] sm:$0xf0] }
 0x226   : > { %v3847_v47 = vor.u32 %v3846_v14, %v3843_v58  ;;  %v3831_v49 = vsel %vm836_vm6, %v3822_v57, %v3830_v23  ;;  %v3852_v17 = vrot.slane %v3850_v5, 3  ;;  %v3855_v40 = vrot.slane %v3853_v7, 4  ;;  %v7874_v58 = vld [vmem:[#allocation2 + $0x30] sm:$0xf0] }
 0x227   : > { %v3860_v28 = vrot.slane %v3858_v31, 3  ;;  %v3863_v11 = vrot.slane %v3861_v8, 4  ;;  %v3869_v34 = vrot.slane %v3867_v43, 3  ;;  %v3872_v33 = vrot.slane %v3870_v53, 4  ;;  %v7888_v31 = vld [vmem:[#allocation2 + $0x50] sm:$0xf0] }
 0x228   : > { %v3848_v32 = vsel %vm836_vm6, %v3839_v62, %v3847_v47  ;;  %v3877_v19 = vrot.slane %v3875_v2, 3  ;;  %v3880_v42 = vrot.slane %v3878_v60, 4  ;;  %v3884_v0 = vshrl.u32 %v3626_v48, 16  ;;  %v7891_v8 = vld [vmem:[#allocation2 + $0x60] sm:$0xf0] }
 0x229   : > { %v3887_v27 = vshll.u32 %v3626_v48, 16  ;;  %v3892_v9 = vshrl.u32 %v7856_v55, 16  ;;  %v3895_v41 = vshll.u32 %v7856_v55, 16  ;;  %v3856_v52 = vor.u32 %v3855_v40, %v3852_v17  ;;  %v7900_v2 = vld [vmem:[#allocation2 + $0x70] sm:$0xf0] }
 0x22a   : > { %v3864_v15 = vor.u32 %v3863_v11, %v3860_v28  ;;  %v3873_v10 = vor.u32 %v3872_v33, %v3869_v34  ;;  %v3881_v51 = vor.u32 %v3880_v42, %v3877_v19  ;;  %v3886_v54 = vrot.slane %v3884_v0, 3  ;;  %v7903_v60 = vld [vmem:[#allocation2 + $0x80] sm:$0xf0]  ;;  %v7912_v28 = vld [vmem:[#allocation2 + $0x90] sm:$0xf0] }
 0x22b   : > { %6212 = vmatmul.mubr.msk.bf16.gmra.mrb[4].mxu1 %vm298_vm3, %v3831_v49  ;;  %v3889_v24 = vrot.slane %v3887_v27, 4  ;;  %v3894_v59 = vrot.slane %v3892_v9, 3  ;;  %v3897_v12 = vrot.slane %v3895_v41, 4  ;;  %v4194_v18 = vrot.slane %v7867_v26, 4  ;;  %v7915_v11 = vld [vmem:[#allocation2 + $0xa0] sm:$0xf0] }
 0x22c   : > { %6215 = vmatprep.mubr.msk.bf16.mxu1 %vm298_vm3, %v3848_v32  ;;  %v3865_v37 = vsel %vm836_vm6, %v3856_v52, %v3864_v15  ;;  %v3882_v36 = vsel %vm836_vm6, %v3873_v10, %v3881_v51  ;;  %v4195_v21 = vrot.slane %v7744_v38, 4  ;;  %v4197_v14 = vrot.slane %v7874_v58, 4  ;;  %v7924_v42 = vld [vmem:[#allocation2 + $0xb0] sm:$0xf0]  ;;  %v7927_v0 = vld [vmem:[#allocation2 + $0xc0] sm:$0xf0] }
 0x22d   : > { %v3890_v29 = vor.u32 %v3889_v24, %v3886_v54  ;;  %v3898_v3 = vor.u32 %v3897_v12, %v3894_v59  ;;  %v4198_v57 = vrot.slane %v7754_v46, 4  ;;  %v4200_v23 = vrot.slane %v7877_v25, 4  ;;  %v7936_v15 = vld [vmem:[#allocation2 + $0xd0] sm:$0xf0]  ;;  %v7939_v10 = vld [vmem:[#allocation2 + $0xe0] sm:$0xf0] }
 0x22e   : > { %v4196_v61 = vsel %vm1158_vm5, %v4194_v18, %v4195_v21  ;;  %v4201_v38 = vrot.slane %v7760_v44, 4  ;;  %v4827_v5 = vsel %vm1257_vm4, %v7774_v1, 0  ;;  %v4203_v46 = vrot.slane %v7888_v31, 4  ;;  %v7946_v59 = vld [vmem:[#allocation2 + $0xf0] sm:$0xf0] }
 0x22f   : > { %v3899_v4 = vsel %vm836_vm6, %v3890_v29, %v3898_v3  ;;  %v4199_v7 = vsel %vm1158_vm5, %v4197_v14, %v4198_v57  ;;  %v4204_v44 = vrot.slane %v7777_v56, 4  ;;  %v4206_v43 = vrot.slane %v7891_v8, 4  ;;  %v5109_v21 = vld [vmem:[%s8325_s5] sm:$0x3] }
 0x230   : > { %v4202_v62 = vsel %vm1158_vm5, %v4200_v23, %v4201_v38  ;;  %v4207_v1 = vrot.slane %v7784_v35, 4  ;;  %v4209_v49 = vrot.slane %v7900_v2, 4  ;;  %v4210_v56 = vrot.slane %v7795_v39, 4  ;;  %6593 = vmatprep.subr.msk.bf16.mxu0 %vm1257_vm4, %v5109_v21 }
 0x231   : > { %v4205_v47 = vsel %vm1158_vm5, %v4203_v46, %v4204_v44  ;;  %v4212_v17 = vrot.slane %v7903_v60, 4  ;;  %v4213_v35 = vrot.slane %v7800_v22, 4  ;;  %v4215_v34 = vrot.slane %v7912_v28, 4 }
 0x232   : > { %v4208_v53 = vsel %vm1158_vm5, %v4206_v43, %v4207_v1  ;;  %v4211_v48 = vsel %vm1158_vm5, %v4209_v49, %v4210_v56  ;;  %v4216_v39 = vrot.slane %v7809_v16, 4  ;;  %v4218_v32 = vrot.slane %v7915_v11, 4  ;;  %v4490_v43 = vld [vmem:[#allocation2 + $0x48] sm:$0x1f] }
 0x233   : > { %6216 = vmatmul.mubr.msk.bf16.gmra.mrb[8].mxu1 %vm298_vm3, %v3865_v37  ;;  %v4214_v40 = vsel %vm1158_vm5, %v4212_v17, %v4213_v35  ;;  %v4219_v22 = vrot.slane %v7813_v13, 4  ;;  %v4221_v27 = vrot.slane %v7924_v42, 4  ;;  %v4222_v16 = vrot.slane %v7820_v63, 4  ;;  %v7950_v37 = vld [vmem:[#allocation2 + $0x100] sm:$0xf0] }
 0x234   : > { %6219 = vmatprep.mubr.msk.bf16.mxu1 %vm298_vm3, %v3882_v36  ;;  %v4217_v33 = vsel %vm1158_vm5, %v4215_v34, %v4216_v39  ;;  %v4224_v9 = vrot.slane %v7927_v0, 4  ;;  %v4225_v13 = vrot.slane %v7827_v6, 4  ;;  %v4227_v51 = vrot.slane %v7936_v15, 4  ;;  %v4488_v36 = vld [vmem:[#allocation2 + $0x28] sm:$0x1f] }
 0x235   : > { %v4220_v19 = vsel %vm1158_vm5, %v4218_v32, %v4219_v22  ;;  %v4223_v41 = vsel %vm1158_vm5, %v4221_v27, %v4222_v16  ;;  %v4228_v63 = vrot.slane %v7833_v50, 4  ;;  %v4230_v54 = vrot.slane %v7939_v10, 4 }
 0x236   : > { %v4226_v52 = vsel %vm1158_vm5, %v4224_v9, %v4225_v13  ;;  %v4231_v6 = vrot.slane %v7837_v45, 4  ;;  %v4233_v29 = vrot.slane %v7946_v59, 4  ;;  %v4234_v50 = vrot.slane %v7846_v20, 4  ;;  %v7964_v20 = vld [vmem:[#allocation2 + $0x110] sm:$0xf0] }
 0x237   : > { %v4229_v24 = vsel %vm1158_vm5, %v4227_v51, %v4228_v63  ;;  %v4236_v3 = vrot.slane %v7950_v37, 4  ;;  %v4505_v45 = vshrl.u32 %v7867_v26, 16  ;;  %v4508_v18 = vshll.u32 %v7867_v26, 16  ;;  %v4489_v26 = vld [vmem:[#allocation2 + $0x38] sm:$0x1f] }
 0x238   : > { %v4232_v12 = vsel %vm1158_vm5, %v4230_v54, %v4231_v6  ;;  %v4516_v14 = vshll.u32 %v4488_v36, 16  ;;  %v5166_v57 = vsel %vm1257_vm4, %v5109_v21, 0  ;;  %v4235_v23 = vsel %vm1158_vm5, %v4233_v29, %v4234_v50  ;;  %v4491_v13 = vld [vmem:[#allocation2 + $0x58] sm:$0x1f] }
 0x239   : > { %6292 = vmatpush3.bf16.msra.mxu0 %v5166_v57  ;;  %v4507_v38 = vrot.slane %v4505_v45, 4  ;;  %v4239_v46 = vrot.slane %v7964_v20, 4  ;;  %v4240_v44 = vrot.slane %v7856_v55, 4  ;;  %v4522_v1 = vshrl.u32 %v7874_v58, 16 }
 0x23a   : > { %v4533_v49 = vshll.u32 %v4489_v26, 16  ;;  %v4539_v17 = vshrl.u32 %v7877_v25, 16  ;;  %v4550_v34 = vshll.u32 %v4490_v43, 16  ;;  %v4556_v51 = vshrl.u32 %v7888_v31, 16 }
 0x23b   : > { %6220 = vmatmul.mubr.msk.bf16.gmra.mrb[12].mxu1 %vm298_vm3, %v3899_v4  ;;  %v4237_v4 = vrot.slane %v7849_v30, 4  ;;  %v4518_v30 = vrot.slane %v4516_v14, 5  ;;  %v4241_v39 = vsel %vm1158_vm5, %v4239_v46, %v4240_v44  ;;  %v4524_v32 = vrot.slane %v4522_v1, 4 }
 0x23c   : > { %6225 = vmatprep.mubr.msk.bf16.mxu1 %vm298_vm3, %v4196_v61  ;;  %v4513_v61 = vshrl.u32 %v4488_v36, 16  ;;  %v4552_v9 = vrot.slane %v4550_v34, 5  ;;  %v4559_v63 = vshll.u32 %v7888_v31, 16  ;;  %v4564_v54 = vshrl.u32 %v4491_v13, 16 }
 0x23d   : > { %v4567_v6 = vshll.u32 %v4491_v13, 16  ;;  %v4607_v1 = vshrl.u32 %v7903_v60, 16 }
 0x23e   : > { %v4561_v21 = vrot.slane %v4559_v63, 5 }
 0x243   : > { %6226 = vmatmul.mubr.msk.bf16.vlgmr.msra.gmra.mrb[16].mxu1 %vm298_vm3, %v4199_v7  ;;  %v4238_v7 = vsel %vm1158_vm5, %v4236_v3, %v4237_v4  ;;  %v4566_v4 = vrot.slane %v4564_v54, 4 }
 0x244   : > { %6258 = vmatpush3.bf16.msra.mxu1 %v4827_v5  ;;  %6229 = vmatprep.mubr.msk.bf16.mxu1 %vm298_vm3, %v4202_v62  ;;  %v4510_v5 = vrot.slane %v4508_v18, 5  ;;  %v4515_v62 = vrot.slane %v4513_v61, 4  ;;  %v4558_v18 = vrot.slane %v4556_v51, 4  ;;  %v4569_v61 = vrot.slane %v4567_v6, 5 }
 0x246   : > { %v4511_v56 = vor.u32 %v4510_v5, %v4507_v38  ;;  %v4519_v35 = vor.u32 %v4518_v30, %v4515_v62  ;;  %v4562_v46 = vor.u32 %v4561_v21, %v4558_v18  ;;  %v4570_v44 = vor.u32 %v4569_v61, %v4566_v4  ;;  %v4497_v18 = vld [vmem:[#allocation2 + $0xb8] sm:$0x1f]  ;;  %v4498_v61 = vld [vmem:[#allocation2 + $0xc8] sm:$0x1f] }
 0x247   : > { %v4661_v4 = vshll.u32 %v7924_v42, 16 }
 0x248   : > { %v4571_v34 = vsel %vm1650_vm7, %v4562_v46, %v4570_v44 }
 0x249   : > { %v4663_v46 = vrot.slane %v4661_v4, 5  ;;  %v4746_v4 = vshll.u32 %v7950_v37, 16 }
 0x24b   : > { %6230 = vmatmul.mubr.msk.bf16.gmra.mrb[20].mxu1 %vm298_vm3, %v4205_v47  ;;  %v4525_v47 = vshll.u32 %v7874_v58, 16  ;;  %v4520_v58 = vsel %vm1650_vm7, %v4511_v56, %v4519_v35 }
 0x24c   : > { %6233 = vmatprep.mubr.msk.bf16.mxu1 %vm298_vm3, %v4208_v53  ;;  %v4530_v53 = vshrl.u32 %v4489_v26, 16  ;;  %v4593_v26 = vshll.u32 %v7900_v2, 16 }
 0x24d   : > { %v4527_v22 = vrot.slane %v4525_v47, 5 }
 0x24e   : > { %v4532_v55 = vrot.slane %v4530_v53, 4  ;;  %v4610_v53 = vshll.u32 %v7903_v60, 16  ;;  %v4595_v35 = vrot.slane %v4593_v26, 5  ;;  %v4678_v26 = vshll.u32 %v7927_v0, 16 }
 0x253   : > { %6234 = vmatmul.mubr.msk.bf16.gmra.mrb[24].mxu1 %vm298_vm3, %v4211_v48  ;;  %v4542_v48 = vshll.u32 %v7877_v25, 16  ;;  %v4492_v25 = vld [vmem:[#allocation2 + $0x68] sm:$0x1f] }
 0x254   : > { %6237 = vmatprep.mubr.msk.bf16.mxu1 %vm298_vm3, %v4214_v40  ;;  %v4547_v40 = vshrl.u32 %v4490_v43, 16  ;;  %v4581_v50 = vshrl.u32 %v4492_v25, 16  ;;  %v4584_v3 = vshll.u32 %v4492_v25, 16  ;;  %v4641_v25 = vshrl.u32 %v7915_v11, 16 }
 0x255   : > { %v4544_v27 = vrot.slane %v4542_v48, 5 }
 0x256   : > { %v4549_v16 = vrot.slane %v4547_v40, 4  ;;  %v4583_v38 = vrot.slane %v4581_v50, 4  ;;  %v4586_v5 = vrot.slane %v4584_v3, 5  ;;  %v4643_v50 = vrot.slane %v4641_v25, 4 }
 0x258   : > { %v4553_v29 = vor.u32 %v4552_v9, %v4549_v16  ;;  %v4587_v47 = vor.u32 %v4586_v5, %v4583_v38  ;;  %v4627_v16 = vshll.u32 %v7912_v28, 16 }
 0x25b   : > { %6238 = vmatmul.mubr.msk.bf16.gmra.mrb[28].mxu1 %vm298_vm3, %v4217_v33  ;;  %v4535_v33 = vrot.slane %v4533_v49, 5 }
 0x25c   : > { %6241 = vmatprep.mubr.msk.bf16.mxu1 %vm298_vm3, %v4220_v19  ;;  %v4541_v19 = vrot.slane %v4539_v17, 4 }
 0x25e   : > { %v4545_v36 = vor.u32 %v4544_v27, %v4541_v19  ;;  %v4496_v19 = vld [vmem:[#allocation2 + $0xa8] sm:$0x1f] }
 0x25f   : > { %v4652_v51 = vshll.u32 %v4496_v19, 16 }
 0x260   : > { %v4554_v31 = vsel %vm1650_vm7, %v4545_v36, %v4553_v29 }
 0x263   : > { %6242 = vmatmul.mubr.msk.bf16.gmra.mrb[0].mxu1 %vm298_vm3, %v4223_v41  ;;  %v4528_v41 = vor.u32 %v4527_v22, %v4524_v32  ;;  %v4612_v22 = vrot.slane %v4610_v53, 5 }
 0x264   : > { %6245 = vmatprep.mubr.msk.bf16.mxu1 %vm298_vm3, %v4226_v52  ;;  %v4536_v52 = vor.u32 %v4535_v33, %v4532_v55 }
 0x266   : > { %v4537_v45 = vsel %vm1650_vm7, %v4528_v41, %v4536_v52  ;;  %v4644_v41 = vshll.u32 %v7915_v11, 16  ;;  %v4649_v52 = vshrl.u32 %v4496_v19, 16  ;;  %v4658_v11 = vshrl.u32 %v7924_v42, 16 }
 0x268   : > { %v4646_v3 = vrot.slane %v4644_v41, 5 }
 0x26a   : > { %v4647_v38 = vor.u32 %v4646_v3, %v4643_v50  ;;  %v4726_v50 = vshrl.u32 %v7946_v59, 16  ;;  %v4729_v3 = vshll.u32 %v7946_v59, 16 }
 0x26b   : > { %6246 = vmatmul.mubr.msk.bf16.gmra.mrb[4].mxu1 %vm298_vm3, %v4229_v24  ;;  %v4573_v24 = vshrl.u32 %v7891_v8, 16 }
 0x26c   : > { %6249 = vmatprep.mubr.msk.bf16.mxu1 %vm298_vm3, %v4232_v12  ;;  %v4576_v12 = vshll.u32 %v7891_v8, 16  ;;  %v4590_v8 = vshrl.u32 %v7900_v2, 16  ;;  %v4609_v2 = vrot.slane %v4607_v1, 4 }
 0x26d   : > { %v4575_v14 = vrot.slane %v4573_v24, 4 }
 0x26e   : > { %v4578_v57 = vrot.slane %v4576_v12, 5  ;;  %v4592_v17 = vrot.slane %v4590_v8, 4  ;;  %v4613_v63 = vor.u32 %v4612_v22, %v4609_v2  ;;  %v4629_v12 = vrot.slane %v4627_v16, 5 }
 0x26f   : > { %v4675_v8 = vshrl.u32 %v7927_v0, 16  ;;  %v4712_v22 = vshll.u32 %v7939_v10, 16 }
 0x270   : > { %v4579_v43 = vor.u32 %v4578_v57, %v4575_v14  ;;  %v4596_v60 = vor.u32 %v4595_v35, %v4592_v17  ;;  %v4666_v14 = vshrl.u32 %v4497_v18, 16  ;;  %v4669_v57 = vshll.u32 %v4497_v18, 16  ;;  %v4500_v35 = vld [vmem:[#allocation2 + $0xe8] sm:$0x1f] }
 0x271   : > { %v4677_v53 = vrot.slane %v4675_v8, 4  ;;  %v4731_v8 = vrot.slane %v4729_v3, 5 }
 0x272   : > { %v4588_v32 = vsel %vm1650_vm7, %v4579_v43, %v4587_v47  ;;  %v4668_v44 = vrot.slane %v4666_v14, 4  ;;  %v4671_v43 = vrot.slane %v4669_v57, 5  ;;  %v4499_v47 = vld [vmem:[#allocation2 + $0xd8] sm:$0x1f] }
 0x273   : > { %6250 = vmatmul.mubr.msk.bf16.gmra.mrb[8].mxu1 %vm298_vm3, %v4235_v23  ;;  %v4493_v23 = vld [vmem:[#allocation2 + $0x78] sm:$0x1f]  ;;  %v4700_v2 = vshrl.u32 %v4499_v47, 16 }
 0x274   : > { %6253 = vmatprep.mubr.msk.bf16.mxu1 %vm298_vm3, %v4238_v7  ;;  %v4494_v7 = vld [vmem:[#allocation2 + $0x88] sm:$0x1f]  ;;  %v4598_v62 = vshrl.u32 %v4493_v23, 16  ;;  %v4601_v30 = vshll.u32 %v4493_v23, 16 }
 0x275   : > { %v4615_v49 = vshrl.u32 %v4494_v7, 16  ;;  %v4618_v56 = vshll.u32 %v4494_v7, 16  ;;  %v4683_v7 = vshrl.u32 %v4498_v61, 16 }
 0x276   : > { %v4600_v48 = vrot.slane %v4598_v62, 4  ;;  %v4603_v40 = vrot.slane %v4601_v30, 5  ;;  %v4686_v62 = vshll.u32 %v4498_v61, 16  ;;  %v4660_v30 = vrot.slane %v4658_v11, 4 }
 0x277   : > { %v4617_v55 = vrot.slane %v4615_v49, 4  ;;  %v4620_v33 = vrot.slane %v4618_v56, 5  ;;  %v4680_v49 = vrot.slane %v4678_v26, 5  ;;  %v4685_v56 = vrot.slane %v4683_v7, 4 }
 0x278   : > { %v4604_v27 = vor.u32 %v4603_v40, %v4600_v48  ;;  %v4688_v17 = vrot.slane %v4686_v62, 5  ;;  %v4664_v0 = vor.u32 %v4663_v46, %v4660_v30  ;;  %v4692_v48 = vshrl.u32 %v7936_v15, 16 }
 0x279   : > { %v4621_v54 = vor.u32 %v4620_v33, %v4617_v55  ;;  %v4672_v40 = vor.u32 %v4671_v43, %v4668_v44  ;;  %v4717_v55 = vshrl.u32 %v4500_v35, 16  ;;  %v4720_v33 = vshll.u32 %v4500_v35, 16 }
 0x27a   : > { %v4605_v24 = vsel %vm1650_vm7, %v4596_v60, %v4604_v27  ;;  %v4681_v19 = vor.u32 %v4680_v49, %v4677_v53  ;;  %v4689_v60 = vor.u32 %v4688_v17, %v4685_v56  ;;  %v4743_v11 = vshrl.u32 %v7950_v37, 16 }
 0x27b   : > { %6254 = vmatmul.mubr.msk.bf16.gmra.mrb[12].mxu1 %vm298_vm3, %v4241_v39  ;;  %v4495_v39 = vld [vmem:[#allocation2 + $0x98] sm:$0x1f]  ;;  %v4622_v21 = vsel %vm1650_vm7, %v4613_v63, %v4621_v54  ;;  %v4673_v16 = vsel %vm1650_vm7, %v4664_v0, %v4672_v40  ;;  %v4722_v63 = vrot.slane %v4720_v33, 5  ;;  %v4748_v30 = vrot.slane %v4746_v4, 5  ;;  %v8079_v4 = vld [vmem:[%s8324_s4] ss:$0 sm:$0xff] }
 0x27c   : > { %6259 = vmatprep.mubr.msk.bf16.mxu1 %vm298_vm3, %v4520_v58  ;;  %v4624_v58 = vshrl.u32 %v7912_v28, 16  ;;  %v4632_v9 = vshrl.u32 %v4495_v39, 16  ;;  %v4635_v13 = vshll.u32 %v4495_v39, 16  ;;  %v4654_v28 = vrot.slane %v4652_v51, 5 }
 0x27d   : > { %v4703_v39 = vshll.u32 %v4499_v47, 16  ;;  %v4719_v51 = vrot.slane %v4717_v55, 4  ;;  %v4745_v62 = vrot.slane %v4743_v11, 4  ;;  %v4760_v43 = vshrl.u32 %v7964_v20, 16 }
 0x27e   : > { %v4626_v6 = vrot.slane %v4624_v58, 4  ;;  %v4634_v36 = vrot.slane %v4632_v9, 4  ;;  %v4637_v29 = vrot.slane %v4635_v13, 5  ;;  %v4694_v58 = vrot.slane %v4692_v48, 4 }
 0x27f   : > { %v4702_v13 = vrot.slane %v4700_v2, 4  ;;  %v4705_v25 = vrot.slane %v4703_v39, 5  ;;  %v4749_v17 = vor.u32 %v4748_v30, %v4745_v62  ;;  %v4762_v0 = vrot.slane %v4760_v43, 4 }
 0x280   : > { %v4630_v23 = vor.u32 %v4629_v12, %v4626_v6  ;;  %v4501_v6 = vld [vmem:[#allocation2 + $0xf8] sm:$0x1f]  ;;  %v4502_v12 = vld [vmem:[#allocation2 + $0x108] sm:$0x1f] }
 0x281   : > { %v4734_v18 = vshrl.u32 %v4501_v6, 16  ;;  %v4751_v61 = vshrl.u32 %v4502_v12, 16  ;;  %v4754_v14 = vshll.u32 %v4502_v12, 16 }
 0x283   : > { %6260 = vmatmul.mubr.msk.bf16.vlgmr.msra.gmra.mrb[16].mxu1 %vm298_vm3, %v4537_v45  ;;  %v4651_v45 = vrot.slane %v4649_v52, 4  ;;  %v4714_v52 = vrot.slane %v4712_v22, 5  ;;  %v4736_v59 = vrot.slane %v4734_v18, 4  ;;  %v4753_v37 = vrot.slane %v4751_v61, 4 }
 0x284   : > { %6263 = vmatprep.mubr.msk.bf16.mxu1 %vm298_vm3, %v4554_v31  ;;  %v4638_v31 = vor.u32 %v4637_v29, %v4634_v36  ;;  %v4706_v29 = vor.u32 %v4705_v25, %v4702_v13  ;;  %v4756_v46 = vrot.slane %v4754_v14, 5 }
 0x285   : > { %v4655_v5 = vor.u32 %v4654_v28, %v4651_v45  ;;  %v4723_v28 = vor.u32 %v4722_v63, %v4719_v51 }
 0x286   : > { %v4639_v1 = vsel %vm1650_vm7, %v4630_v23, %v4638_v31  ;;  %v4728_v23 = vrot.slane %v4726_v50, 4  ;;  %v4757_v35 = vor.u32 %v4756_v46, %v4753_v37 }
 0x287   : > { %v4656_v42 = vsel %vm1650_vm7, %v4647_v38, %v4655_v5  ;;  %v4503_v38 = vld [vmem:[#allocation2 + $0x118] sm:$0x1f] }
 0x288   : > { %v4771_v47 = vshll.u32 %v4503_v38, 16  ;;  %v4732_v49 = vor.u32 %v4731_v8, %v4728_v23  ;;  %v4758_v39 = vsel %vm1650_vm7, %v4749_v17, %v4757_v35 }
 0x28b   : > { %6264 = vmatmul.mubr.msk.bf16.gmra.mrb[20].mxu1 %vm298_vm3, %v4571_v34  ;;  %v4695_v34 = vshll.u32 %v7936_v15, 16 }
 0x28c   : > { %6267 = vmatprep.mubr.msk.bf16.mxu1 %vm298_vm3, %v4588_v32  ;;  %v4709_v32 = vshrl.u32 %v7939_v10, 16  ;;  %v4690_v10 = vsel %vm1650_vm7, %v4681_v19, %v4689_v60 }
 0x28d   : > { %v4697_v9 = vrot.slane %v4695_v34, 5  ;;  %v4773_v34 = vrot.slane %v4771_v47, 5 }
 0x28e   : > { %v4711_v15 = vrot.slane %v4709_v32, 4 }
 0x28f   : > { %v4698_v36 = vor.u32 %v4697_v9, %v4694_v58 }
 0x290   : > { %v4715_v45 = vor.u32 %v4714_v52, %v4711_v15 }
 0x291   : > { %v4707_v57 = vsel %vm1650_vm7, %v4698_v36, %v4706_v29 }
 0x292   : > { %v4724_v5 = vsel %vm1650_vm7, %v4715_v45, %v4723_v28 }
 0x293   : > { %6268 = vmatmul.mubr.msk.bf16.gmra.mrb[24].mxu1 %vm298_vm3, %v4605_v24 }
 0x294   : > { %6271 = vmatprep.mubr.msk.bf16.mxu1 %vm298_vm3, %v4622_v21  ;;  %v4737_v21 = vshll.u32 %v4501_v6, 16 }
 0x296   : > { %v4739_v26 = vrot.slane %v4737_v21, 5 }
 0x298   : > { %v4740_v56 = vor.u32 %v4739_v26, %v4736_v59 }
 0x29a   : > { %v4741_v2 = vsel %vm1650_vm7, %v4732_v49, %v4740_v56 }
 0x29b   : > { %6272 = vmatmul.mubr.msk.bf16.gmra.mrb[28].mxu1 %vm298_vm3, %v4639_v1  ;;  %v4763_v1 = vshll.u32 %v7964_v20, 16 }
 0x29c   : > { %6275 = vmatprep.mubr.msk.bf16.mxu1 %vm298_vm3, %v4656_v42  ;;  %v4768_v42 = vshrl.u32 %v4503_v38, 16 }
 0x29d   : > { %v4765_v48 = vrot.slane %v4763_v1, 5 }
 0x29e   : > { %v4770_v40 = vrot.slane %v4768_v42, 4 }
 0x29f   : > { %v8016_v27 = vpop.f32.mrb[48].mxu0  ;;  %v4766_v20 = vor.u32 %v4765_v48, %v4762_v0 }
 0x2a0   : > { %v8019_v41 = vpop.f32.mrb[49].mxu0  ;;  %v4774_v32 = vor.u32 %v4773_v34, %v4770_v40 }
 0x2a1   : > { %v8021_v54 = vpop.f32.mrb[50].mxu0 }
 0x2a2   : > { %v8025_v24 = vpop.f32.mrb[51].mxu0  ;;  %v4775_v60 = vsel %vm1650_vm7, %v4766_v20, %v4774_v32 }
 0x2a3   : > { %6276 = vmatmul.mubr.msk.bf16.gmra.mrb[0].mxu1 %vm298_vm3, %v4673_v16 }
 0x2a4   : > { %6279 = vmatprep.mubr.msk.bf16.mxu1 %vm298_vm3, %v4690_v10 }
 0x2a9   : > { %v8033_v31 = vpop.f32.mrb[52].mxu0 }
 0x2aa   : > { %v8036_v7 = vpop.f32.mrb[53].mxu0 }
 0x2ab   : > { %6280 = vmatmul.mubr.msk.bf16.gmra.mrb[4].mxu1 %vm298_vm3, %v4707_v57  ;;  %v8039_v44 = vpop.f32.mrb[54].mxu0 }
 0x2ac   : > { %6283 = vmatprep.mubr.msk.bf16.mxu1 %vm298_vm3, %v4724_v5  ;;  %v8044_v53 = vpop.f32.mrb[55].mxu0 }
 0x2b3   : > { %6284 = vmatmul.mubr.msk.bf16.gmra.mrb[8].mxu1 %vm298_vm3, %v4741_v2 }
 0x2b4   : > { %6287 = vmatprep.mubr.msk.bf16.mxu1 %vm298_vm3, %v4758_v39  ;;  %v8050_v22 = vpop.f32.mrb[56].mxu0 }
 0x2b5   : > { %v8052_v55 = vpop.f32.mrb[57].mxu0 }
 0x2b6   : > { %v8054_v33 = vpop.f32.mrb[58].mxu0 }
 0x2b7   : > { %v8056_v19 = vpop.f32.mrb[59].mxu0 }
 0x2bb   : > { %6288 = vmatmul.mubr.msk.bf16.gmra.mrb[12].mxu1 %vm298_vm3, %v4775_v60 }
 0x2bf   : > { %v8060_v58 = vpop.f32.mrb[60].mxu0 }
 0x2c0   : > { %v8062_v16 = vpop.f32.mrb[61].mxu0 }
 0x2c1   : > { %v8064_v9 = vpop.f32.mrb[62].mxu0 }
 0x2c2   : > { %v8066_v13 = vpop.f32.mrb[63].mxu0 }
 0x2ca   : > { %v6091_v25 = vpop.f32.mrb[32].mxu0 }
 0x2cb   : > { %v2560_v15 = vpop.f32.mrb[33].mxu0 }
 0x2cc   : > { %v6092_v52 = vpop.f32.mrb[34].mxu0 }
 0x2cd   : > { %v2563_v51 = vpop.f32.mrb[35].mxu0 }
 0x2d5   : > { %v6095_v63 = vpop.f32.mrb[36].mxu0 }
 0x2d6   : > { %v2576_v10 = vpop.f32.mrb[37].mxu0 }
 0x2d7   : > { %v6096_v6 = vpop.f32.mrb[38].mxu0 }
 0x2d8   : > { %v2579_v12 = vpop.f32.mrb[39].mxu0 }
 0x2e0   : > { %v6099_v36 = vpop.f32.mrb[40].mxu0 }
 0x2e1   : > { %v2592_v29 = vpop.f32.mrb[41].mxu0 }
 0x2e2   : > { %v6100_v50 = vpop.f32.mrb[42].mxu0 }
 0x2e3   : > { %v2595_v3 = vpop.f32.mrb[43].mxu0 }
 0x2eb   : > { %v8068_v45 = vpop.f32.mrb[44].mxu0 }
 0x2ec   : > { %v8070_v28 = vpop.f32.mrb[45].mxu0 }
 0x2ed   : > { %v8072_v18 = vpop.f32.mrb[46].mxu0 }
 0x2ee   : > { %v8074_v21 = vpop.f32.mrb[47].mxu0 }
 0x356   : > { %v6261_v11 = vpop.f32.mrb[16].mxu1 }
 0x357   : > { %v6327_v61 = vadd.f32 %v6261_v11, %v6091_v25  ;;  %v4863_v14 = vpop.f32.mrb[17].mxu1 }
 0x358   : > { %v6328_v57 = vadd.f32 %v4863_v14, %v2560_v15  ;;  %v6262_v23 = vpop.f32.mrb[18].mxu1 }
 0x359   : > { %v5031_v38 = vadd.f32 %v6327_v61, %v8079_v4  ;;  %v6329_v5 = vadd.f32 %v6262_v23, %v6092_v52  ;;  %v4866_v8 = vpop.f32.mrb[19].mxu1 }
 0x35a   : > { %v5029_v59 = vadd.f32 %v6328_v57, %v8079_v4  ;;  %v6330_v26 = vadd.f32 %v4866_v8, %v2563_v51 }
 0x35b   : > { %v5032_v62 = vadd.f32 %v6329_v5, %v8079_v4  ;;  %v5063_v37 = vmax.f32 %v5031_v38, 0.0 }
 0x35c   : > { %v5030_v30 = vadd.f32 %v6330_v26, %v8079_v4  ;;  %v5061_v43 = vmax.f32 %v5029_v59, 0.0 }
 0x35d   : > { %v5064_v46 = vmax.f32 %v5032_v62, 0.0 }
 0x35e   : > { %v5062_v1 = vmax.f32 %v5030_v30, 0.0  ;;  %v6265_v42 = vpop.f32.mrb[20].mxu1 }
 0x35f   : > { %v5094_v47 = vpack.c.bf16 %v5064_v46, %v5063_v37  ;;  %v6331_v49 = vadd.f32 %v6265_v42, %v6095_v63  ;;  %v4879_v56 = vpop.f32.mrb[21].mxu1 }
 0x360   : > { %v5093_v17 = vpack.c.bf16 %v5062_v1, %v5061_v43  ;;  %v6332_v35 = vadd.f32 %v4879_v56, %v2576_v10  ;;  %v6266_v0 = vpop.f32.mrb[22].mxu1 }
 0x361   : > { %v5035_v48 = vadd.f32 %v6331_v49, %v8079_v4  ;;  %v6333_v40 = vadd.f32 %v6266_v0, %v6096_v6  ;;  %v4882_v34 = vpop.f32.mrb[23].mxu1 }
 0x362   : > { %v5033_v2 = vadd.f32 %v6332_v35, %v8079_v4  ;;  %v6334_v39 = vadd.f32 %v4882_v34, %v2579_v12  ;;  %6293 = vmatprep.mubr.msk.bf16.mxu0 %vm298_vm3, %v5093_v17 }
 0x363   : > { %v5036_v20 = vadd.f32 %v6333_v40, %v8079_v4  ;;  %6294 = vmatmul.mubr.msk.bf16.vlgmr.msra.gmra.mrb[64].mxu0 %vm298_vm3, %v5094_v47  ;;  %v5067_v60 = vmax.f32 %v5035_v48, 0.0 }
 0x364   : > { %v5034_v32 = vadd.f32 %v6334_v39, %v8079_v4  ;;  %v5065_v15 = vmax.f32 %v5033_v2, 0.0 }
 0x365   : > { %v5068_v25 = vmax.f32 %v5036_v20, 0.0 }
 0x366   : > { %v5066_v52 = vmax.f32 %v5034_v32, 0.0  ;;  %v6269_v51 = vpop.f32.mrb[24].mxu1 }
 0x367   : > { %v5096_v63 = vpack.c.bf16 %v5068_v25, %v5067_v60  ;;  %v6335_v10 = vadd.f32 %v6269_v51, %v6099_v36  ;;  %v4895_v6 = vpop.f32.mrb[25].mxu1 }
 0x368   : > { %v5095_v11 = vpack.c.bf16 %v5066_v52, %v5065_v15  ;;  %v6336_v61 = vadd.f32 %v4895_v6, %v2592_v29  ;;  %v6270_v14 = vpop.f32.mrb[26].mxu1 }
 0x369   : > { %v5039_v12 = vadd.f32 %v6335_v10, %v8079_v4  ;;  %v6337_v57 = vadd.f32 %v6270_v14, %v6100_v50  ;;  %v4898_v23 = vpop.f32.mrb[27].mxu1 }
 0x36a   : > { %v5037_v38 = vadd.f32 %v6336_v61, %v8079_v4  ;;  %v6338_v5 = vadd.f32 %v4898_v23, %v2595_v3  ;;  %6297 = vmatprep.mubr.msk.bf16.mxu0 %vm298_vm3, %v5095_v11 }
 0x36b   : > { %v5040_v8 = vadd.f32 %v6337_v57, %v8079_v4  ;;  %6298 = vmatmul.mubr.msk.bf16.gmra.mrb[68].mxu0 %vm298_vm3, %v5096_v63  ;;  %v5071_v36 = vmax.f32 %v5039_v12, 0.0 }
 0x36c   : > { %v5038_v59 = vadd.f32 %v6338_v5, %v8079_v4  ;;  %v5069_v62 = vmax.f32 %v5037_v38, 0.0 }
 0x36d   : > { %v5072_v26 = vmax.f32 %v5040_v8, 0.0 }
 0x36e   : > { %v5070_v29 = vmax.f32 %v5038_v59, 0.0  ;;  %v6273_v30 = vpop.f32.mrb[28].mxu1 }
 0x36f   : > { %v5098_v37 = vpack.c.bf16 %v5072_v26, %v5071_v36  ;;  %v6339_v50 = vadd.f32 %v6273_v30, %v8068_v45  ;;  %v4911_v46 = vpop.f32.mrb[29].mxu1 }
 0x370   : > { %v5097_v43 = vpack.c.bf16 %v5070_v29, %v5069_v62  ;;  %v6340_v3 = vadd.f32 %v4911_v46, %v8070_v28  ;;  %v6274_v1 = vpop.f32.mrb[30].mxu1 }
 0x371   : > { %v5043_v42 = vadd.f32 %v6339_v50, %v8079_v4  ;;  %v6341_v47 = vadd.f32 %v6274_v1, %v8072_v18  ;;  %v4914_v49 = vpop.f32.mrb[31].mxu1 }
 0x372   : > { %v5041_v56 = vadd.f32 %v6340_v3, %v8079_v4  ;;  %v6342_v17 = vadd.f32 %v4914_v49, %v8074_v21  ;;  %6301 = vmatprep.mubr.msk.bf16.mxu0 %vm298_vm3, %v5097_v43 }
 0x373   : > { %v5044_v35 = vadd.f32 %v6341_v47, %v8079_v4  ;;  %6302 = vmatmul.mubr.msk.bf16.gmra.mrb[72].mxu0 %vm298_vm3, %v5098_v37  ;;  %v5075_v0 = vmax.f32 %v5043_v42, 0.0 }
 0x374   : > { %v5042_v45 = vadd.f32 %v6342_v17, %v8079_v4  ;;  %v5073_v48 = vmax.f32 %v5041_v56, 0.0 }
 0x375   : > { %v5076_v28 = vmax.f32 %v5044_v35, 0.0 }
 0x376   : > { %v5074_v40 = vmax.f32 %v5042_v45, 0.0  ;;  %v6277_v34 = vpop.f32.mrb[0].mxu1 }
 0x377   : > { %v5100_v2 = vpack.c.bf16 %v5076_v28, %v5075_v0  ;;  %v6343_v18 = vadd.f32 %v6277_v34, %v8016_v27  ;;  %v4927_v39 = vpop.f32.mrb[1].mxu1 }
 0x378   : > { %v5099_v20 = vpack.c.bf16 %v5074_v40, %v5073_v48  ;;  %v6344_v21 = vadd.f32 %v4927_v39, %v8019_v41  ;;  %v6278_v32 = vpop.f32.mrb[2].mxu1 }
 0x379   : > { %v5047_v60 = vadd.f32 %v6343_v18, %v8079_v4  ;;  %v6345_v25 = vadd.f32 %v6278_v32, %v8021_v54  ;;  %v4930_v15 = vpop.f32.mrb[3].mxu1 }
 0x37a   : > { %v5045_v52 = vadd.f32 %v6344_v21, %v8079_v4  ;;  %v6346_v51 = vadd.f32 %v4930_v15, %v8025_v24  ;;  %6305 = vmatprep.mubr.msk.bf16.mxu0 %vm298_vm3, %v5099_v20 }
 0x37b   : > { %v5048_v63 = vadd.f32 %v6345_v25, %v8079_v4  ;;  %6306 = vmatmul.mubr.msk.bf16.gmra.mrb[76].mxu0 %vm298_vm3, %v5100_v2  ;;  %v5079_v10 = vmax.f32 %v5047_v60, 0.0 }
 0x37c   : > { %v5046_v27 = vadd.f32 %v6346_v51, %v8079_v4  ;;  %v5077_v6 = vmax.f32 %v5045_v52, 0.0 }
 0x37d   : > { %v5080_v41 = vmax.f32 %v5048_v63, 0.0  ;;  %v6707_v63 = vld [vmem:[%s6976_s15 + $0x8] sm:$0xff]  }
 0x37e   : > { %v5078_v11 = vmax.f32 %v5046_v27, 0.0  ;;  %v6281_v61 = vpop.f32.mrb[4].mxu1  ;;  %v5331_v27 = vunpack.c.l.bf16 %v6707_v63 }
 0x37f   : > { %v5102_v14 = vpack.c.bf16 %v5080_v41, %v5079_v10  ;;  %v6347_v54 = vadd.f32 %v6281_v61, %v8033_v31  ;;  %v4943_v12 = vpop.f32.mrb[5].mxu1  ;;  %v6708_v10 = vld [vmem:[%s6976_s15] sm:$0xff]   ;;  %v5332_v61 = vunpack.c.h.bf16 %v6707_v63 }
 0x380   : > { %v5101_v57 = vpack.c.bf16 %v5078_v11, %v5077_v6  ;;  %v6348_v24 = vadd.f32 %v4943_v12, %v8036_v7  ;;  %v6282_v23 = vpop.f32.mrb[6].mxu1  ;;  %v5329_v41 = vunpack.c.l.bf16 %v6708_v10 }
 0x381   : > { %v5051_v38 = vadd.f32 %v6347_v54, %v8079_v4  ;;  %v6349_v5 = vadd.f32 %v6282_v23, %v8039_v44  ;;  %v4946_v8 = vpop.f32.mrb[7].mxu1 }
 0x382   : > { %v5049_v59 = vadd.f32 %v6348_v24, %v8079_v4  ;;  %v6350_v36 = vadd.f32 %v4946_v8, %v8044_v53  ;;  %6309 = vmatprep.mubr.msk.bf16.mxu0 %vm298_vm3, %v5101_v57 }
 0x383   : > { %v5052_v26 = vadd.f32 %v6349_v5, %v8079_v4  ;;  %6310 = vmatmul.mubr.msk.bf16.gmra.mrb[80].mxu0 %vm298_vm3, %v5102_v14  ;;  %v5083_v62 = vmax.f32 %v5051_v38, 0.0  ;;  %v5330_v14 = vunpack.c.h.bf16 %v6708_v10  ;;  %v6713_v10 = vld [vmem:[%s6976_s15 + $0x38] sm:$0xff]  }
 0x384   : > { %v5050_v31 = vadd.f32 %v6350_v36, %v8079_v4  ;;  %v5081_v29 = vmax.f32 %v5049_v59, 0.0 }
 0x385   : > { %v5084_v7 = vmax.f32 %v5052_v26, 0.0 }
 0x386   : > { %v5082_v30 = vmax.f32 %v5050_v31, 0.0  ;;  %v6285_v37 = vpop.f32.mrb[8].mxu1 }
 0x387   : > { %v5104_v50 = vpack.c.bf16 %v5084_v7, %v5083_v62  ;;  %v6351_v44 = vadd.f32 %v6285_v37, %v8050_v22  ;;  %v4959_v46 = vpop.f32.mrb[9].mxu1  ;;  %v6709_v62 = vld [vmem:[%s6976_s15 + $0x18] sm:$0xff]   ;;  %v6710_v37 = vld [vmem:[%s6976_s15 + $0x10] sm:$0xff]  }
 0x388   : > { %v5103_v43 = vpack.c.bf16 %v5082_v30, %v5081_v29  ;;  %v6352_v53 = vadd.f32 %v4959_v46, %v8052_v55  ;;  %v6286_v3 = vpop.f32.mrb[10].mxu1  ;;  %v5335_v7 = vunpack.c.l.bf16 %v6709_v62 }
 0x389   : > { %v5055_v1 = vadd.f32 %v6351_v44, %v8079_v4  ;;  %v6353_v42 = vadd.f32 %v6286_v3, %v8054_v33  ;;  %v4962_v47 = vpop.f32.mrb[11].mxu1 }
 0x38a   : > { %v5053_v49 = vadd.f32 %v6352_v53, %v8079_v4  ;;  %v6354_v56 = vadd.f32 %v4962_v47, %v8056_v19  ;;  %6313 = vmatprep.mubr.msk.bf16.mxu0 %vm298_vm3, %v5103_v43  ;;  %v5336_v43 = vunpack.c.h.bf16 %v6709_v62 }
 0x38b   : > { %v5056_v17 = vadd.f32 %v6353_v42, %v8079_v4  ;;  %6314 = vmatmul.mubr.msk.bf16.gmra.mrb[84].mxu0 %vm298_vm3, %v5104_v50  ;;  %v5087_v35 = vmax.f32 %v5055_v1, 0.0  ;;  %v5333_v50 = vunpack.c.l.bf16 %v6710_v37  ;;  %v5334_v1 = vunpack.c.h.bf16 %v6710_v37 }
 0x38c   : > { %v5054_v22 = vadd.f32 %v6354_v56, %v8079_v4  ;;  %v5085_v45 = vmax.f32 %v5053_v49, 0.0 }
 0x38d   : > { %v5088_v55 = vmax.f32 %v5056_v17, 0.0 }
 0x38e   : > { %v5086_v0 = vmax.f32 %v5054_v22, 0.0  ;;  %v6289_v28 = vpop.f32.mrb[12].mxu1 }
 0x38f   : > { %v5106_v48 = vpack.c.bf16 %v5088_v55, %v5087_v35  ;;  %v6355_v33 = vadd.f32 %v6289_v28, %v8060_v58  ;;  %v4975_v40 = vpop.f32.mrb[13].mxu1  ;;  %v6711_v28 = vld [vmem:[%s6976_s15 + $0x28] sm:$0xff]  }
 0x390   : > { %v5105_v34 = vpack.c.bf16 %v5086_v0, %v5085_v45  ;;  %v6356_v19 = vadd.f32 %v4975_v40, %v8062_v16  ;;  %v6290_v2 = vpop.f32.mrb[14].mxu1 }
 0x391   : > { %v5059_v18 = vadd.f32 %v6355_v33, %v8079_v4  ;;  %v6357_v39 = vadd.f32 %v6290_v2, %v8064_v9  ;;  %v4978_v20 = vpop.f32.mrb[15].mxu1 }
 0x392   : > { %v5057_v21 = vadd.f32 %v6356_v19, %v8079_v4  ;;  %v6358_v32 = vadd.f32 %v4978_v20, %v8066_v13  ;;  %6317 = vmatprep.mubr.msk.bf16.mxu0 %vm298_vm3, %v5105_v34  ;;  %v8152_v13 = vld [vmem:[%s8326_s6] ss:$0 sm:$0xff] }
 0x393   : > { %v5060_v58 = vadd.f32 %v6357_v39, %v8079_v4  ;;  %6318 = vmatmul.mubr.msk.bf16.gmra.mrb[88].mxu0 %vm298_vm3, %v5106_v48  ;;  %v5091_v60 = vmax.f32 %v5059_v18, 0.0  ;;  %v5339_v48 = vunpack.c.l.bf16 %v6711_v28  ;;  %v6712_v34 = vld [vmem:[%s6976_s15 + $0x20] sm:$0xff]   ;;  %v5340_v39 = vunpack.c.h.bf16 %v6711_v28 }
 0x394   : > { %v5058_v16 = vadd.f32 %v6358_v32, %v8079_v4  ;;  %v5089_v15 = vmax.f32 %v5057_v21, 0.0  ;;  %v5337_v19 = vunpack.c.l.bf16 %v6712_v34  ;;  %v5338_v32 = vunpack.c.h.bf16 %v6712_v34 }
 0x395   : > { %v5092_v25 = vmax.f32 %v5060_v58, 0.0 }
 0x396   : > { %v5090_v9 = vmax.f32 %v5058_v16, 0.0 }
 0x397   : > { %v5108_v52 = vpack.c.bf16 %v5092_v25, %v5091_v60 }
 0x398   : > { %v5107_v51 = vpack.c.bf16 %v5090_v9, %v5089_v15 }
 0x39a   : > { %6321 = vmatprep.mubr.msk.bf16.mxu0 %vm298_vm3, %v5107_v51 }
 0x39b   : > { %6322 = vmatmul.mubr.msk.bf16.gmra.mrb[92].mxu0 %vm298_vm3, %v5108_v52 }
 0x436   : > { %v6295_v4 = vpop.f32.mrb[64].mxu0 }
 0x437   : > { %v5211_v6 = vadd.f32 %v6295_v4, %v8152_v13  ;;  %v5202_v11 = vpop.f32.mrb[65].mxu0 }
 0x438   : > { %v5203_v54 = vadd.f32 %v8152_v13, %v5202_v11  ;;  %v6296_v12 = vpop.f32.mrb[66].mxu0  ;;  %v6714_v11 = vld [vmem:[%s6976_s15 + $0x30] sm:$0xff]  }
 0x439   : > { %v5363_v57 = vadd.f32 %v5331_v27, %v5211_v6  ;;  %v5214_v24 = vadd.f32 %v6296_v12, %v8152_v13  ;;  %v5205_v23 = vpop.f32.mrb[67].mxu0  ;;  %v5344_v12 = vunpack.c.h.bf16 %v6713_v10 }
 0x43a   : > { %v5361_v38 = vadd.f32 %v5329_v41, %v5203_v54  ;;  %v5206_v5 = vadd.f32 %v8152_v13, %v5205_v23  ;;  %v5343_v41 = vunpack.c.l.bf16 %v6713_v10  ;;  %v5342_v23 = vunpack.c.h.bf16 %v6714_v11 }
 0x43b   : > { %v5395_v8 = vmax.f32 %v5363_v57, 0.0  ;;  %v5364_v59 = vadd.f32 %v5332_v61, %v5214_v24  ;;  %v5341_v61 = vunpack.c.l.bf16 %v6714_v11 }
 0x43c   : > { %v5393_v36 = vmax.f32 %v5361_v38, 0.0  ;;  %v5362_v26 = vadd.f32 %v5330_v14, %v5206_v5 }
 0x43d   : > { %5427 = vst.msk [vmem:[%s8161_s11 + $0x10] sm:$0xff] %vm466_vm0, %v5395_v8  ;;  %v5396_v31 = vmax.f32 %v5364_v59, 0.0 }
 0x43e   : > { %5425 = vst.msk [vmem:[%s8161_s11] sm:$0xff] %vm466_vm0, %v5393_v36  ;;  %v5394_v29 = vmax.f32 %v5362_v26, 0.0  ;;  %v6299_v30 = vpop.f32.mrb[68].mxu0 }
 0x43f   : > { %5428 = vst.msk [vmem:[%s8161_s11 + $0x18] sm:$0xff] %vm466_vm0, %v5396_v31  ;;  %v5227_v44 = vadd.f32 %v6299_v30, %v8152_v13  ;;  %v5218_v46 = vpop.f32.mrb[69].mxu0  ;;  %v6715_v30 = vld [vmem:[%s6976_s15 + $0x48] sm:$0xff]  }
 0x440   : > { %5426 = vst.msk [vmem:[%s8161_s11 + $0x8] sm:$0xff] %vm466_vm0, %v5394_v29  ;;  %v5219_v53 = vadd.f32 %v8152_v13, %v5218_v46  ;;  %v6300_v3 = vpop.f32.mrb[70].mxu0  ;;  %v5347_v37 = vunpack.c.l.bf16 %v6715_v30  ;;  %v6716_v46 = vld [vmem:[%s6976_s15 + $0x40] sm:$0xff]  }
 0x441   : > { %v5367_v42 = vadd.f32 %v5335_v7, %v5227_v44  ;;  %v5230_v47 = vadd.f32 %v6300_v3, %v8152_v13  ;;  %v5221_v49 = vpop.f32.mrb[71].mxu0 }
 0x442   : > { %v5365_v56 = vadd.f32 %v5333_v50, %v5219_v53  ;;  %v5222_v17 = vadd.f32 %v8152_v13, %v5221_v49  ;;  %v5346_v49 = vunpack.c.h.bf16 %v6716_v46 }
 0x443   : > { %v5399_v22 = vmax.f32 %v5367_v42, 0.0  ;;  %v5368_v35 = vadd.f32 %v5336_v43, %v5230_v47  ;;  %v5345_v43 = vunpack.c.l.bf16 %v6716_v46 }
 0x444   : > { %v5397_v55 = vmax.f32 %v5365_v56, 0.0  ;;  %v5366_v45 = vadd.f32 %v5334_v1, %v5222_v17  ;;  %v5348_v1 = vunpack.c.h.bf16 %v6715_v30 }
 0x445   : > { %5431 = vst.msk [vmem:[%s8161_s11 + $0x30] sm:$0xff] %vm466_vm0, %v5399_v22  ;;  %v5400_v0 = vmax.f32 %v5368_v35, 0.0 }
 0x446   : > { %5429 = vst.msk [vmem:[%s8161_s11 + $0x20] sm:$0xff] %vm466_vm0, %v5397_v55  ;;  %v5398_v33 = vmax.f32 %v5366_v45, 0.0  ;;  %v6303_v40 = vpop.f32.mrb[72].mxu0 }
 0x447   : > { %5432 = vst.msk [vmem:[%s8161_s11 + $0x38] sm:$0xff] %vm466_vm0, %v5400_v0  ;;  %v5243_v2 = vadd.f32 %v6303_v40, %v8152_v13  ;;  %v5234_v18 = vpop.f32.mrb[73].mxu0  ;;  %v6717_v40 = vld [vmem:[%s6976_s15 + $0x58] sm:$0xff]  }
 0x448   : > { %5430 = vst.msk [vmem:[%s8161_s11 + $0x28] sm:$0xff] %vm466_vm0, %v5398_v33  ;;  %v5235_v20 = vadd.f32 %v8152_v13, %v5234_v18  ;;  %v6304_v21 = vpop.f32.mrb[74].mxu0  ;;  %v5351_v34 = vunpack.c.l.bf16 %v6717_v40  ;;  %v6718_v18 = vld [vmem:[%s6976_s15 + $0x50] sm:$0xff]  }
 0x449   : > { %v5371_v58 = vadd.f32 %v5339_v48, %v5243_v2  ;;  %v5246_v16 = vadd.f32 %v6304_v21, %v8152_v13  ;;  %v5237_v60 = vpop.f32.mrb[75].mxu0 }
 0x44a   : > { %v5369_v25 = vadd.f32 %v5337_v19, %v5235_v20  ;;  %v5238_v15 = vadd.f32 %v8152_v13, %v5237_v60  ;;  %v5350_v60 = vunpack.c.h.bf16 %v6718_v18 }
 0x44b   : > { %v5403_v9 = vmax.f32 %v5371_v58, 0.0  ;;  %v5372_v52 = vadd.f32 %v5340_v39, %v5246_v16  ;;  %v5349_v39 = vunpack.c.l.bf16 %v6718_v18 }
 0x44c   : > { %v5401_v51 = vmax.f32 %v5369_v25, 0.0  ;;  %v5370_v63 = vadd.f32 %v5338_v32, %v5238_v15  ;;  %v5352_v32 = vunpack.c.h.bf16 %v6717_v40 }
 0x44d   : > { %5435 = vst.msk [vmem:[%s8161_s11 + $0x50] sm:$0xff] %vm466_vm0, %v5403_v9  ;;  %v5404_v27 = vmax.f32 %v5372_v52, 0.0 }
 0x44e   : > { %5433 = vst.msk [vmem:[%s8161_s11 + $0x40] sm:$0xff] %vm466_vm0, %v5401_v51  ;;  %v5402_v4 = vmax.f32 %v5370_v63, 0.0  ;;  %v6307_v6 = vpop.f32.mrb[76].mxu0 }
 0x44f   : > { %5436 = vst.msk [vmem:[%s8161_s11 + $0x58] sm:$0xff] %vm466_vm0, %v5404_v27  ;;  %v5259_v14 = vadd.f32 %v6307_v6, %v8152_v13  ;;  %v5250_v54 = vpop.f32.mrb[77].mxu0  ;;  %v6719_v6 = vld [vmem:[%s6976_s15 + $0x68] sm:$0xff]  }
 0x450   : > { %5434 = vst.msk [vmem:[%s8161_s11 + $0x48] sm:$0xff] %vm466_vm0, %v5402_v4  ;;  %v5251_v57 = vadd.f32 %v8152_v13, %v5250_v54  ;;  %v6308_v24 = vpop.f32.mrb[78].mxu0  ;;  %v5355_v11 = vunpack.c.l.bf16 %v6719_v6  ;;  %v6720_v54 = vld [vmem:[%s6976_s15 + $0x60] sm:$0xff]  }
 0x451   : > { %v5375_v38 = vadd.f32 %v5343_v41, %v5259_v14  ;;  %v5262_v5 = vadd.f32 %v6308_v24, %v8152_v13  ;;  %v5253_v8 = vpop.f32.mrb[79].mxu0 }
 0x452   : > { %v5373_v59 = vadd.f32 %v5341_v61, %v5251_v57  ;;  %v5254_v36 = vadd.f32 %v8152_v13, %v5253_v8  ;;  %v5354_v8 = vunpack.c.h.bf16 %v6720_v54 }
 0x453   : > { %v5407_v26 = vmax.f32 %v5375_v38, 0.0  ;;  %v5376_v31 = vadd.f32 %v5344_v12, %v5262_v5  ;;  %v5353_v12 = vunpack.c.l.bf16 %v6720_v54 }
 0x454   : > { %v5405_v62 = vmax.f32 %v5373_v59, 0.0  ;;  %v5374_v7 = vadd.f32 %v5342_v23, %v5254_v36  ;;  %v5356_v23 = vunpack.c.h.bf16 %v6719_v6 }
 0x455   : > { %5439 = vst.msk [vmem:[%s8161_s11 + $0x70] sm:$0xff] %vm466_vm0, %v5407_v26  ;;  %v5408_v29 = vmax.f32 %v5376_v31, 0.0 }
 0x456   : > { %5437 = vst.msk [vmem:[%s8161_s11 + $0x60] sm:$0xff] %vm466_vm0, %v5405_v62  ;;  %v5406_v50 = vmax.f32 %v5374_v7, 0.0  ;;  %v6311_v44 = vpop.f32.mrb[80].mxu0 }
 0x457   : > { %5440 = vst.msk [vmem:[%s8161_s11 + $0x78] sm:$0xff] %vm466_vm0, %v5408_v29  ;;  %v5275_v53 = vadd.f32 %v6311_v44, %v8152_v13  ;;  %v5266_v3 = vpop.f32.mrb[81].mxu0  ;;  %v6721_v44 = vld [vmem:[%s6976_s15 + $0x78] sm:$0xff]  }
 0x458   : > { %5438 = vst.msk [vmem:[%s8161_s11 + $0x68] sm:$0xff] %vm466_vm0, %v5406_v50  ;;  %v5267_v42 = vadd.f32 %v8152_v13, %v5266_v3  ;;  %v6312_v47 = vpop.f32.mrb[82].mxu0  ;;  %v5359_v46 = vunpack.c.l.bf16 %v6721_v44  ;;  %v6722_v3 = vld [vmem:[%s6976_s15 + $0x70] sm:$0xff]   ;;  %s5763_s15 = sshll.u32 %s6889_s28, 12  ;;  %s5458_s28 = scalar_lea.sflag [#allocation5], %s6972_s16 }
 0x459   : > { %v5379_v56 = vadd.f32 %v5347_v37, %v5275_v53  ;;  %v5278_v17 = vadd.f32 %v6312_v47, %v8152_v13  ;;  %v5269_v22 = vpop.f32.mrb[83].mxu0  ;;  %s8268_s22 = scalar_lea.hbm %s8327_s7, %s5763_s15 }
 0x45a   : > { %v5377_v35 = vadd.f32 %v5345_v43, %v5267_v42  ;;  %v5270_v55 = vadd.f32 %v8152_v13, %v5269_v22  ;;  %v5358_v22 = vunpack.c.h.bf16 %v6722_v3 }
 0x45b   : > { %v5411_v45 = vmax.f32 %v5379_v56, 0.0  ;;  %v5380_v0 = vadd.f32 %v5348_v1, %v5278_v17  ;;  %v5357_v1 = vunpack.c.l.bf16 %v6722_v3 }
 0x45c   : > { %v5409_v28 = vmax.f32 %v5377_v35, 0.0  ;;  %v5378_v48 = vadd.f32 %v5346_v49, %v5270_v55  ;;  %v5360_v49 = vunpack.c.h.bf16 %v6721_v44 }
 0x45d   : > { %5443 = vst.msk [vmem:[%s8161_s11 + $0x90] sm:$0xff] %vm466_vm0, %v5411_v45  ;;  %v5412_v33 = vmax.f32 %v5380_v0, 0.0 }
 0x45e   : > { %5441 = vst.msk [vmem:[%s8161_s11 + $0x80] sm:$0xff] %vm466_vm0, %v5409_v28  ;;  %v5410_v19 = vmax.f32 %v5378_v48, 0.0  ;;  %v6315_v2 = vpop.f32.mrb[84].mxu0 }
 0x45f   : > { %5444 = vst.msk [vmem:[%s8161_s11 + $0x98] sm:$0xff] %vm466_vm0, %v5412_v33  ;;  %v5291_v20 = vadd.f32 %v6315_v2, %v8152_v13  ;;  %v5282_v21 = vpop.f32.mrb[85].mxu0 }
 0x460   : > { %5442 = vst.msk [vmem:[%s8161_s11 + $0x88] sm:$0xff] %vm466_vm0, %v5410_v19  ;;  %v5283_v58 = vadd.f32 %v8152_v13, %v5282_v21  ;;  %v6316_v16 = vpop.f32.mrb[86].mxu0 }
 0x461   : > { %v5383_v25 = vadd.f32 %v5351_v34, %v5291_v20  ;;  %v5294_v15 = vadd.f32 %v6316_v16, %v8152_v13  ;;  %v5285_v9 = vpop.f32.mrb[87].mxu0 }
 0x462   : > { %v5381_v52 = vadd.f32 %v5349_v39, %v5283_v58  ;;  %v5286_v51 = vadd.f32 %v8152_v13, %v5285_v9 }
 0x463   : > { %v5415_v63 = vmax.f32 %v5383_v25, 0.0  ;;  %v5384_v27 = vadd.f32 %v5352_v32, %v5294_v15 }
 0x464   : > { %v5413_v10 = vmax.f32 %v5381_v52, 0.0  ;;  %v5382_v41 = vadd.f32 %v5350_v60, %v5286_v51 }
 0x465   : > { %5447 = vst.msk [vmem:[%s8161_s11 + $0xb0] sm:$0xff] %vm466_vm0, %v5415_v63  ;;  %v5416_v4 = vmax.f32 %v5384_v27, 0.0 }
 0x466   : > { %5445 = vst.msk [vmem:[%s8161_s11 + $0xa0] sm:$0xff] %vm466_vm0, %v5413_v10  ;;  %v5414_v61 = vmax.f32 %v5382_v41, 0.0  ;;  %v6319_v14 = vpop.f32.mrb[88].mxu0 }
 0x467   : > { %5448 = vst.msk [vmem:[%s8161_s11 + $0xb8] sm:$0xff] %vm466_vm0, %v5416_v4  ;;  %v5307_v57 = vadd.f32 %v6319_v14, %v8152_v13  ;;  %v5298_v24 = vpop.f32.mrb[89].mxu0 }
 0x468   : > { %5446 = vst.msk [vmem:[%s8161_s11 + $0xa8] sm:$0xff] %vm466_vm0, %v5414_v61  ;;  %v5299_v38 = vadd.f32 %v8152_v13, %v5298_v24  ;;  %v6320_v5 = vpop.f32.mrb[90].mxu0 }
 0x469   : > { %v5387_v59 = vadd.f32 %v5355_v11, %v5307_v57  ;;  %v5310_v36 = vadd.f32 %v6320_v5, %v8152_v13  ;;  %v5301_v26 = vpop.f32.mrb[91].mxu0 }
 0x46a   : > { %v5385_v31 = vadd.f32 %v5353_v12, %v5299_v38  ;;  %v5302_v62 = vadd.f32 %v8152_v13, %v5301_v26 }
 0x46b   : > { %v5419_v7 = vmax.f32 %v5387_v59, 0.0  ;;  %v5388_v29 = vadd.f32 %v5356_v23, %v5310_v36 }
 0x46c   : > { %v5417_v30 = vmax.f32 %v5385_v31, 0.0  ;;  %v5386_v37 = vadd.f32 %v5354_v8, %v5302_v62 }
 0x46d   : > { %5451 = vst.msk [vmem:[%s8161_s11 + $0xd0] sm:$0xff] %vm466_vm0, %v5419_v7  ;;  %v5420_v50 = vmax.f32 %v5388_v29, 0.0 }
 0x46e   : > { %5449 = vst.msk [vmem:[%s8161_s11 + $0xc0] sm:$0xff] %vm466_vm0, %v5417_v30  ;;  %v5418_v43 = vmax.f32 %v5386_v37, 0.0  ;;  %v6323_v53 = vpop.f32.mrb[92].mxu0 }
 0x46f   : > { %5452 = vst.msk [vmem:[%s8161_s11 + $0xd8] sm:$0xff] %vm466_vm0, %v5420_v50  ;;  %v5323_v42 = vadd.f32 %v6323_v53, %v8152_v13  ;;  %v5314_v47 = vpop.f32.mrb[93].mxu0 }
 0x470   : > { %5450 = vst.msk [vmem:[%s8161_s11 + $0xc8] sm:$0xff] %vm466_vm0, %v5418_v43  ;;  %v5315_v56 = vadd.f32 %v8152_v13, %v5314_v47  ;;  %v6324_v17 = vpop.f32.mrb[94].mxu0 }
 0x471   : > { %v5391_v35 = vadd.f32 %v5359_v46, %v5323_v42  ;;  %v5326_v55 = vadd.f32 %v6324_v17, %v8152_v13  ;;  %v5317_v45 = vpop.f32.mrb[95].mxu0 }
 0x472   : > { %v5389_v0 = vadd.f32 %v5357_v1, %v5315_v56  ;;  %v5318_v28 = vadd.f32 %v8152_v13, %v5317_v45 }
 0x473   : > { %v5423_v48 = vmax.f32 %v5391_v35, 0.0  ;;  %v5392_v33 = vadd.f32 %v5360_v49, %v5326_v55 }
 0x474   : > { %v5421_v40 = vmax.f32 %v5389_v0, 0.0  ;;  %v5390_v34 = vadd.f32 %v5358_v22, %v5318_v28 }
 0x475   : > { %5455 = vst.msk [vmem:[%s8161_s11 + $0xf0] sm:$0xff] %vm466_vm0, %v5423_v48  ;;  %v5424_v19 = vmax.f32 %v5392_v33, 0.0 }
 0x476   : > { %5453 = vst.msk [vmem:[%s8161_s11 + $0xe0] sm:$0xff] %vm466_vm0, %v5421_v40  ;;  %v5422_v13 = vmax.f32 %v5390_v34, 0.0 }
 0x477   : > { %5456 = vst.msk [vmem:[%s8161_s11 + $0xf8] sm:$0xff] %vm466_vm0, %v5424_v19 }
 0x478   : > { %5454 = vst.msk [vmem:[%s8161_s11 + $0xe8] sm:$0xff] %vm466_vm0, %v5422_v13 }
 0x479   : > { %6766 = shalt.err (!%p6763_p2)
}
 0x47a   : > { %s6767_s21 = scalar_lea.hbm %s8268_s22, 4096  ;;  %s6771_s11 = scalar_lea.hbm %s8327_s7, 8192 }
 0x47b   : > { %p6768_p4 = scmp.ne.s32.totalorder %s8268_s22, %s6767_s21  ;;  %p6772_p9 = scmp.lt.u32.totalorder %s8268_s22, %s8327_s7 }
 0x47c   : > { %p6773_p1 = scmp.lt.u32.totalorder %s6771_s11, %s6767_s21  ;;  %p6775_p6 = scmp.lt.u32.totalorder %s6767_s21, %s8268_s22 }
 0x47d   : > { %p6769_p5 = pnand %p6768_p4, %p8334_p11 }
 0x47e   : > { %p6774_p3 = por %p6773_p1, %p6772_p9 }
 0x47f   : > { %p6770_p7 = pneg %p6769_p5 }
 0x480   : > { %p6776_p12 = por %p6775_p6, %p6774_p3 }
 0x482   : > { %p6777_p13 = pnand %p6776_p12, %p6770_p7 }
 0x484   : > { %6780 = shalt.err (!%p6777_p13)
}
 0x485   : > { %s6826_s20 = smov 128   ;;  %s6827_s12 = smov 8  }
 0x486   : > { %6596 = dma.vmem_to_hbm [thread:$0]  (%p8334_p11), %s8270_s17, 4096, %s8268_s22, %s5458_s28, %s6826_s20, %s6826_s20, %s6827_s12  }
 0x487 PF: > { %s5486_s23 = sand.u32 1, %s6807_s24   ;;  %p8335_p8 = scmp.ne.s32.totalorder %s8332_s14, 0 }
 0x488   : > { %p8336_p10 = scmp.ge.s32.totalorder %s6819_s27, 2  ;;  %s5487_s29 = scalar_lea.sflag [#allocation5], %s5486_s23 }
 0x48a   : > { %p6603_p0 = pnand %p8336_p10, %p8335_p8 }
 0x48c   : > { %6802 = dma.done.wait (!%p6603_p0), %s5487_s29, 4096  }
 0x48d   : > { %6804 = vsyncadd (!%p6603_p0), %s5487_s29, 4294963200  ;;  %p20_p2 = scmp.ge.s32.totalorder %s6893_s30, 4   ;;  %s8337_s24 = smov %s6811_s25 }
 0x48e   : > { %s8338_s25 = smov %s6815_s26  ;;  %s8339_s26 = smov %s6905_s10 }
 0x48f   : > { %s8340_s27 = smov %s6893_s30  ;;  %22 = sbr.rel (!%p20_p2) target bundleno = 5 (0x5), region = 104 }
 0x496   :  { %5492 = vsyncpa [#allocation4], 1 }
 0x497   :  { %5494 = vsyncpa [#allocation4 + $0x1], 1 }
 0x498   :  { %5495 = vsyncpa [#allocation5], 1 }
 0x499   :  { %5497 = vsyncpa [#allocation5 + $0x1], 1 }

</bundles_post_ra>
